<compile_context>
chip_gen: v5e
topology: v5e:2x2
jax: 0.10.0
libtpu: 0.0.40
codegen_flags: <defaults>
</compile_context>

<pallas_src>
import jax
import jax.numpy as jnp
from jax.experimental import pallas as pl
from jax.experimental.pallas import tpu as pltpu

D_T = 768        # t_in in_features
D_V = 1000       # v_in in_features
D_V_PAD = 1024   # padded to a lane multiple
D_HID = 512      # hidden width of both branches
D_CAT = 1024     # concat width (= fc_out in_features)
D_OUT = 100      # fc_out out_features
D_OUT_PAD = 128  # lane-dense padded output width


def _round_up(n, m):
    return (n + m - 1) // m * m


def concat_fusion_kernel(x_ref, y_ref,
                         wt_ref, bt_ref,
                         wv_ref, bv_ref,
                         wot_ref, wov_ref, bo_ref,
                         xo_ref, yo_ref, out_ref):
    # Activations cast to bf16 in-kernel (cheap VPU cast); weights arrive bf16.
    xb = x_ref[...].astype(jnp.bfloat16)
    yb = y_ref[...].astype(jnp.bfloat16)

    # Branch matmuls: bf16 x bf16 -> f32 accumulate, bias add in f32.
    xt = jnp.dot(xb, wt_ref[...], preferred_element_type=jnp.float32) + bt_ref[...]
    yv = jnp.dot(yb, wv_ref[...], preferred_element_type=jnp.float32) + bv_ref[...]

    # These are part of the module's return value, so they must hit HBM (f32).
    xo_ref[...] = xt
    yo_ref[...] = yv

    # Fused torch.cat + fc_out: the concat never materializes; instead the
    # fc_out weight is pre-split into its top/bottom 512 rows and the two
    # halves are accumulated in f32 on the MXU.
    out_ref[...] = (
        jnp.dot(xt.astype(jnp.bfloat16), wot_ref[...],
                preferred_element_type=jnp.float32)
        + jnp.dot(yv.astype(jnp.bfloat16), wov_ref[...],
                  preferred_element_type=jnp.float32)
        + bo_ref[...]
    )


def concat_fusion(x, y, params, *, tile_b=512):
    """x: (B, 768) f32, y: (B, 1000) f32. Returns (xt, yv, out) in f32."""
    B = x.shape[0]
    wt, bt = params["wt"], params["bt"]
    wv, bv = params["wv"], params["bv"]
    wot, wov, bo = params["wot"], params["wov"], params["bo"]

    tb = min(tile_b, _round_up(B, 8))
    Bp = _round_up(B, tb)

    xp = x if Bp == B else jnp.pad(x, ((0, Bp - B), (0, 0)))
    # Pad batch and pad K 1000 -> 1024 (zero cols match the zero rows in wv).
    yp = jnp.pad(y, ((0, Bp - B), (0, D_V_PAD - D_V)))

    act = lambda i: (i, 0)   # batch-tiled activations / outputs
    rep = lambda i: (0, 0)   # weights/biases: VMEM-resident across grid steps

    xt_p, yv_p, out_p = pl.pallas_call(
        concat_fusion_kernel,
        out_shape=(
            jax.ShapeDtypeStruct((Bp, D_HID), jnp.float32),      # xt
            jax.ShapeDtypeStruct((Bp, D_HID), jnp.float32),      # yv
            jax.ShapeDtypeStruct((Bp, D_OUT_PAD), jnp.float32),  # out (padded)
        ),
        grid_spec=pltpu.PrefetchScalarGridSpec(
            num_scalar_prefetch=0,
            grid=(Bp // tb,),
            in_specs=[
                pl.BlockSpec((tb, D_T), act),            # x tile
                pl.BlockSpec((tb, D_V_PAD), act),        # y tile (K padded)
                pl.BlockSpec((D_T, D_HID), rep),         # wt (bf16)
                pl.BlockSpec((1, D_HID), rep),           # bt
                pl.BlockSpec((D_V_PAD, D_HID), rep),     # wv (bf16, K padded)
                pl.BlockSpec((1, D_HID), rep),           # bv
                pl.BlockSpec((D_HID, D_OUT_PAD), rep),   # wo top half (bf16, N padded)
                pl.BlockSpec((D_HID, D_OUT_PAD), rep),   # wo bottom half (bf16, N padded)
                pl.BlockSpec((1, D_OUT_PAD), rep),       # bo (N padded)
            ],
            out_specs=[
                pl.BlockSpec((tb, D_HID), act),
                pl.BlockSpec((tb, D_HID), act),
                pl.BlockSpec((tb, D_OUT_PAD), act),
            ],
        ),
        compiler_params=pltpu.CompilerParams(
            dimension_semantics=("parallel",),        # megacore/2-TC sharding
            vmem_limit_bytes=32 * 1024 * 1024,        # safe on v5e/v6e/v7x
        ),
    )(xp, yp, wt, bt, wv, bv, wot, wov, bo)

    return xt_p[:B], yv_p[:B], out_p[:B, :D_OUT]


def init_params(key):
    """Synthetic init matching nn.Linear shapes (W stored transposed, bf16,
    K/N padding and the fc_out split done once here instead of per call)."""
    ks = jax.random.split(key, 6)

    def linear(kw, kb, fan_in, fan_out):
        bound = 1.0 / jnp.sqrt(fan_in)
        w = jax.random.uniform(kw, (fan_in, fan_out), jnp.float32, -bound, bound)
        b = jax.random.uniform(kb, (1, fan_out), jnp.float32, -bound, bound)
        return w, b

    wt, bt = linear(ks[0], ks[1], D_T, D_HID)    # t_in
    wv, bv = linear(ks[2], ks[3], D_V, D_HID)    # v_in
    wo, bo = linear(ks[4], ks[5], D_CAT, D_OUT)  # fc_out

    wv_p = jnp.pad(wv, ((0, D_V_PAD - D_V), (0, 0)))          # K: 1000 -> 1024
    wo_p = jnp.pad(wo, ((0, 0), (0, D_OUT_PAD - D_OUT)))      # N: 100 -> 128
    bo_p = jnp.pad(bo, ((0, 0), (0, D_OUT_PAD - D_OUT)))

    return {
        "wt": wt.astype(jnp.bfloat16), "bt": bt,
        "wv": wv_p.astype(jnp.bfloat16), "bv": bv,
        "wot": wo_p[:D_HID].astype(jnp.bfloat16),   # fc_out rows for x branch
        "wov": wo_p[D_HID:].astype(jnp.bfloat16),   # fc_out rows for y branch
        "bo": bo_p,
    }


if __name__ == "__main__":
    key = jax.random.PRNGKey(0)
    k_p, k_x, k_y = jax.random.split(key, 3)

    params = init_params(k_p)

    B = 8
    x = jax.random.normal(k_x, (B, D_T), jnp.float32)
    y = jax.random.normal(k_y, (B, D_V), jnp.float32)

    xt, yv, out = jax.block_until_ready(concat_fusion(x, y, params))

    # Reference in plain JAX with the same bf16 weight/activation rounding.
    wt32 = params["wt"].astype(jnp.float32)
    wv32 = params["wv"].astype(jnp.float32)
    wo32 = jnp.concatenate([params["wot"], params["wov"]], axis=0).astype(jnp.float32)
    xb = x.astype(jnp.bfloat16).astype(jnp.float32)
    yb = jnp.pad(y, ((0, 0), (0, D_V_PAD - D_V))).astype(jnp.bfloat16).astype(jnp.float32)

    xt_ref = xb @ wt32 + params["bt"]
    yv_ref = yb @ wv32 + params["bv"]
    cat = jnp.concatenate([xt_ref, yv_ref], axis=1).astype(jnp.bfloat16).astype(jnp.float32)
    out_ref = (cat @ wo32 + params["bo"])[:, :D_OUT]

    assert xt.shape == (B, D_HID) and yv.shape == (B, D_HID) and out.shape == (B, D_OUT)
    assert jnp.allclose(xt, xt_ref, atol=2e-2, rtol=2e-2)
    assert jnp.allclose(yv, yv_ref, atol=2e-2, rtol=2e-2)
    assert jnp.allclose(out, out_ref, atol=2e-2, rtol=2e-2)

    print("KERNEL_OK")
</pallas_src>

<mosaic_0001>
module attributes {stable_mosaic.version = 11 : i64} {
  func.func @concat_fusion_kernel(%arg0: i32, %arg1: memref<8x768xf32, #tpu.memory_space<vmem>>, %arg2: memref<8x1024xf32, #tpu.memory_space<vmem>>, %arg3: memref<768x512xbf16, #tpu.memory_space<vmem>>, %arg4: memref<1x512xf32, #tpu.memory_space<vmem>>, %arg5: memref<1024x512xbf16, #tpu.memory_space<vmem>>, %arg6: memref<1x512xf32, #tpu.memory_space<vmem>>, %arg7: memref<512x128xbf16, #tpu.memory_space<vmem>>, %arg8: memref<512x128xbf16, #tpu.memory_space<vmem>>, %arg9: memref<1x128xf32, #tpu.memory_space<vmem>>, %arg10: memref<8x512xf32, #tpu.memory_space<vmem>>, %arg11: memref<8x512xf32, #tpu.memory_space<vmem>>, %arg12: memref<8x128xf32, #tpu.memory_space<vmem>>) attributes {dimension_semantics = [#tpu.dimension_semantics<parallel>], iteration_bounds = array<i64: 1>, scalar_prefetch = 0 : i64, scratch_operands = 0 : i64, tpu.core_type = #tpu.core_type<tc>, window_params = [{transform_indices = @transform_0, window_bounds = array<i64: 8, 768>}, {transform_indices = @transform_1, window_bounds = array<i64: 8, 1024>}, {pipeline_mode = #tpu.pipeline_mode<synchronous>, transform_indices = @transform_2, window_bounds = array<i64: 768, 512>}, {pipeline_mode = #tpu.pipeline_mode<synchronous>, transform_indices = @transform_3, window_bounds = array<i64: 1, 512>}, {pipeline_mode = #tpu.pipeline_mode<synchronous>, transform_indices = @transform_4, window_bounds = array<i64: 1024, 512>}, {pipeline_mode = #tpu.pipeline_mode<synchronous>, transform_indices = @transform_5, window_bounds = array<i64: 1, 512>}, {pipeline_mode = #tpu.pipeline_mode<synchronous>, transform_indices = @transform_6, window_bounds = array<i64: 512, 128>}, {pipeline_mode = #tpu.pipeline_mode<synchronous>, transform_indices = @transform_7, window_bounds = array<i64: 512, 128>}, {pipeline_mode = #tpu.pipeline_mode<synchronous>, transform_indices = @transform_8, window_bounds = array<i64: 1, 128>}, {transform_indices = @transform_9, window_bounds = array<i64: 8, 512>}, {transform_indices = @transform_10, window_bounds = array<i64: 8, 512>}, {transform_indices = @transform_11, window_bounds = array<i64: 8, 128>}]} {
    %c0 = arith.constant 0 : index
    %c0_0 = arith.constant 0 : index
    %0 = vector.load %arg1[%c0, %c0_0] : memref<8x768xf32, #tpu.memory_space<vmem>>, vector<8x768xf32>
    %1 = arith.truncf %0 : vector<8x768xf32> to vector<8x768xbf16>
    %c0_1 = arith.constant 0 : index
    %c0_2 = arith.constant 0 : index
    %2 = vector.load %arg2[%c0_1, %c0_2] : memref<8x1024xf32, #tpu.memory_space<vmem>>, vector<8x1024xf32>
    %3 = arith.truncf %2 : vector<8x1024xf32> to vector<8x1024xbf16>
    %c0_3 = arith.constant 0 : index
    %c0_4 = arith.constant 0 : index
    %4 = vector.load %arg3[%c0_3, %c0_4] : memref<768x512xbf16, #tpu.memory_space<vmem>>, vector<768x512xbf16>
    %cst = arith.constant dense<0.000000e+00> : vector<8x512xf32>
    %5 = tpu.matmul %1, %4, %cst {dimension_numbers = #tpu.dot_dimension_numbers<[1], [0], [0], [1], [0, 0, 1, 1], [], []>} : vector<8x768xbf16>, vector<768x512xbf16>, vector<8x512xf32> -> vector<8x512xf32>
    %c0_5 = arith.constant 0 : index
    %c0_6 = arith.constant 0 : index
    %6 = vector.load %arg4[%c0_5, %c0_6] : memref<1x512xf32, #tpu.memory_space<vmem>>, vector<1x512xf32>
    %7 = vector.broadcast %6 : vector<1x512xf32> to vector<8x512xf32>
    %8 = arith.addf %5, %7 : vector<8x512xf32>
    %c0_7 = arith.constant 0 : index
    %c0_8 = arith.constant 0 : index
    %9 = vector.load %arg5[%c0_7, %c0_8] : memref<1024x512xbf16, #tpu.memory_space<vmem>>, vector<1024x512xbf16>
    %cst_9 = arith.constant dense<0.000000e+00> : vector<8x512xf32>
    %10 = tpu.matmul %3, %9, %cst_9 {dimension_numbers = #tpu.dot_dimension_numbers<[1], [0], [0], [1], [0, 0, 1, 1], [], []>} : vector<8x1024xbf16>, vector<1024x512xbf16>, vector<8x512xf32> -> vector<8x512xf32>
    %c0_10 = arith.constant 0 : index
    %c0_11 = arith.constant 0 : index
    %11 = vector.load %arg6[%c0_10, %c0_11] : memref<1x512xf32, #tpu.memory_space<vmem>>, vector<1x512xf32>
    %12 = vector.broadcast %11 : vector<1x512xf32> to vector<8x512xf32>
    %13 = arith.addf %10, %12 : vector<8x512xf32>
    %c0_12 = arith.constant 0 : index
    %c0_13 = arith.constant 0 : index
    %14 = vector.load %arg10[%c0_12, %c0_13] : memref<8x512xf32, #tpu.memory_space<vmem>>, vector<8x512xf32>
    tpu.vector_store %arg10[%c0_12, %c0_13], %8 {strides = array<i32>} : memref<8x512xf32, #tpu.memory_space<vmem>>, vector<8x512xf32>,
    %c0_14 = arith.constant 0 : index
    %c0_15 = arith.constant 0 : index
    %15 = vector.load %arg11[%c0_14, %c0_15] : memref<8x512xf32, #tpu.memory_space<vmem>>, vector<8x512xf32>
    tpu.vector_store %arg11[%c0_14, %c0_15], %13 {strides = array<i32>} : memref<8x512xf32, #tpu.memory_space<vmem>>, vector<8x512xf32>,
    %16 = arith.truncf %8 : vector<8x512xf32> to vector<8x512xbf16>
    %c0_16 = arith.constant 0 : index
    %c0_17 = arith.constant 0 : index
    %17 = vector.load %arg7[%c0_16, %c0_17] : memref<512x128xbf16, #tpu.memory_space<vmem>>, vector<512x128xbf16>
    %cst_18 = arith.constant dense<0.000000e+00> : vector<8x128xf32>
    %18 = tpu.matmul %16, %17, %cst_18 {dimension_numbers = #tpu.dot_dimension_numbers<[1], [0], [0], [1], [0, 0, 1, 1], [], []>} : vector<8x512xbf16>, vector<512x128xbf16>, vector<8x128xf32> -> vector<8x128xf32>
    %19 = arith.truncf %13 : vector<8x512xf32> to vector<8x512xbf16>
    %c0_19 = arith.constant 0 : index
    %c0_20 = arith.constant 0 : index
    %20 = vector.load %arg8[%c0_19, %c0_20] : memref<512x128xbf16, #tpu.memory_space<vmem>>, vector<512x128xbf16>
    %cst_21 = arith.constant dense<0.000000e+00> : vector<8x128xf32>
    %21 = tpu.matmul %19, %20, %cst_21 {dimension_numbers = #tpu.dot_dimension_numbers<[1], [0], [0], [1], [0, 0, 1, 1], [], []>} : vector<8x512xbf16>, vector<512x128xbf16>, vector<8x128xf32> -> vector<8x128xf32>
    %22 = arith.addf %18, %21 : vector<8x128xf32>
    %c0_22 = arith.constant 0 : index
    %c0_23 = arith.constant 0 : index
    %23 = vector.load %arg9[%c0_22, %c0_23] : memref<1x128xf32, #tpu.memory_space<vmem>>, vector<1x128xf32>
    %24 = vector.broadcast %23 : vector<1x128xf32> to vector<8x128xf32>
    %25 = arith.addf %22, %24 : vector<8x128xf32>
    %c0_24 = arith.constant 0 : index
    %c0_25 = arith.constant 0 : index
    %26 = vector.load %arg12[%c0_24, %c0_25] : memref<8x128xf32, #tpu.memory_space<vmem>>, vector<8x128xf32>
    tpu.vector_store %arg12[%c0_24, %c0_25], %25 {strides = array<i32>} : memref<8x128xf32, #tpu.memory_space<vmem>>, vector<8x128xf32>,
    return
  }
  func.func @transform_0(%arg0: i32) -> (i32, i32) {
    %c0_i32 = arith.constant 0 : i32
    %c0_i32_0 = arith.constant 0 : i32
    return %arg0, %c0_i32 : i32, i32
  }
  func.func @transform_1(%arg0: i32) -> (i32, i32) {
    %c0_i32 = arith.constant 0 : i32
    %c0_i32_0 = arith.constant 0 : i32
    return %arg0, %c0_i32 : i32, i32
  }
  func.func @transform_2(%arg0: i32) -> (i32, i32) {
    %c0_i32 = arith.constant 0 : i32
    %c0_i32_0 = arith.constant 0 : i32
    %c0_i32_1 = arith.constant 0 : i32
    return %c0_i32, %c0_i32_0 : i32, i32
  }
  func.func @transform_3(%arg0: i32) -> (i32, i32) {
    %c0_i32 = arith.constant 0 : i32
    %c0_i32_0 = arith.constant 0 : i32
    %c0_i32_1 = arith.constant 0 : i32
    return %c0_i32, %c0_i32_0 : i32, i32
  }
  func.func @transform_4(%arg0: i32) -> (i32, i32) {
    %c0_i32 = arith.constant 0 : i32
    %c0_i32_0 = arith.constant 0 : i32
    %c0_i32_1 = arith.constant 0 : i32
    return %c0_i32, %c0_i32_0 : i32, i32
  }
  func.func @transform_5(%arg0: i32) -> (i32, i32) {
    %c0_i32 = arith.constant 0 : i32
    %c0_i32_0 = arith.constant 0 : i32
    %c0_i32_1 = arith.constant 0 : i32
    return %c0_i32, %c0_i32_0 : i32, i32
  }
  func.func @transform_6(%arg0: i32) -> (i32, i32) {
    %c0_i32 = arith.constant 0 : i32
    %c0_i32_0 = arith.constant 0 : i32
    %c0_i32_1 = arith.constant 0 : i32
    return %c0_i32, %c0_i32_0 : i32, i32
  }
  func.func @transform_7(%arg0: i32) -> (i32, i32) {
    %c0_i32 = arith.constant 0 : i32
    %c0_i32_0 = arith.constant 0 : i32
    %c0_i32_1 = arith.constant 0 : i32
    return %c0_i32, %c0_i32_0 : i32, i32
  }
  func.func @transform_8(%arg0: i32) -> (i32, i32) {
    %c0_i32 = arith.constant 0 : i32
    %c0_i32_0 = arith.constant 0 : i32
    %c0_i32_1 = arith.constant 0 : i32
    return %c0_i32, %c0_i32_0 : i32, i32
  }
  func.func @transform_9(%arg0: i32) -> (i32, i32) {
    %c0_i32 = arith.constant 0 : i32
    %c0_i32_0 = arith.constant 0 : i32
    return %arg0, %c0_i32 : i32, i32
  }
  func.func @transform_10(%arg0: i32) -> (i32, i32) {
    %c0_i32 = arith.constant 0 : i32
    %c0_i32_0 = arith.constant 0 : i32
    return %arg0, %c0_i32 : i32, i32
  }
  func.func @transform_11(%arg0: i32) -> (i32, i32) {
    %c0_i32 = arith.constant 0 : i32
    %c0_i32_0 = arith.constant 0 : i32
    return %arg0, %c0_i32 : i32, i32
  }
}

</mosaic_0001>

<bundles_post_ra>
// kernel: tpu_custom_call.1
= control target key start
LH: loop header
LB: loop body
LE: loop exit
PB: predicated region body
PF: predicated region fallthrough
CT: control target
= control target key end

     0   :  { %17 = vsyncpa [#allocation3], 0  ;;  %s7395_s0 = inlined_call_operand.hbm [shape: f32[8,768], index: 0, kind: input, shape index: {}]   ;;  %s7396_s1 = inlined_call_operand.hbm [shape: f32[8,1024], index: 1, kind: input, shape index: {}]   ;;  %s7397_s2 = inlined_call_operand.hbm [shape: bf16[768,512], index: 2, kind: input, shape index: {}]   ;;  %s7398_s3 = inlined_call_operand.hbm [shape: f32[1,512], index: 3, kind: input, shape index: {}]   ;;  %s7399_s4 = inlined_call_operand.hbm [shape: bf16[1024,512], index: 4, kind: input, shape index: {}]   ;;  %s7400_s5 = inlined_call_operand.vmem [shape: f32[1,512], index: 5, kind: input, shape index: {}]   ;;  %s7401_s6 = inlined_call_operand.hbm [shape: bf16[512,128], index: 6, kind: input, shape index: {}]   ;;  %s7402_s7 = inlined_call_operand.hbm [shape: bf16[512,128], index: 7, kind: input, shape index: {}]   ;;  %s7403_s8 = inlined_call_operand.vmem [shape: f32[1,128], index: 8, kind: input, shape index: {}]   ;;  %s7404_s9 = inlined_call_operand.hbm [shape: f32[8,512], index: 9, kind: output, shape index: {0}]   ;;  %s7405_s10 = inlined_call_operand.hbm [shape: f32[8,512], index: 10, kind: output, shape index: {1}]   ;;  %s7406_s11 = inlined_call_operand.hbm [shape: f32[8,128], index: 11, kind: output, shape index: {2}]  }
   0x1   :  { %18 = vsyncpa [#allocation6], 0 }
   0x2   :  { %19 = vsyncpa [#allocation9], 0 }
   0x3   :  { %20 = vsyncpa [#allocation12], 0 }
   0x4   :  { %21 = vsyncpa [#allocation4], 0  ;;  %s39_s19 = sshll.u32 %s7396_s1, 4  ;;  %s40_s19 = int_to_ptr.hbm [resolvable:$true] %s39_s19 }
   0x5   :  { %22 = vsyncpa [#allocation16], 0  ;;  %s7126_s20 = smov [#allocation5]   ;;  %s63_s24 = sshll.u32 %s7398_s3, 4  ;;  %s64_s24 = int_to_ptr.hbm [resolvable:$true] %s63_s24 }
   0x6   :  { %s41_s21 = sshll.u32 %s7126_s20, 4  ;;  %s7127_s25 = smov [#allocation8]   ;;  %s42_s21 = int_to_ptr.vmem [resolvable:$true] %s41_s21 }
   0x7   :  { %44 = dma.hbm_to_vmem [thread:$0]  %s40_s19, 1024, %s42_s21, [#allocation6]  }
   0x8   :  { %s65_s26 = sshll.u32 %s7127_s25, 4  ;;  %s88_s29 = sshll.u32 %s7401_s6, 4  ;;  %s66_s26 = int_to_ptr.vmem [resolvable:$true] %s65_s26  ;;  %s89_s29 = int_to_ptr.hbm [resolvable:$true] %s88_s29 }
   0x9   :  { %68 = dma.hbm_to_vmem [thread:$0]  %s64_s24, 64, %s66_s26, [#allocation9]  }
   0xa   :  { %s7128_s1 = smov [#allocation11]   ;;  %s28_s14 = sshll.u32 %s7395_s0, 4  ;;  %s29_s14 = int_to_ptr.hbm [resolvable:$true] %s28_s14 }
   0xb   :  { %s90_s30 = sshll.u32 %s7128_s1, 4  ;;  %s7129_s15 = smov 64   ;;  %s91_s30 = int_to_ptr.vmem [resolvable:$true] %s90_s30 }
   0xc   :  { %s7130_s3 = smov 4   ;;  %s7131_s16 = smov [#allocation2]  }
   0xd   :  { %96 = dma.hbm_to_vmem [thread:$0]  %s89_s29, 4096, %s91_s30, [#allocation12], %s7129_s15, %s7129_s15, %s7130_s3  }
   0xe   :  { %s30_s17 = sshll.u32 %s7131_s16, 4  ;;  %s49_s19 = sshll.u32 %s7397_s2, 4  ;;  %s31_s17 = int_to_ptr.vmem [resolvable:$true] %s30_s17  ;;  %s50_s19 = int_to_ptr.hbm [resolvable:$true] %s49_s19 }
   0xf   :  { %33 = dma.hbm_to_vmem [thread:$0]  %s29_s14, 768, %s31_s17, [#allocation3]  }
  0x10   :  { %s7132_s20 = smov [#allocation7]   ;;  %s73_s23 = sshll.u32 %s7399_s4, 4  ;;  %s74_s23 = int_to_ptr.hbm [resolvable:$true] %s73_s23 }
  0x11   :  { %s51_s21 = sshll.u32 %s7132_s20, 4  ;;  %s7133_s24 = smov 256   ;;  %s52_s21 = int_to_ptr.vmem [resolvable:$true] %s51_s21 }
  0x12   :  { %s7134_s25 = smov 16   ;;  %s7135_s26 = smov [#allocation10]  }
  0x13   :  { %57 = dma.hbm_to_vmem [thread:$0]  %s50_s19, 24576, %s52_s21, [#allocation6], %s7133_s24, %s7133_s24, %s7134_s25  }
  0x14   :  { %s75_s27 = sshll.u32 %s7135_s26, 4  ;;  %s101_s2 = sshll.u32 %s7402_s7, 4  ;;  %s76_s27 = int_to_ptr.vmem [resolvable:$true] %s75_s27  ;;  %s102_s2 = int_to_ptr.hbm [resolvable:$true] %s101_s2 }
  0x15   :  { %81 = dma.hbm_to_vmem [thread:$0]  %s74_s23, 32768, %s76_s27, [#allocation9], %s7133_s24, %s7133_s24, %s7134_s25  }
  0x16   :  { %s7136_s1 = smov [#allocation13]  }
  0x17   :  { %s103_s30 = sshll.u32 %s7136_s1, 4  ;;  %s104_s30 = int_to_ptr.vmem [resolvable:$true] %s103_s30 }
  0x18   :  { %109 = dma.hbm_to_vmem [thread:$0]  %s102_s2, 4096, %s104_s30, [#allocation12], %s7129_s15, %s7129_s15, %s7130_s3  }
  0x19   :  { %7114 = dma.done.wait [#allocation3], 768  }
  0x1a   :  { %7115 = vsyncadd [#allocation3], 4294966528 }
  0x1b   :  { %7116 = dma.done.wait [#allocation6], 25600  }
  0x1c   :  { %7117 = vsyncadd [#allocation6], 4294941696 }
  0x1d   :  { %7118 = dma.done.wait [#allocation9], 32832  }
  0x1e   :  { %7119 = vsyncadd [#allocation9], 4294934464 }
  0x1f   :  { %7120 = dma.done.wait [#allocation12], 8192  }
  0x20   :  { %7121 = vsyncadd [#allocation12], 4294959104  ;;  %v4407_v0 = vld [vmem:[#allocation7 + $0xe0] sm:$0xf]  ;;  %v6371_v1 = vld [vmem:[#allocation7 + $0xec] sm:$0xf0] }
  0x21   :  { %v4535_v2 = vld [vmem:[#allocation7 + $0x1e0] sm:$0xf]  ;;  %v4408_v3 = vor.u32 %v6371_v1, %v4407_v0  ;;  %v6403_v4 = vld [vmem:[#allocation7 + $0x1ec] sm:$0xf0]  ;;  %s4260_s15 = sshll.u32 %s7405_s10, 4  ;;  %s7137_s3 = smov [#allocation15]   ;;  %s4261_s15 = int_to_ptr.hbm [resolvable:$true] %s4260_s15 }
  0x22   :  { %v4663_v5 = vld [vmem:[#allocation7 + $0x2e0] sm:$0xf]  ;;  %v6435_v6 = vld [vmem:[#allocation7 + $0x2ec] sm:$0xf0]  ;;  %v4536_v7 = vor.u32 %v6403_v4, %v4535_v2  ;;  %s4258_s16 = sshll.u32 %s7137_s3, 4  ;;  %s7138_s17 = smov [#allocation14]   ;;  %s4259_s16 = int_to_ptr.vmem [resolvable:$true] %s4258_s16 }
  0x23   :  { %v4664_v8 = vor.u32 %v6435_v6, %v4663_v5  ;;  %v4791_v9 = vld [vmem:[#allocation7 + $0x3e0] sm:$0xf]  ;;  %v6467_v10 = vld [vmem:[#allocation7 + $0x3ec] sm:$0xf0]  ;;  %1330 = vmatpush.bf16.msra.mxu0 %v4408_v3  ;;  %s4247_s6 = sshll.u32 %s7138_s17, 4  ;;  %s4249_s20 = sshll.u32 %s7404_s9, 4  ;;  %s4248_s6 = int_to_ptr.vmem [resolvable:$true] %s4247_s6  ;;  %s4250_s20 = int_to_ptr.hbm [resolvable:$true] %s4249_s20 }
  0x24   :  { %v4391_v11 = vld [vmem:[#allocation7 + $0xc0] sm:$0xf]  ;;  %v4792_v12 = vor.u32 %v6467_v10, %v4791_v9  ;;  %v6367_v13 = vld [vmem:[#allocation7 + $0xcc] sm:$0xf0]  ;;  %1343 = vmatpush.bf16.msra.mxu1 %v4536_v7  ;;  %s7139_s21 = smov [#allocation17]   ;;  %s4271_s24 = sshll.u32 %s7406_s11, 4  ;;  %s4272_s24 = int_to_ptr.hbm [resolvable:$true] %s4271_s24 }
  0x25   :  { %v4519_v14 = vld [vmem:[#allocation7 + $0x1c0] sm:$0xf]  ;;  %v6399_v15 = vld [vmem:[#allocation7 + $0x1cc] sm:$0xf0]  ;;  %1356 = vmatpush.bf16.msra.mxu2 %v4664_v8  ;;  %v4392_v16 = vor.u32 %v6367_v13, %v4391_v11  ;;  %s4269_s0 = sshll.u32 %s7139_s21, 4  ;;  %s4270_s0 = int_to_ptr.vmem [resolvable:$true] %s4269_s0 }
  0x26   :  { %v4520_v17 = vor.u32 %v6399_v15, %v4519_v14  ;;  %v4647_v18 = vld [vmem:[#allocation7 + $0x2c0] sm:$0xf]  ;;  %v6431_v19 = vld [vmem:[#allocation7 + $0x2cc] sm:$0xf0]  ;;  %1369 = vmatpush.bf16.msra.mxu3 %v4792_v12 }
  0x27   :  { %v4775_v20 = vld [vmem:[#allocation7 + $0x3c0] sm:$0xf]  ;;  %v4648_v21 = vor.u32 %v6431_v19, %v4647_v18  ;;  %v6463_v22 = vld [vmem:[#allocation7 + $0x3cc] sm:$0xf0]  ;;  %1331 = vmatpush.bf16.msra.mxu0 %v4392_v16 }
  0x28   :  { %v4375_v23 = vld [vmem:[#allocation7 + $0xa0] sm:$0xf]  ;;  %v6363_v24 = vld [vmem:[#allocation7 + $0xac] sm:$0xf0]  ;;  %v4776_v25 = vor.u32 %v6463_v22, %v4775_v20  ;;  %1344 = vmatpush.bf16.msra.mxu1 %v4520_v17 }
  0x29   :  { %v4503_v26 = vld [vmem:[#allocation7 + $0x1a0] sm:$0xf]  ;;  %v6395_v27 = vld [vmem:[#allocation7 + $0x1ac] sm:$0xf0]  ;;  %v4376_v29 = vor.u32 %v6363_v24, %v4375_v23  ;;  %1357 = vmatpush.bf16.msra.mxu2 %v4648_v21 }
  0x2a   :  { %v4631_v28 = vld [vmem:[#allocation7 + $0x2a0] sm:$0xf]  ;;  %v6427_v30 = vld [vmem:[#allocation7 + $0x2ac] sm:$0xf0]  ;;  %v4504_v33 = vor.u32 %v6395_v27, %v4503_v26  ;;  %1370 = vmatpush.bf16.msra.mxu3 %v4776_v25 }
  0x2b   :  { %v4759_v31 = vld [vmem:[#allocation7 + $0x3a0] sm:$0xf]  ;;  %v6459_v32 = vld [vmem:[#allocation7 + $0x3ac] sm:$0xf0]  ;;  %v4632_v34 = vor.u32 %v6427_v30, %v4631_v28  ;;  %1332 = vmatpush.bf16.msra.mxu0 %v4376_v29 }
  0x2c   :  { %v4359_v35 = vld [vmem:[#allocation7 + $0x80] sm:$0xf]  ;;  %v6359_v36 = vld [vmem:[#allocation7 + $0x8c] sm:$0xf0]  ;;  %v4760_v38 = vor.u32 %v6459_v32, %v4759_v31  ;;  %1345 = vmatpush.bf16.msra.mxu1 %v4504_v33  ;;  %v6369_v33 = vld [vmem:[#allocation7 + $0xe4] sm:$0xf] }
  0x2d   :  { %v4487_v37 = vld [vmem:[#allocation7 + $0x180] sm:$0xf]  ;;  %v6391_v39 = vld [vmem:[#allocation7 + $0x18c] sm:$0xf0]  ;;  %v4360_v44 = vor.u32 %v6359_v36, %v4359_v35  ;;  %1358 = vmatpush.bf16.msra.mxu2 %v4632_v34  ;;  %v4409_v34 = vld [vmem:[#allocation7 + $0xf0] sm:$0xf0] }
  0x2e   :  { %v4615_v40 = vld [vmem:[#allocation7 + $0x280] sm:$0xf]  ;;  %v6423_v41 = vld [vmem:[#allocation7 + $0x28c] sm:$0xf0]  ;;  %v4488_v45 = vor.u32 %v6391_v39, %v4487_v37  ;;  %1371 = vmatpush.bf16.msra.mxu3 %v4760_v38  ;;  %v6401_v37 = vld [vmem:[#allocation7 + $0x1e4] sm:$0xf] }
  0x2f   :  { %v4743_v42 = vld [vmem:[#allocation7 + $0x380] sm:$0xf]  ;;  %v6455_v43 = vld [vmem:[#allocation7 + $0x38c] sm:$0xf0]  ;;  %v4616_v46 = vor.u32 %v6423_v41, %v4615_v40  ;;  %1333 = vmatpush.bf16.msra.mxu0 %v4360_v44  ;;  %v4537_v38 = vld [vmem:[#allocation7 + $0x1f0] sm:$0xf0] }
  0x30   :  { %v4343_v47 = vld [vmem:[#allocation7 + $0x60] sm:$0xf]  ;;  %v6355_v48 = vld [vmem:[#allocation7 + $0x6c] sm:$0xf0]  ;;  %v4744_v50 = vor.u32 %v6455_v43, %v4743_v42  ;;  %1346 = vmatpush.bf16.msra.mxu1 %v4488_v45  ;;  %v4412_v42 = vor.u32 %v6369_v33, %v4409_v34 }
  0x31   :  { %v4471_v49 = vld [vmem:[#allocation7 + $0x160] sm:$0xf]  ;;  %v6387_v51 = vld [vmem:[#allocation7 + $0x16c] sm:$0xf0]  ;;  %v4344_v56 = vor.u32 %v6355_v48, %v4343_v47  ;;  %1359 = vmatpush.bf16.msra.mxu2 %v4616_v46  ;;  %v4540_v46 = vor.u32 %v6401_v37, %v4537_v38  ;;  %v6365_v48 = vld [vmem:[#allocation7 + $0xc4] sm:$0xf] }
  0x32   :  { %v4599_v52 = vld [vmem:[#allocation7 + $0x260] sm:$0xf]  ;;  %v6419_v53 = vld [vmem:[#allocation7 + $0x26c] sm:$0xf0]  ;;  %v4472_v57 = vor.u32 %v6387_v51, %v4471_v49  ;;  %1372 = vmatpush.bf16.msra.mxu3 %v4744_v50  ;;  %v4393_v49 = vld [vmem:[#allocation7 + $0xd0] sm:$0xf0] }
  0x33   :  { %v4727_v54 = vld [vmem:[#allocation7 + $0x360] sm:$0xf]  ;;  %v6451_v55 = vld [vmem:[#allocation7 + $0x36c] sm:$0xf0]  ;;  %v4600_v58 = vor.u32 %v6419_v53, %v4599_v52  ;;  %1334 = vmatpush.bf16.msra.mxu0 %v4344_v56  ;;  %v6397_v50 = vld [vmem:[#allocation7 + $0x1c4] sm:$0xf] }
  0x34   :  { %v4327_v59 = vld [vmem:[#allocation7 + $0x40] sm:$0xf]  ;;  %v6351_v60 = vld [vmem:[#allocation7 + $0x4c] sm:$0xf0]  ;;  %v4728_v62 = vor.u32 %v6451_v55, %v4727_v54  ;;  %1347 = vmatpush.bf16.msra.mxu1 %v4472_v57  ;;  %v4521_v51 = vld [vmem:[#allocation7 + $0x1d0] sm:$0xf0]  ;;  %v4396_v55 = vor.u32 %v6365_v48, %v4393_v49 }
  0x35   :  { %v4455_v61 = vld [vmem:[#allocation7 + $0x140] sm:$0xf]  ;;  %v6383_v63 = vld [vmem:[#allocation7 + $0x14c] sm:$0xf0]  ;;  %v4328_v4 = vor.u32 %v6351_v60, %v4327_v59  ;;  %1360 = vmatpush.bf16.msra.mxu2 %v4600_v58  ;;  %v4524_v59 = vor.u32 %v6397_v50, %v4521_v51  ;;  %v6361_v60 = vld [vmem:[#allocation7 + $0xa4] sm:$0xf] }
  0x36   :  { %v4583_v0 = vld [vmem:[#allocation7 + $0x240] sm:$0xf]  ;;  %v6415_v1 = vld [vmem:[#allocation7 + $0x24c] sm:$0xf0]  ;;  %v4456_v5 = vor.u32 %v6383_v63, %v4455_v61  ;;  %1373 = vmatpush.bf16.msra.mxu3 %v4728_v62  ;;  %v4377_v61 = vld [vmem:[#allocation7 + $0xb0] sm:$0xf0] }
  0x37   :  { %v4711_v2 = vld [vmem:[#allocation7 + $0x340] sm:$0xf]  ;;  %v6447_v3 = vld [vmem:[#allocation7 + $0x34c] sm:$0xf0]  ;;  %v4584_v6 = vor.u32 %v6415_v1, %v4583_v0  ;;  %1335 = vmatpush.bf16.msra.mxu0 %v4328_v4  ;;  %v6393_v62 = vld [vmem:[#allocation7 + $0x1a4] sm:$0xf] }
  0x38   :  { %v4311_v7 = vld [vmem:[#allocation7 + $0x20] sm:$0xf]  ;;  %v6347_v8 = vld [vmem:[#allocation7 + $0x2c] sm:$0xf0]  ;;  %v4712_v10 = vor.u32 %v6447_v3, %v4711_v2  ;;  %1348 = vmatpush.bf16.msra.mxu1 %v4456_v5  ;;  %v4505_v63 = vld [vmem:[#allocation7 + $0x1b0] sm:$0xf0]  ;;  %v4380_v5 = vor.u32 %v6361_v60, %v4377_v61 }
  0x39   :  { %v4439_v9 = vld [vmem:[#allocation7 + $0x120] sm:$0xf]  ;;  %v6379_v11 = vld [vmem:[#allocation7 + $0x12c] sm:$0xf0]  ;;  %v4312_v16 = vor.u32 %v6347_v8, %v4311_v7  ;;  %1361 = vmatpush.bf16.msra.mxu2 %v4584_v6 }
  0x3a   :  { %v4567_v12 = vld [vmem:[#allocation7 + $0x220] sm:$0xf]  ;;  %v6411_v13 = vld [vmem:[#allocation7 + $0x22c] sm:$0xf0]  ;;  %v4440_v19 = vor.u32 %v6379_v11, %v4439_v9  ;;  %1374 = vmatpush.bf16.msra.mxu3 %v4712_v10  ;;  %v143_v10 = vld [vmem:[#allocation2 + $0x18] sm:$0xff]  ;;  %v4508_v11 = vor.u32 %v6393_v62, %v4505_v63 }
  0x3b   :  { %v4695_v14 = vld [vmem:[#allocation7 + $0x320] sm:$0xf]  ;;  %v6443_v15 = vld [vmem:[#allocation7 + $0x32c] sm:$0xf0]  ;;  %v4568_v20 = vor.u32 %v6411_v13, %v4567_v12  ;;  %1336 = vmatpush.bf16.msra.mxu0 %v4312_v16  ;;  %v6357_v13 = vld [vmem:[#allocation7 + $0x84] sm:$0xf] }
  0x3c   :  { %v4295_v17 = vld [vmem:[#allocation7] sm:$0xf]  ;;  %v6343_v18 = vld [vmem:[#allocation7 + $0xc] sm:$0xf0]  ;;  %v4696_v24 = vor.u32 %v6443_v15, %v4695_v14  ;;  %1349 = vmatpush.bf16.msra.mxu1 %v4440_v19  ;;  %v4361_v14 = vld [vmem:[#allocation7 + $0x90] sm:$0xf0]  ;;  %v7231_v15 = vpack.c.bf16 %v143_v10, %v143_v10 }
  0x3d   :  { %v4423_v21 = vld [vmem:[#allocation7 + $0x100] sm:$0xf]  ;;  %v6375_v22 = vld [vmem:[#allocation7 + $0x10c] sm:$0xf0]  ;;  %v4296_v31 = vor.u32 %v6343_v18, %v4295_v17  ;;  %1362 = vmatpush.bf16.msra.mxu2 %v4568_v20  ;;  %v6389_v16 = vld [vmem:[#allocation7 + $0x184] sm:$0xf] }
  0x3e   :  { %v4551_v23 = vld [vmem:[#allocation7 + $0x200] sm:$0xf]  ;;  %v6407_v25 = vld [vmem:[#allocation7 + $0x20c] sm:$0xf0]  ;;  %v4424_v35 = vor.u32 %v6375_v22, %v4423_v21  ;;  %1375 = vmatpush.bf16.msra.mxu3 %v4696_v24  ;;  %v4489_v17 = vld [vmem:[#allocation7 + $0x190] sm:$0xf0]  ;;  %v4364_v21 = vor.u32 %v6357_v13, %v4361_v14 }
  0x3f   :  { %v4679_v26 = vld [vmem:[#allocation7 + $0x300] sm:$0xf]  ;;  %v6439_v27 = vld [vmem:[#allocation7 + $0x30c] sm:$0xf0]  ;;  %v4552_v36 = vor.u32 %v6407_v25, %v4551_v23  ;;  %1337 = vmatpush.bf16.msra.mxu0 %v4296_v31  ;;  %v141_v19 = vld [vmem:[#allocation2 + $0x8] sm:$0xff] }
  0x40   :  { %v4919_v28 = vld [vmem:[#allocation7 + $0x4e0] sm:$0xf]  ;;  %v6499_v29 = vld [vmem:[#allocation7 + $0x4ec] sm:$0xf0]  ;;  %v4680_v39 = vor.u32 %v6439_v27, %v4679_v26  ;;  %1350 = vmatpush.bf16.msra.mxu1 %v4424_v35  ;;  %v7236_v25 = vpack.c.bf16 %v141_v19, %v141_v19  ;;  %v4492_v26 = vor.u32 %v6389_v16, %v4489_v17  ;;  %v4473_v31 = vld [vmem:[#allocation7 + $0x170] sm:$0xf0] }
  0x41   :  { %v5047_v30 = vld [vmem:[#allocation7 + $0x5e0] sm:$0xf]  ;;  %v6531_v32 = vld [vmem:[#allocation7 + $0x5ec] sm:$0xf0]  ;;  %v4920_v40 = vor.u32 %v6499_v29, %v4919_v28  ;;  %1363 = vmatpush.bf16.msra.mxu2 %v4552_v36  ;;  %v6353_v28 = vld [vmem:[#allocation7 + $0x64] sm:$0xf] }
  0x42   :  { %v5048_v41 = vor.u32 %v6531_v32, %v5047_v30  ;;  %v4903_v43 = vld [vmem:[#allocation7 + $0x4c0] sm:$0xf]  ;;  %v6495_v44 = vld [vmem:[#allocation7 + $0x4cc] sm:$0xf0]  ;;  %1376 = vmatpush.bf16.msra.mxu3 %v4680_v39  ;;  %v4345_v29 = vld [vmem:[#allocation7 + $0x70] sm:$0xf0] }
  0x43   :  { %v5031_v45 = vld [vmem:[#allocation7 + $0x5c0] sm:$0xf]  ;;  %v6527_v47 = vld [vmem:[#allocation7 + $0x5cc] sm:$0xf0]  ;;  %1382 = vmatpush.bf16.msrb.mxu0 %v4920_v40  ;;  %v4904_v52 = vor.u32 %v6495_v44, %v4903_v43  ;;  %v6385_v30 = vld [vmem:[#allocation7 + $0x164] sm:$0xf]  ;;  %1351 = vmatmul.bf16.vlgmr.msra.gmra.mxu1 %v7236_v25  ;;  %v4348_v34 = vor.u32 %v6353_v28, %v4345_v29 }
  0x44   :  { %v4887_v53 = vld [vmem:[#allocation7 + $0x4a0] sm:$0xf]  ;;  %1395 = vmatpush.bf16.msrb.mxu1 %v5048_v41  ;;  %v5032_v54 = vor.u32 %v6527_v47, %v5031_v45  ;;  %v6491_v56 = vld [vmem:[#allocation7 + $0x4ac] sm:$0xf0]  ;;  %v4476_v38 = vor.u32 %v6385_v30, %v4473_v31  ;;  %v6349_v40 = vld [vmem:[#allocation7 + $0x44] sm:$0xf] }
  0x45   :  { %1408 = vmatpush.bf16.msrb.mxu2 %v4412_v42  ;;  %v5015_v57 = vld [vmem:[#allocation7 + $0x5a0] sm:$0xf]  ;;  %v6523_v58 = vld [vmem:[#allocation7 + $0x5ac] sm:$0xf0]  ;;  %v4888_v0 = vor.u32 %v6491_v56, %v4887_v53  ;;  %1377 = vmatmul.bf16.vlgmr.msra.gmra.mxu3 %v7231_v15  ;;  %v4329_v41 = vld [vmem:[#allocation7 + $0x50] sm:$0xf0] }
  0x46   :  { %1421 = vmatpush.bf16.msrb.mxu3 %v4540_v46  ;;  %v5016_v1 = vor.u32 %v6523_v58, %v5015_v57  ;;  %v4871_v2 = vld [vmem:[#allocation7 + $0x480] sm:$0xf]  ;;  %v140_v4 = vld [vmem:[#allocation2] sm:$0xff]  ;;  %v6381_v42 = vld [vmem:[#allocation7 + $0x144] sm:$0xf]  ;;  %v4332_v46 = vor.u32 %v6349_v40, %v4329_v41 }
  0x47   :  { %1383 = vmatpush.bf16.msrb.mxu0 %v4904_v52  ;;  %v142_v3 = vld [vmem:[#allocation2 + $0x10] sm:$0xff]  ;;  %v6487_v6 = vld [vmem:[#allocation7 + $0x48c] sm:$0xf0]  ;;  %v7229_v9 = vpack.c.bf16 %v140_v4, %v140_v4  ;;  %v4457_v43 = vld [vmem:[#allocation7 + $0x150] sm:$0xf0] }
  0x48   :  { %1396 = vmatpush.bf16.msrb.mxu1 %v5032_v54  ;;  %v4999_v7 = vld [vmem:[#allocation7 + $0x580] sm:$0xf]  ;;  %v7227_v8 = vpack.c.bf16 %v142_v3, %v142_v3  ;;  %v6519_v12 = vld [vmem:[#allocation7 + $0x58c] sm:$0xf0]  ;;  %v4872_v18 = vor.u32 %v6487_v6, %v4871_v2  ;;  %v4460_v50 = vor.u32 %v6381_v42, %v4457_v43  ;;  %v6345_v52 = vld [vmem:[#allocation7 + $0x24] sm:$0xf] }
  0x49   :  { %1409 = vmatpush.bf16.msrb.mxu2 %v4396_v55  ;;  %1338 = vmatmul.bf16.vlgmr.msra.gmra.mxu0 %v7229_v9  ;;  %v5000_v20 = vor.u32 %v6519_v12, %v4999_v7  ;;  %v4855_v22 = vld [vmem:[#allocation7 + $0x460] sm:$0xf]  ;;  %v6483_v23 = vld [vmem:[#allocation7 + $0x46c] sm:$0xf0]  ;;  %v4313_v53 = vld [vmem:[#allocation7 + $0x30] sm:$0xf0] }
  0x4a   :  { %1422 = vmatpush.bf16.msrb.mxu3 %v4524_v59  ;;  %1364 = vmatmul.bf16.vlgmr.msra.gmra.mxu2 %v7227_v8  ;;  %v4983_v24 = vld [vmem:[#allocation7 + $0x560] sm:$0xf]  ;;  %v6515_v27 = vld [vmem:[#allocation7 + $0x56c] sm:$0xf0]  ;;  %v4856_v32 = vor.u32 %v6483_v23, %v4855_v22  ;;  %v6377_v54 = vld [vmem:[#allocation7 + $0x124] sm:$0xf]  ;;  %v4316_v60 = vor.u32 %v6345_v52, %v4313_v53 }
  0x4b   :  { %1384 = vmatpush.bf16.msrb.mxu0 %v4888_v0  ;;  %v4984_v33 = vor.u32 %v6515_v27, %v4983_v24  ;;  %v4839_v35 = vld [vmem:[#allocation7 + $0x440] sm:$0xf]  ;;  %v6479_v36 = vld [vmem:[#allocation7 + $0x44c] sm:$0xf0]  ;;  %v4441_v55 = vld [vmem:[#allocation7 + $0x130] sm:$0xf0] }
  0x4c   :  { %1397 = vmatpush.bf16.msrb.mxu1 %v5016_v1  ;;  %v4967_v37 = vld [vmem:[#allocation7 + $0x540] sm:$0xf]  ;;  %v6511_v39 = vld [vmem:[#allocation7 + $0x54c] sm:$0xf0]  ;;  %v4840_v44 = vor.u32 %v6479_v36, %v4839_v35  ;;  %v6341_v63 = vld [vmem:[#allocation7 + $0x4] sm:$0xf]  ;;  %v4444_v0 = vor.u32 %v6377_v54, %v4441_v55 }
  0x4d   :  { %1410 = vmatpush.bf16.msrb.mxu2 %v4380_v5  ;;  %v4968_v45 = vor.u32 %v6511_v39, %v4967_v37  ;;  %v4823_v47 = vld [vmem:[#allocation7 + $0x420] sm:$0xf]  ;;  %v6475_v48 = vld [vmem:[#allocation7 + $0x42c] sm:$0xf0]  ;;  %v4297_v1 = vld [vmem:[#allocation7 + $0x10] sm:$0xf0] }
  0x4e   :  { %1423 = vmatpush.bf16.msrb.mxu3 %v4508_v11  ;;  %v4951_v49 = vld [vmem:[#allocation7 + $0x520] sm:$0xf]  ;;  %v6507_v51 = vld [vmem:[#allocation7 + $0x52c] sm:$0xf0]  ;;  %v4824_v56 = vor.u32 %v6475_v48, %v4823_v47  ;;  %v6373_v2 = vld [vmem:[#allocation7 + $0x104] sm:$0xf]  ;;  %v4300_v14 = vor.u32 %v6341_v63, %v4297_v1 }
  0x4f   :  { %1385 = vmatpush.bf16.msrb.mxu0 %v4872_v18  ;;  %v4807_v57 = vld [vmem:[#allocation7 + $0x400] sm:$0xf]  ;;  %v6471_v58 = vld [vmem:[#allocation7 + $0x40c] sm:$0xf0]  ;;  %v4952_v59 = vor.u32 %v6507_v51, %v4951_v49  ;;  %v4425_v3 = vld [vmem:[#allocation7 + $0x110] sm:$0xf0] }
  0x50   :  { %1398 = vmatpush.bf16.msrb.mxu1 %v5000_v20  ;;  %v4935_v61 = vld [vmem:[#allocation7 + $0x500] sm:$0xf]  ;;  %v6503_v62 = vld [vmem:[#allocation7 + $0x50c] sm:$0xf0]  ;;  %v6433_v4 = vld [vmem:[#allocation7 + $0x2e4] sm:$0xf]  ;;  %v4808_v7 = vor.u32 %v6471_v58, %v4807_v57  ;;  %v4428_v19 = vor.u32 %v6373_v2, %v4425_v3 }
  0x51   :  { %1411 = vmatpush.bf16.msrb.mxu2 %v4364_v21  ;;  %v4665_v5 = vld [vmem:[#allocation7 + $0x2f0] sm:$0xf0]  ;;  %v6465_v6 = vld [vmem:[#allocation7 + $0x3e4] sm:$0xf]  ;;  %v4936_v13 = vor.u32 %v6503_v62, %v4935_v61  ;;  %v145_v21 = vld [vmem:[#allocation2 + $0x28] sm:$0xff] }
  0x52   :  { %1424 = vmatpush.bf16.msrb.mxu3 %v4492_v26  ;;  %v4793_v10 = vld [vmem:[#allocation7 + $0x3f0] sm:$0xf0]  ;;  %v6497_v11 = vld [vmem:[#allocation7 + $0x4e4] sm:$0xf]  ;;  %v4668_v20 = vor.u32 %v6433_v4, %v4665_v5  ;;  %v7241_v35 = vpack.c.bf16 %v145_v21, %v145_v21 }
  0x53   :  { %1386 = vmatpush.bf16.msrb.mxu0 %v4856_v32  ;;  %v4921_v12 = vld [vmem:[#allocation7 + $0x4f0] sm:$0xf0]  ;;  %v6529_v16 = vld [vmem:[#allocation7 + $0x5e4] sm:$0xf]  ;;  %v4796_v22 = vor.u32 %v6465_v6, %v4793_v10 }
  0x54   :  { %1399 = vmatpush.bf16.msrb.mxu1 %v4984_v33  ;;  %v5049_v17 = vld [vmem:[#allocation7 + $0x5f0] sm:$0xf0]  ;;  %v4924_v23 = vor.u32 %v6497_v11, %v4921_v12  ;;  %v6429_v24 = vld [vmem:[#allocation7 + $0x2c4] sm:$0xf] }
  0x55   :  { %1412 = vmatpush.bf16.msrb.mxu2 %v4348_v34  ;;  %v144_v18 = vld [vmem:[#allocation2 + $0x20] sm:$0xff]  ;;  %v6461_v27 = vld [vmem:[#allocation7 + $0x3c4] sm:$0xf]  ;;  %v5052_v28 = vor.u32 %v6529_v16, %v5049_v17 }
  0x56   :  { %1425 = vmatpush.bf16.msrb.mxu3 %v4476_v38  ;;  %v4649_v26 = vld [vmem:[#allocation7 + $0x2d0] sm:$0xf0]  ;;  %v6493_v30 = vld [vmem:[#allocation7 + $0x4c4] sm:$0xf]  ;;  %v7239_v32 = vpack.c.bf16 %v144_v18, %v144_v18 }
  0x57   :  { %1387 = vmatpush.bf16.msrb.mxu0 %v4840_v44  ;;  %v4777_v29 = vld [vmem:[#allocation7 + $0x3d0] sm:$0xf0]  ;;  %v6525_v33 = vld [vmem:[#allocation7 + $0x5c4] sm:$0xf]  ;;  %v4652_v36 = vor.u32 %v6429_v24, %v4649_v26 }
  0x58   :  { %1400 = vmatpush.bf16.msrb.mxu1 %v4968_v45  ;;  %v4905_v31 = vld [vmem:[#allocation7 + $0x4d0] sm:$0xf0]  ;;  %v4780_v37 = vor.u32 %v6461_v27, %v4777_v29  ;;  %v6425_v39 = vld [vmem:[#allocation7 + $0x2a4] sm:$0xf] }
  0x59   :  { %1413 = vmatpush.bf16.msrb.mxu2 %v4332_v46  ;;  %v5033_v34 = vld [vmem:[#allocation7 + $0x5d0] sm:$0xf0]  ;;  %v4908_v38 = vor.u32 %v6493_v30, %v4905_v31  ;;  %v6457_v41 = vld [vmem:[#allocation7 + $0x3a4] sm:$0xf] }
  0x5a   :  { %1426 = vmatpush.bf16.msrb.mxu3 %v4460_v50  ;;  %v4633_v40 = vld [vmem:[#allocation7 + $0x2b0] sm:$0xf0]  ;;  %v5036_v42 = vor.u32 %v6525_v33, %v5033_v34  ;;  %v6489_v44 = vld [vmem:[#allocation7 + $0x4a4] sm:$0xf] }
  0x5b   :  { %1388 = vmatpush.bf16.msrb.mxu0 %v4824_v56  ;;  %v4761_v43 = vld [vmem:[#allocation7 + $0x3b0] sm:$0xf0]  ;;  %v6521_v46 = vld [vmem:[#allocation7 + $0x5a4] sm:$0xf]  ;;  %v4636_v48 = vor.u32 %v6425_v39, %v4633_v40 }
  0x5c   :  { %1401 = vmatpush.bf16.msrb.mxu1 %v4952_v59  ;;  %v4889_v45 = vld [vmem:[#allocation7 + $0x4b0] sm:$0xf0]  ;;  %v4764_v49 = vor.u32 %v6457_v41, %v4761_v43  ;;  %v6421_v51 = vld [vmem:[#allocation7 + $0x284] sm:$0xf] }
  0x5d   :  { %1414 = vmatpush.bf16.msrb.mxu2 %v4316_v60  ;;  %v5017_v47 = vld [vmem:[#allocation7 + $0x5b0] sm:$0xf0]  ;;  %v4892_v50 = vor.u32 %v6489_v44, %v4889_v45  ;;  %v6453_v53 = vld [vmem:[#allocation7 + $0x384] sm:$0xf] }
  0x5e   :  { %1427 = vmatpush.bf16.msrb.mxu3 %v4444_v0  ;;  %v4617_v52 = vld [vmem:[#allocation7 + $0x290] sm:$0xf0]  ;;  %v5020_v54 = vor.u32 %v6521_v46, %v5017_v47  ;;  %v6485_v56 = vld [vmem:[#allocation7 + $0x484] sm:$0xf] }
  0x5f   :  { %1389 = vmatpush.bf16.msrb.mxu0 %v4808_v7  ;;  %v4745_v55 = vld [vmem:[#allocation7 + $0x390] sm:$0xf0]  ;;  %v6517_v58 = vld [vmem:[#allocation7 + $0x584] sm:$0xf]  ;;  %v4620_v60 = vor.u32 %v6421_v51, %v4617_v52  ;;  %v6372_v51 = vld [vmem:[#allocation7 + $0xf4] sm:$0xf0] }
  0x60   :  { %1402 = vmatpush.bf16.msrb.mxu1 %v4936_v13  ;;  %v4873_v57 = vld [vmem:[#allocation7 + $0x490] sm:$0xf0]  ;;  %v4748_v61 = vor.u32 %v6453_v53, %v4745_v55  ;;  %v6417_v63 = vld [vmem:[#allocation7 + $0x264] sm:$0xf]  ;;  %v4543_v52 = vld [vmem:[#allocation7 + $0x1e8] sm:$0xf] }
  0x61   :  { %1415 = vmatpush.bf16.msrb.mxu2 %v4300_v14  ;;  %v5001_v59 = vld [vmem:[#allocation7 + $0x590] sm:$0xf0]  ;;  %v4876_v62 = vor.u32 %v6485_v56, %v4873_v57  ;;  %v6449_v1 = vld [vmem:[#allocation7 + $0x364] sm:$0xf]  ;;  %v4671_v55 = vld [vmem:[#allocation7 + $0x2e8] sm:$0xf] }
  0x62   :  { %1428 = vmatpush.bf16.msrb.mxu3 %v4428_v19  ;;  %1390 = vmatmul.bf16.vlgmr.msrb.gmra.mxu0 %v7239_v32  ;;  %v4601_v0 = vld [vmem:[#allocation7 + $0x270] sm:$0xf0]  ;;  %v5004_v2 = vor.u32 %v6517_v58, %v5001_v59  ;;  %v6481_v4 = vld [vmem:[#allocation7 + $0x464] sm:$0xf]  ;;  %v6436_v56 = vld [vmem:[#allocation7 + $0x2f4] sm:$0xf0] }
  0x63   :  { %1434 = vmatpush.bf16.msra.mxu0 %v4668_v20  ;;  %1403 = vmatmul.bf16.vlgmr.msrb.gmra.mxu1 %v7241_v35  ;;  %v4729_v3 = vld [vmem:[#allocation7 + $0x370] sm:$0xf0]  ;;  %v6513_v6 = vld [vmem:[#allocation7 + $0x564] sm:$0xf]  ;;  %v4604_v10 = vor.u32 %v6417_v63, %v4601_v0  ;;  %v4799_v59 = vld [vmem:[#allocation7 + $0x3e8] sm:$0xf]  ;;  %v4672_v0 = vor.u32 %v6436_v56, %v4671_v55 }
  0x64   :  { %1447 = vmatpush.bf16.msra.mxu1 %v4796_v22  ;;  %1416 = vmatmul.bf16.vlgmr.msrb.gmra.mxu2 %v7229_v9  ;;  %v4857_v5 = vld [vmem:[#allocation7 + $0x470] sm:$0xf0]  ;;  %v4732_v11 = vor.u32 %v6449_v1, %v4729_v3  ;;  %v6413_v13 = vld [vmem:[#allocation7 + $0x244] sm:$0xf]  ;;  %v4399_v1 = vld [vmem:[#allocation7 + $0xc8] sm:$0xf] }
  0x65   :  { %1460 = vmatpush.bf16.msra.mxu2 %v4924_v23  ;;  %1429 = vmatmul.bf16.vlgmr.msrb.gmra.mxu3 %v7236_v25  ;;  %v4985_v7 = vld [vmem:[#allocation7 + $0x570] sm:$0xf0]  ;;  %v4860_v12 = vor.u32 %v6481_v4, %v4857_v5  ;;  %v6445_v16 = vld [vmem:[#allocation7 + $0x344] sm:$0xf]  ;;  %v4527_v3 = vld [vmem:[#allocation7 + $0x1c8] sm:$0xf] }
  0x66   :  { %1473 = vmatpush.bf16.msra.mxu3 %v5052_v28  ;;  %v4585_v14 = vld [vmem:[#allocation7 + $0x250] sm:$0xf0]  ;;  %v4988_v17 = vor.u32 %v6513_v6, %v4985_v7  ;;  %v6477_v19 = vld [vmem:[#allocation7 + $0x444] sm:$0xf]  ;;  %v6400_v5 = vld [vmem:[#allocation7 + $0x1d4] sm:$0xf0] }
  0x67   :  { %1435 = vmatpush.bf16.msra.mxu0 %v4652_v36  ;;  %v4713_v18 = vld [vmem:[#allocation7 + $0x350] sm:$0xf0]  ;;  %v6509_v21 = vld [vmem:[#allocation7 + $0x544] sm:$0xf]  ;;  %v4588_v23 = vor.u32 %v6413_v13, %v4585_v14  ;;  %v4655_v6 = vld [vmem:[#allocation7 + $0x2c8] sm:$0xf]  ;;  %v4528_v13 = vor.u32 %v6400_v5, %v4527_v3 }
  0x68   :  { %1448 = vmatpush.bf16.msra.mxu1 %v4780_v37  ;;  %v4841_v20 = vld [vmem:[#allocation7 + $0x450] sm:$0xf0]  ;;  %v4716_v24 = vor.u32 %v6445_v16, %v4713_v18  ;;  %v6409_v27 = vld [vmem:[#allocation7 + $0x224] sm:$0xf]  ;;  %v6432_v7 = vld [vmem:[#allocation7 + $0x2d4] sm:$0xf0] }
  0x69   :  { %1461 = vmatpush.bf16.msra.mxu2 %v4908_v38  ;;  %v4969_v22 = vld [vmem:[#allocation7 + $0x550] sm:$0xf0]  ;;  %v4844_v26 = vor.u32 %v6477_v19, %v4841_v20  ;;  %v6441_v29 = vld [vmem:[#allocation7 + $0x324] sm:$0xf]  ;;  %v4656_v14 = vor.u32 %v6432_v7, %v4655_v6  ;;  %v4383_v16 = vld [vmem:[#allocation7 + $0xa8] sm:$0xf] }
  0x6a   :  { %1474 = vmatpush.bf16.msra.mxu3 %v5036_v42  ;;  %v4569_v28 = vld [vmem:[#allocation7 + $0x230] sm:$0xf0]  ;;  %v4972_v30 = vor.u32 %v6509_v21, %v4969_v22  ;;  %v6473_v33 = vld [vmem:[#allocation7 + $0x424] sm:$0xf]  ;;  %v4511_v18 = vld [vmem:[#allocation7 + $0x1a8] sm:$0xf] }
  0x6b   :  { %1436 = vmatpush.bf16.msra.mxu0 %v4636_v48  ;;  %v4697_v31 = vld [vmem:[#allocation7 + $0x330] sm:$0xf0]  ;;  %v6505_v36 = vld [vmem:[#allocation7 + $0x524] sm:$0xf]  ;;  %v4572_v38 = vor.u32 %v6409_v27, %v4569_v28  ;;  %v6396_v20 = vld [vmem:[#allocation7 + $0x1b4] sm:$0xf0] }
  0x6c   :  { %1449 = vmatpush.bf16.msra.mxu1 %v4764_v49  ;;  %v4825_v34 = vld [vmem:[#allocation7 + $0x430] sm:$0xf0]  ;;  %v6405_v39 = vld [vmem:[#allocation7 + $0x204] sm:$0xf]  ;;  %v4700_v41 = vor.u32 %v6441_v29, %v4697_v31  ;;  %v4639_v21 = vld [vmem:[#allocation7 + $0x2a8] sm:$0xf]  ;;  %v4512_v27 = vor.u32 %v6396_v20, %v4511_v18 }
  0x6d   :  { %1462 = vmatpush.bf16.msra.mxu2 %v4892_v50  ;;  %v4953_v37 = vld [vmem:[#allocation7 + $0x530] sm:$0xf0]  ;;  %v4828_v42 = vor.u32 %v6473_v33, %v4825_v34  ;;  %v6437_v43 = vld [vmem:[#allocation7 + $0x304] sm:$0xf]  ;;  %v4415_v50 = vld [vmem:[#allocation7 + $0xe8] sm:$0xf] }
  0x6e   :  { %1475 = vmatpush.bf16.msra.mxu3 %v5020_v54  ;;  %v4553_v40 = vld [vmem:[#allocation7 + $0x210] sm:$0xf0]  ;;  %v6469_v45 = vld [vmem:[#allocation7 + $0x404] sm:$0xf]  ;;  %v4956_v46 = vor.u32 %v6505_v36, %v4953_v37  ;;  %v6404_v54 = vld [vmem:[#allocation7 + $0x1f4] sm:$0xf0] }
  0x6f   :  { %1437 = vmatpush.bf16.msra.mxu0 %v4620_v60  ;;  %v4681_v44 = vld [vmem:[#allocation7 + $0x310] sm:$0xf0]  ;;  %v6501_v48 = vld [vmem:[#allocation7 + $0x504] sm:$0xf]  ;;  %v4556_v53 = vor.u32 %v6405_v39, %v4553_v40  ;;  %v6468_v60 = vld [vmem:[#allocation7 + $0x3f4] sm:$0xf0]  ;;  %v4544_v63 = vor.u32 %v6404_v54, %v4543_v52 }
  0x70   :  { %1450 = vmatpush.bf16.msra.mxu1 %v4748_v61  ;;  %v4809_v47 = vld [vmem:[#allocation7 + $0x410] sm:$0xf0]  ;;  %v4684_v57 = vor.u32 %v6437_v43, %v4681_v44  ;;  %v4800_v4 = vor.u32 %v6468_v60, %v4799_v59  ;;  %v6428_v22 = vld [vmem:[#allocation7 + $0x2b4] sm:$0xf0]  ;;  %v4367_v29 = vld [vmem:[#allocation7 + $0x88] sm:$0xf] }
  0x71   :  { %1463 = vmatpush.bf16.msra.mxu2 %v4876_v62  ;;  %v4937_v49 = vld [vmem:[#allocation7 + $0x510] sm:$0xf0]  ;;  %v4812_v58 = vor.u32 %v6469_v45, %v4809_v47  ;;  %v4416_v62 = vor.u32 %v6372_v51, %v4415_v50  ;;  %v4640_v28 = vor.u32 %v6428_v22, %v4639_v21  ;;  %v4495_v31 = vld [vmem:[#allocation7 + $0x188] sm:$0xf]  ;;  %v6392_v34 = vld [vmem:[#allocation7 + $0x194] sm:$0xf0] }
  0x72   :  { %1476 = vmatpush.bf16.msra.mxu3 %v5004_v2  ;;  %v4940_v61 = vor.u32 %v6501_v48, %v4937_v49  ;;  %v6368_v2 = vld [vmem:[#allocation7 + $0xd4] sm:$0xf0]  ;;  %v4623_v36 = vld [vmem:[#allocation7 + $0x288] sm:$0xf] }
  0x73   :  { %1438 = vmatpush.bf16.msra.mxu0 %v4604_v10  ;;  %v4783_v10 = vld [vmem:[#allocation7 + $0x3c8] sm:$0xf]  ;;  %v6424_v37 = vld [vmem:[#allocation7 + $0x294] sm:$0xf0] }
  0x74   :  { %1451 = vmatpush.bf16.msra.mxu1 %v4732_v11  ;;  %v6464_v11 = vld [vmem:[#allocation7 + $0x3d4] sm:$0xf0]  ;;  %v4351_v43 = vld [vmem:[#allocation7 + $0x68] sm:$0xf] }
  0x75   :  { %1464 = vmatpush.bf16.msra.mxu2 %v4860_v12  ;;  %v4400_v12 = vor.u32 %v6368_v2, %v4399_v1  ;;  %v4784_v19 = vor.u32 %v6464_v11, %v4783_v10  ;;  %v6456_v39 = vld [vmem:[#allocation7 + $0x394] sm:$0xf0]  ;;  %v4479_v45 = vld [vmem:[#allocation7 + $0x168] sm:$0xf] }
  0x76   :  { %1477 = vmatpush.bf16.msra.mxu3 %v4988_v17  ;;  %v6364_v17 = vld [vmem:[#allocation7 + $0xb4] sm:$0xf0]  ;;  %v4607_v48 = vld [vmem:[#allocation7 + $0x268] sm:$0xf] }
  0x77   :  { %1439 = vmatpush.bf16.msra.mxu0 %v4588_v23  ;;  %v4767_v23 = vld [vmem:[#allocation7 + $0x3a8] sm:$0xf]  ;;  %v6356_v44 = vld [vmem:[#allocation7 + $0x74] sm:$0xf0] }
  0x78   :  { %1452 = vmatpush.bf16.msra.mxu1 %v4716_v24  ;;  %v6460_v24 = vld [vmem:[#allocation7 + $0x3b4] sm:$0xf0]  ;;  %v4735_v50 = vld [vmem:[#allocation7 + $0x368] sm:$0xf]  ;;  %v4352_v52 = vor.u32 %v6356_v44, %v4351_v43 }
  0x79   :  { %1465 = vmatpush.bf16.msra.mxu2 %v4844_v26  ;;  %v4384_v26 = vor.u32 %v6364_v17, %v4383_v16  ;;  %v4768_v33 = vor.u32 %v6460_v24, %v4767_v23  ;;  %v6388_v47 = vld [vmem:[#allocation7 + $0x174] sm:$0xf0]  ;;  %v4335_v55 = vld [vmem:[#allocation7 + $0x48] sm:$0xf] }
  0x7a   :  { %1478 = vmatpush.bf16.msra.mxu3 %v4972_v30  ;;  %v6360_v30 = vld [vmem:[#allocation7 + $0x94] sm:$0xf0]  ;;  %v4591_v60 = vld [vmem:[#allocation7 + $0x248] sm:$0xf] }
  0x7b   :  { %1440 = vmatpush.bf16.msra.mxu0 %v4572_v38  ;;  %v4751_v38 = vld [vmem:[#allocation7 + $0x388] sm:$0xf]  ;;  %v4368_v40 = vor.u32 %v6360_v30, %v4367_v29  ;;  %v6420_v49 = vld [vmem:[#allocation7 + $0x274] sm:$0xf0] }
  0x7c   :  { %1453 = vmatpush.bf16.msra.mxu1 %v4700_v41  ;;  %v4496_v41 = vor.u32 %v6392_v34, %v4495_v31  ;;  %v6452_v51 = vld [vmem:[#allocation7 + $0x374] sm:$0xf0]  ;;  %v4608_v54 = vor.u32 %v6420_v49, %v4607_v48  ;;  %v4319_v3 = vld [vmem:[#allocation7 + $0x28] sm:$0xf]  ;;  %v6370_v34 = vld [vmem:[#allocation7 + $0xec] sm:$0xf] }
  0x7d   :  { %1466 = vmatpush.bf16.msra.mxu2 %v4828_v42  ;;  %v4624_v42 = vor.u32 %v6424_v37, %v4623_v36  ;;  %v6352_v56 = vld [vmem:[#allocation7 + $0x54] sm:$0xf0]  ;;  %v4447_v5 = vld [vmem:[#allocation7 + $0x128] sm:$0xf]  ;;  %v4417_v36 = vld [vmem:[#allocation7 + $0xf8] sm:$0xf0] }
  0x7e   :  { %1479 = vmatpush.bf16.msra.mxu3 %v4956_v46  ;;  %v4752_v46 = vor.u32 %v6456_v39, %v4751_v38  ;;  %v6384_v59 = vld [vmem:[#allocation7 + $0x154] sm:$0xf0]  ;;  %v4575_v10 = vld [vmem:[#allocation7 + $0x228] sm:$0xf]  ;;  %v6402_v39 = vld [vmem:[#allocation7 + $0x1ec] sm:$0xf]  ;;  %v4420_v44 = vor.u32 %v6370_v34, %v4417_v36 }
  0x7f   :  { %1441 = vmatpush.bf16.msra.mxu0 %v4556_v53  ;;  %v4480_v53 = vor.u32 %v6388_v47, %v4479_v45  ;;  %v6380_v7 = vld [vmem:[#allocation7 + $0x134] sm:$0xf0]  ;;  %v4303_v16 = vld [vmem:[#allocation7 + $0x8] sm:$0xf] }
  0x80   :  { %1454 = vmatpush.bf16.msra.mxu1 %v4684_v57  ;;  %v4463_v57 = vld [vmem:[#allocation7 + $0x148] sm:$0xf]  ;;  %v6412_v11 = vld [vmem:[#allocation7 + $0x234] sm:$0xf0]  ;;  %v4448_v18 = vor.u32 %v6380_v7, %v4447_v5 }
  0x81   :  { %1467 = vmatpush.bf16.msra.mxu2 %v4812_v58  ;;  %v4736_v58 = vor.u32 %v6452_v51, %v4735_v50  ;;  %v4464_v1 = vor.u32 %v6384_v59, %v4463_v57  ;;  %v6344_v17 = vld [vmem:[#allocation7 + $0x14] sm:$0xf0]  ;;  %v4431_v20 = vld [vmem:[#allocation7 + $0x108] sm:$0xf]  ;;  %v6366_v50 = vld [vmem:[#allocation7 + $0xcc] sm:$0xf] }
  0x82   :  { %1480 = vmatpush.bf16.msra.mxu3 %v4940_v61  ;;  %1442 = vmatmul.bf16.vlgmr.msra.gmra.mxu0 %v7227_v8  ;;  %v6416_v61 = vld [vmem:[#allocation7 + $0x254] sm:$0xf0]  ;;  %v4559_v22 = vld [vmem:[#allocation7 + $0x208] sm:$0xf]  ;;  %v4304_v31 = vor.u32 %v6344_v17, %v4303_v16  ;;  %v4401_v51 = vld [vmem:[#allocation7 + $0xd8] sm:$0xf0] }
  0x83   :  { %1486 = vmatpush.bf16.msrb.mxu0 %v4416_v62  ;;  %1455 = vmatmul.bf16.vlgmr.msra.gmra.mxu1 %v7231_v15  ;;  %v4719_v62 = vld [vmem:[#allocation7 + $0x348] sm:$0xf]  ;;  %v4592_v2 = vor.u32 %v6416_v61, %v4591_v60  ;;  %v6376_v21 = vld [vmem:[#allocation7 + $0x114] sm:$0xf0]  ;;  %v4497_v16 = vld [vmem:[#allocation7 + $0x198] sm:$0xf0] }
  0x84   :  { %1499 = vmatpush.bf16.msrb.mxu1 %v4544_v63  ;;  %1468 = vmatmul.bf16.vlgmr.msra.gmra.mxu2 %v7239_v32  ;;  %v6448_v63 = vld [vmem:[#allocation7 + $0x354] sm:$0xf0]  ;;  %v5055_v30 = vld [vmem:[#allocation7 + $0x5e8] sm:$0xf]  ;;  %v4432_v37 = vor.u32 %v6376_v21, %v4431_v20 }
  0x85   :  { %1512 = vmatpush.bf16.msrb.mxu2 %v4672_v0  ;;  %1481 = vmatmul.bf16.vlgmr.msra.gmra.mxu3 %v7241_v35  ;;  %v4336_v0 = vor.u32 %v6352_v56, %v4335_v55  ;;  %v4720_v6 = vor.u32 %v6448_v63, %v4719_v62  ;;  %v6408_v24 = vld [vmem:[#allocation7 + $0x214] sm:$0xf0]  ;;  %v4911_v45 = vld [vmem:[#allocation7 + $0x4c8] sm:$0xf]  ;;  %v4404_v56 = vor.u32 %v6366_v50, %v4401_v51  ;;  %v6362_v62 = vld [vmem:[#allocation7 + $0xac] sm:$0xf] }
  0x86   :  { %1525 = vmatpush.bf16.msrb.mxu3 %v4800_v4  ;;  %v6348_v4 = vld [vmem:[#allocation7 + $0x34] sm:$0xf0]  ;;  %v4560_v38 = vor.u32 %v6408_v24, %v4559_v22  ;;  %v5039_v47 = vld [vmem:[#allocation7 + $0x5c8] sm:$0xf]  ;;  %v4385_v63 = vld [vmem:[#allocation7 + $0xb8] sm:$0xf0] }
  0x87   :  { %1487 = vmatpush.bf16.msrb.mxu0 %v4400_v12  ;;  %v4703_v12 = vld [vmem:[#allocation7 + $0x328] sm:$0xf]  ;;  %v6500_v29 = vld [vmem:[#allocation7 + $0x4f4] sm:$0xf0] }
  0x88   :  { %1500 = vmatpush.bf16.msrb.mxu1 %v4528_v13  ;;  %v6444_v13 = vld [vmem:[#allocation7 + $0x334] sm:$0xf0]  ;;  %v4895_v57 = vld [vmem:[#allocation7 + $0x4a8] sm:$0xf] }
  0x89   :  { %1513 = vmatpush.bf16.msrb.mxu2 %v4656_v14  ;;  %v4320_v14 = vor.u32 %v6348_v4, %v4319_v3  ;;  %v4704_v23 = vor.u32 %v6444_v13, %v4703_v12  ;;  %v6528_v49 = vld [vmem:[#allocation7 + $0x5d4] sm:$0xf0]  ;;  %v5023_v59 = vld [vmem:[#allocation7 + $0x5a8] sm:$0xf]  ;;  %v4388_v4 = vor.u32 %v6362_v62, %v4385_v63  ;;  %v6358_v12 = vld [vmem:[#allocation7 + $0x8c] sm:$0xf] }
  0x8a   :  { %1526 = vmatpush.bf16.msrb.mxu3 %v4784_v19  ;;  %v4576_v19 = vor.u32 %v6412_v11, %v4575_v10  ;;  %v5040_v55 = vor.u32 %v6528_v49, %v5039_v47  ;;  %v6524_v61 = vld [vmem:[#allocation7 + $0x5b4] sm:$0xf0]  ;;  %v4879_v5 = vld [vmem:[#allocation7 + $0x488] sm:$0xf]  ;;  %v4369_v13 = vld [vmem:[#allocation7 + $0x98] sm:$0xf0] }
  0x8b   :  { %1488 = vmatpush.bf16.msrb.mxu0 %v4384_v26  ;;  %v4687_v26 = vld [vmem:[#allocation7 + $0x308] sm:$0xf]  ;;  %v5024_v3 = vor.u32 %v6524_v61, %v5023_v59  ;;  %v6520_v11 = vld [vmem:[#allocation7 + $0x594] sm:$0xf0]  ;;  %v6342_v63 = vld [vmem:[#allocation7 + $0xc] sm:$0xf] }
  0x8c   :  { %1501 = vmatpush.bf16.msrb.mxu1 %v4512_v27  ;;  %v6440_v27 = vld [vmem:[#allocation7 + $0x314] sm:$0xf0]  ;;  %v5007_v7 = vld [vmem:[#allocation7 + $0x588] sm:$0xf] }
  0x8d   :  { %1514 = vmatpush.bf16.msrb.mxu2 %v4640_v28  ;;  %v4927_v28 = vld [vmem:[#allocation7 + $0x4e8] sm:$0xf]  ;;  %v6484_v21 = vld [vmem:[#allocation7 + $0x474] sm:$0xf0] }
  0x8e   :  { %1527 = vmatpush.bf16.msrb.mxu3 %v4768_v33  ;;  %v6532_v33 = vld [vmem:[#allocation7 + $0x5f4] sm:$0xf0]  ;;  %v4863_v20 = vld [vmem:[#allocation7 + $0x468] sm:$0xf] }
  0x8f   :  { %1489 = vmatpush.bf16.msrb.mxu0 %v4368_v40  ;;  %v4545_v40 = vld [vmem:[#allocation7 + $0x1f8] sm:$0xf0]  ;;  %v5056_v43 = vor.u32 %v6532_v33, %v5055_v30  ;;  %v4991_v22 = vld [vmem:[#allocation7 + $0x568] sm:$0xf]  ;;  %v6516_v24 = vld [vmem:[#allocation7 + $0x574] sm:$0xf0]  ;;  %v4864_v30 = vor.u32 %v6484_v21, %v4863_v20 }
  0x90   :  { %1502 = vmatpush.bf16.msrb.mxu1 %v4496_v41  ;;  %v4688_v41 = vor.u32 %v6440_v27, %v4687_v26  ;;  %v4548_v48 = vor.u32 %v6402_v39, %v4545_v40  ;;  %v6354_v26 = vld [vmem:[#allocation7 + $0x6c] sm:$0xf]  ;;  %v4353_v27 = vld [vmem:[#allocation7 + $0x78] sm:$0xf0]  ;;  %v4847_v34 = vld [vmem:[#allocation7 + $0x448] sm:$0xf] }
  0x91   :  { %1515 = vmatpush.bf16.msrb.mxu2 %v4624_v42  ;;  %v4928_v42 = vor.u32 %v6500_v29, %v4927_v28  ;;  %v6386_v28 = vld [vmem:[#allocation7 + $0x16c] sm:$0xf]  ;;  %v4481_v29 = vld [vmem:[#allocation7 + $0x178] sm:$0xf0]  ;;  %v4356_v33 = vor.u32 %v6354_v26, %v4353_v27  ;;  %v6480_v36 = vld [vmem:[#allocation7 + $0x454] sm:$0xf0] }
  0x92   :  { %1528 = vmatpush.bf16.msrb.mxu3 %v4752_v46  ;;  %v6496_v46 = vld [vmem:[#allocation7 + $0x4d4] sm:$0xf0]  ;;  %v6350_v40 = vld [vmem:[#allocation7 + $0x4c] sm:$0xf]  ;;  %v4831_v47 = vld [vmem:[#allocation7 + $0x428] sm:$0xf] }
  0x93   :  { %1490 = vmatpush.bf16.msrb.mxu0 %v4352_v52  ;;  %v6398_v52 = vld [vmem:[#allocation7 + $0x1cc] sm:$0xf]  ;;  %v6512_v39 = vld [vmem:[#allocation7 + $0x554] sm:$0xf0]  ;;  %v4959_v49 = vld [vmem:[#allocation7 + $0x528] sm:$0xf] }
  0x94   :  { %1503 = vmatpush.bf16.msrb.mxu1 %v4480_v53  ;;  %v4529_v53 = vld [vmem:[#allocation7 + $0x1d8] sm:$0xf0]  ;;  %v6508_v51 = vld [vmem:[#allocation7 + $0x534] sm:$0xf0]  ;;  %v4943_v61 = vld [vmem:[#allocation7 + $0x508] sm:$0xf] }
  0x95   :  { %1516 = vmatpush.bf16.msrb.mxu2 %v4608_v54  ;;  %v4912_v54 = vor.u32 %v6496_v46, %v4911_v45  ;;  %v4532_v60 = vor.u32 %v6398_v52, %v4529_v53  ;;  %v6346_v52 = vld [vmem:[#allocation7 + $0x2c] sm:$0xf]  ;;  %v4321_v53 = vld [vmem:[#allocation7 + $0x38] sm:$0xf0]  ;;  %v4960_v59 = vor.u32 %v6508_v51, %v4959_v49  ;;  %v6504_v62 = vld [vmem:[#allocation7 + $0x514] sm:$0xf0] }
  0x96   :  { %1529 = vmatpush.bf16.msrb.mxu3 %v4736_v58  ;;  %v6492_v58 = vld [vmem:[#allocation7 + $0x4b4] sm:$0xf0]  ;;  %v4785_v27 = vld [vmem:[#allocation7 + $0x3d8] sm:$0xf0]  ;;  %v6422_v49 = vld [vmem:[#allocation7 + $0x28c] sm:$0xf] }
  0x97   :  { %1491 = vmatpush.bf16.msrb.mxu0 %v4336_v0  ;;  %v6394_v0 = vld [vmem:[#allocation7 + $0x1ac] sm:$0xf] }
  0x98   :  { %1504 = vmatpush.bf16.msrb.mxu1 %v4464_v1  ;;  %v4513_v1 = vld [vmem:[#allocation7 + $0x1b8] sm:$0xf0]  ;;  %v6454_v51 = vld [vmem:[#allocation7 + $0x38c] sm:$0xf] }
  0x99   :  { %1517 = vmatpush.bf16.msrb.mxu2 %v4592_v2  ;;  %v4896_v2 = vor.u32 %v6492_v58, %v4895_v57  ;;  %v4516_v10 = vor.u32 %v6394_v0, %v4513_v1  ;;  %v4815_v57 = vld [vmem:[#allocation7 + $0x408] sm:$0xf]  ;;  %v6472_v58 = vld [vmem:[#allocation7 + $0x414] sm:$0xf0]  ;;  %v4305_v1 = vld [vmem:[#allocation7 + $0x18] sm:$0xf0] }
  0x9a   :  { %1530 = vmatpush.bf16.msrb.mxu3 %v4720_v6  ;;  %v6488_v6 = vld [vmem:[#allocation7 + $0x494] sm:$0xf0] }
  0x9b   :  { %1492 = vmatpush.bf16.msrb.mxu0 %v4320_v14  ;;  %v6390_v14 = vld [vmem:[#allocation7 + $0x18c] sm:$0xf]  ;;  %v4880_v17 = vor.u32 %v6488_v6, %v4879_v5  ;;  %v4673_v5 = vld [vmem:[#allocation7 + $0x2f8] sm:$0xf0] }
  0x9c   :  { %1505 = vmatpush.bf16.msrb.mxu1 %v4448_v18  ;;  %v5008_v18 = vor.u32 %v6520_v11, %v5007_v7  ;;  %v6466_v6 = vld [vmem:[#allocation7 + $0x3ec] sm:$0xf]  ;;  %v4816_v7 = vor.u32 %v6472_v58, %v4815_v57  ;;  %v5009_v57 = vld [vmem:[#allocation7 + $0x598] sm:$0xf0] }
  0x9d   :  { %1518 = vmatpush.bf16.msrb.mxu2 %v4576_v19  ;;  %v4372_v19 = vor.u32 %v6358_v12, %v4369_v13  ;;  %v6498_v11 = vld [vmem:[#allocation7 + $0x4ec] sm:$0xf]  ;;  %v4929_v12 = vld [vmem:[#allocation7 + $0x4f8] sm:$0xf0]  ;;  %v4944_v13 = vor.u32 %v6504_v62, %v4943_v61 }
  0x9e   :  { %1531 = vmatpush.bf16.msrb.mxu3 %v4704_v23  ;;  %v4500_v23 = vor.u32 %v6390_v14, %v4497_v16  ;;  %v4308_v14 = vor.u32 %v6342_v63, %v4305_v1  ;;  %v6530_v16 = vld [vmem:[#allocation7 + $0x5ec] sm:$0xf]  ;;  %v4932_v21 = vor.u32 %v6498_v11, %v4929_v12  ;;  %v4737_v63 = vld [vmem:[#allocation7 + $0x378] sm:$0xf0] }
  0x9f   :  { %1493 = vmatpush.bf16.msrb.mxu0 %v4304_v31  ;;  %v4992_v31 = vor.u32 %v6516_v24, %v4991_v22  ;;  %v6430_v22 = vld [vmem:[#allocation7 + $0x2cc] sm:$0xf]  ;;  %v4865_v1 = vld [vmem:[#allocation7 + $0x478] sm:$0xf0] }
  0xa0   :  { %1506 = vmatpush.bf16.msrb.mxu1 %v4432_v37  ;;  %v4975_v37 = vld [vmem:[#allocation7 + $0x548] sm:$0xf]  ;;  %v6462_v24 = vld [vmem:[#allocation7 + $0x3cc] sm:$0xf]  ;;  %v4593_v11 = vld [vmem:[#allocation7 + $0x258] sm:$0xf0] }
  0xa1   :  { %1519 = vmatpush.bf16.msrb.mxu2 %v4560_v38  ;;  %v4484_v38 = vor.u32 %v6386_v28, %v4481_v29  ;;  %v4976_v45 = vor.u32 %v6512_v39, %v4975_v37  ;;  %v6494_v28 = vld [vmem:[#allocation7 + $0x4cc] sm:$0xf]  ;;  %v4913_v29 = vld [vmem:[#allocation7 + $0x4d8] sm:$0xf0] }
  0xa2   :  { %1532 = vmatpush.bf16.msrb.mxu3 %v4688_v41  ;;  %1494 = vmatmul.bf16.vlgmr.msrb.gmra.mxu0 %v7229_v9  ;;  %v4337_v41 = vld [vmem:[#allocation7 + $0x58] sm:$0xf0]  ;;  %v6426_v37 = vld [vmem:[#allocation7 + $0x2ac] sm:$0xf] }
  0xa3   :  { %1538 = vmatpush.bf16.msra.mxu0 %v4928_v42  ;;  %1507 = vmatmul.bf16.vlgmr.msrb.gmra.mxu1 %v7236_v25  ;;  %v6382_v42 = vld [vmem:[#allocation7 + $0x14c] sm:$0xf]  ;;  %v4340_v46 = vor.u32 %v6350_v40, %v4337_v41  ;;  %v4769_v41 = vld [vmem:[#allocation7 + $0x3b8] sm:$0xf0] }
  0xa4   :  { %1551 = vmatpush.bf16.msra.mxu1 %v5056_v43  ;;  %1520 = vmatmul.bf16.vlgmr.msrb.gmra.mxu2 %v7227_v8  ;;  %v4465_v43 = vld [vmem:[#allocation7 + $0x158] sm:$0xf0]  ;;  %v6458_v39 = vld [vmem:[#allocation7 + $0x3ac] sm:$0xf] }
  0xa5   :  { %1564 = vmatpush.bf16.msra.mxu2 %v4420_v44  ;;  %1533 = vmatmul.bf16.vlgmr.msrb.gmra.mxu3 %v7231_v15  ;;  %v4848_v44 = vor.u32 %v6480_v36, %v4847_v34  ;;  %v4468_v50 = vor.u32 %v6382_v42, %v4465_v43  ;;  %v4788_v34 = vor.u32 %v6462_v24, %v4785_v27  ;;  %v6490_v42 = vld [vmem:[#allocation7 + $0x4ac] sm:$0xf]  ;;  %v4897_v43 = vld [vmem:[#allocation7 + $0x4b8] sm:$0xf0] }
  0xa6   :  { %1577 = vmatpush.bf16.msra.mxu3 %v4548_v48  ;;  %v6476_v48 = vld [vmem:[#allocation7 + $0x434] sm:$0xf0]  ;;  %v4916_v36 = vor.u32 %v6494_v28, %v4913_v29  ;;  %v6450_v61 = vld [vmem:[#allocation7 + $0x36c] sm:$0xf]  ;;  %v4577_v27 = vld [vmem:[#allocation7 + $0x238] sm:$0xf0] }
  0xa7   :  { %1539 = vmatpush.bf16.msra.mxu0 %v4912_v54  ;;  %v6378_v54 = vld [vmem:[#allocation7 + $0x12c] sm:$0xf]  ;;  %v4705_v29 = vld [vmem:[#allocation7 + $0x338] sm:$0xf0] }
  0xa8   :  { %1552 = vmatpush.bf16.msra.mxu1 %v5040_v55  ;;  %v4449_v55 = vld [vmem:[#allocation7 + $0x138] sm:$0xf0]  ;;  %v6446_v12 = vld [vmem:[#allocation7 + $0x34c] sm:$0xf] }
  0xa9   :  { %1565 = vmatpush.bf16.msra.mxu2 %v4404_v56  ;;  %v4832_v56 = vor.u32 %v6476_v48, %v4831_v47  ;;  %v4452_v0 = vor.u32 %v6378_v54, %v4449_v55  ;;  %v4772_v47 = vor.u32 %v6458_v39, %v4769_v41  ;;  %v4900_v48 = vor.u32 %v6490_v42, %v4897_v43  ;;  %v6486_v54 = vld [vmem:[#allocation7 + $0x48c] sm:$0xf]  ;;  %v4881_v55 = vld [vmem:[#allocation7 + $0x498] sm:$0xf0] }
  0xaa   :  { %1578 = vmatpush.bf16.msra.mxu3 %v4532_v60  ;;  %v4324_v60 = vor.u32 %v6346_v52, %v4321_v53  ;;  %v4753_v53 = vld [vmem:[#allocation7 + $0x398] sm:$0xf0]  ;;  %v6442_v28 = vld [vmem:[#allocation7 + $0x32c] sm:$0xf] }
  0xab   :  { %1540 = vmatpush.bf16.msra.mxu0 %v4896_v2  ;;  %v6374_v2 = vld [vmem:[#allocation7 + $0x10c] sm:$0xf]  ;;  %v4756_v58 = vor.u32 %v6454_v51, %v4753_v53  ;;  %v4561_v42 = vld [vmem:[#allocation7 + $0x218] sm:$0xf0] }
  0xac   :  { %1553 = vmatpush.bf16.msra.mxu1 %v5024_v3  ;;  %v4433_v3 = vld [vmem:[#allocation7 + $0x118] sm:$0xf0]  ;;  %v6406_v41 = vld [vmem:[#allocation7 + $0x20c] sm:$0xf] }
  0xad   :  { %1566 = vmatpush.bf16.msra.mxu2 %v4388_v4  ;;  %v6434_v4 = vld [vmem:[#allocation7 + $0x2ec] sm:$0xf] }
  0xae   :  { %1579 = vmatpush.bf16.msra.mxu3 %v4516_v10  ;;  %v4801_v10 = vld [vmem:[#allocation7 + $0x3f8] sm:$0xf0]  ;;  %v6502_v51 = vld [vmem:[#allocation7 + $0x50c] sm:$0xf] }
  0xaf   :  { %1541 = vmatpush.bf16.msra.mxu0 %v4880_v17  ;;  %v5057_v17 = vld [vmem:[#allocation7 + $0x5f8] sm:$0xf0]  ;;  %v4804_v20 = vor.u32 %v6466_v6, %v4801_v10  ;;  %v4740_v6 = vor.u32 %v6450_v61, %v4737_v63  ;;  %v6414_v10 = vld [vmem:[#allocation7 + $0x24c] sm:$0xf]  ;;  %v6659_v63 = vld [vmem:[#allocation10 + $0x3ec] sm:$0xf0] }
  0xb0   :  { %1554 = vmatpush.bf16.msra.mxu1 %v5008_v18  ;;  %v4436_v18 = vor.u32 %v6374_v2, %v4433_v3  ;;  %v5060_v26 = vor.u32 %v6530_v16, %v5057_v17  ;;  %v6514_v2 = vld [vmem:[#allocation7 + $0x56c] sm:$0xf]  ;;  %v4993_v3 = vld [vmem:[#allocation7 + $0x578] sm:$0xf0] }
  0xb1   :  { %1567 = vmatpush.bf16.msra.mxu2 %v4372_v19  ;;  %v4676_v19 = vor.u32 %v6434_v4, %v4673_v5  ;;  %v6478_v16 = vld [vmem:[#allocation7 + $0x44c] sm:$0xf]  ;;  %v4849_v17 = vld [vmem:[#allocation7 + $0x458] sm:$0xf0] }
  0xb2   :  { %1580 = vmatpush.bf16.msra.mxu3 %v4500_v23  ;;  %v4657_v23 = vld [vmem:[#allocation7 + $0x2d8] sm:$0xf0] }
  0xb3   :  { %1542 = vmatpush.bf16.msra.mxu0 %v4864_v30  ;;  %v6526_v30 = vld [vmem:[#allocation7 + $0x5cc] sm:$0xf] }
  0xb4   :  { %1555 = vmatpush.bf16.msra.mxu1 %v4992_v31  ;;  %v5041_v31 = vld [vmem:[#allocation7 + $0x5d8] sm:$0xf0] }
  0xb5   :  { %1568 = vmatpush.bf16.msra.mxu2 %v4356_v33  ;;  %v4660_v33 = vor.u32 %v6430_v22, %v4657_v23  ;;  %v5044_v40 = vor.u32 %v6526_v30, %v5041_v31  ;;  %v6410_v22 = vld [vmem:[#allocation7 + $0x22c] sm:$0xf] }
  0xb6   :  { %1581 = vmatpush.bf16.msra.mxu3 %v4484_v38  ;;  %v4641_v38 = vld [vmem:[#allocation7 + $0x2b8] sm:$0xf0]  ;;  %v6474_v31 = vld [vmem:[#allocation7 + $0x42c] sm:$0xf] }
  0xb7   :  { %1543 = vmatpush.bf16.msra.mxu0 %v4848_v44  ;;  %v6522_v44 = vld [vmem:[#allocation7 + $0x5ac] sm:$0xf] }
  0xb8   :  { %1556 = vmatpush.bf16.msra.mxu1 %v4976_v45  ;;  %v5025_v45 = vld [vmem:[#allocation7 + $0x5b8] sm:$0xf0] }
  0xb9   :  { %1569 = vmatpush.bf16.msra.mxu2 %v4340_v46  ;;  %v4644_v46 = vor.u32 %v6426_v37, %v4641_v38  ;;  %v5028_v52 = vor.u32 %v6522_v44, %v5025_v45  ;;  %v6506_v37 = vld [vmem:[#allocation7 + $0x52c] sm:$0xf]  ;;  %v4961_v38 = vld [vmem:[#allocation7 + $0x538] sm:$0xf0]  ;;  %v4708_v44 = vor.u32 %v6442_v28, %v4705_v29  ;;  %v6587_v29 = vld [vmem:[#allocation10 + $0x1ac] sm:$0xf0] }
  0xba   :  { %1582 = vmatpush.bf16.msra.mxu3 %v4468_v50  ;;  %v4625_v50 = vld [vmem:[#allocation7 + $0x298] sm:$0xf0] }
  0xbb   :  { %1544 = vmatpush.bf16.msra.mxu0 %v4832_v56  ;;  %v6518_v56 = vld [vmem:[#allocation7 + $0x58c] sm:$0xf] }
  0xbc   :  { %1557 = vmatpush.bf16.msra.mxu1 %v4960_v59  ;;  %v6418_v59 = vld [vmem:[#allocation7 + $0x26c] sm:$0xf]  ;;  %v5012_v62 = vor.u32 %v6518_v56, %v5009_v57  ;;  %v5303_v56 = vld [vmem:[#allocation10 + $0x1e0] sm:$0xf]  ;;  %v4564_v57 = vor.u32 %v6406_v41, %v4561_v42  ;;  %v6551_v41 = vld [vmem:[#allocation10 + $0x8c] sm:$0xf0] }
  0xbd   :  { %1570 = vmatpush.bf16.msra.mxu2 %v4324_v60  ;;  %v4609_v60 = vld [vmem:[#allocation7 + $0x278] sm:$0xf0]  ;;  %v5255_v42 = vld [vmem:[#allocation10 + $0x180] sm:$0xf] }
  0xbe   :  { %1583 = vmatpush.bf16.msra.mxu3 %v4452_v0  ;;  %v6482_v0 = vld [vmem:[#allocation7 + $0x46c] sm:$0xf]  ;;  %v4612_v4 = vor.u32 %v6418_v59, %v4609_v60 }
  0xbf   :  { %1545 = vmatpush.bf16.msra.mxu0 %v4816_v7  ;;  %v4868_v7 = vor.u32 %v6482_v0, %v4865_v1 }
  0xc0   :  { %1558 = vmatpush.bf16.msra.mxu1 %v4944_v13  ;;  %v4996_v13 = vor.u32 %v6514_v2, %v4993_v3  ;;  %v1352_v23 = vpop.f32.mrf.mxu1 }
  0xc1   :  { %1571 = vmatpush.bf16.msra.mxu2 %v4308_v14  ;;  %v4721_v14 = vld [vmem:[#allocation7 + $0x358] sm:$0xf0] }
  0xc2   :  { %1584 = vmatpush.bf16.msra.mxu3 %v4436_v18  ;;  %1546 = vmatmul.bf16.vlgmr.msra.gmra.mxu0 %v7239_v32  ;;  %v6510_v18 = vld [vmem:[#allocation7 + $0x54c] sm:$0xf]  ;;  %v4724_v24 = vor.u32 %v6446_v12, %v4721_v14  ;;  %v5415_v14 = vld [vmem:[#allocation10 + $0x2c0] sm:$0xf] }
  0xc3   :  { %1590 = vmatpush.bf16.msrb.mxu0 %v4676_v19  ;;  %1559 = vmatmul.bf16.vlgmr.msra.gmra.mxu1 %v7241_v35  ;;  %v4977_v19 = vld [vmem:[#allocation7 + $0x558] sm:$0xf0] }
  0xc4   :  { %1603 = vmatpush.bf16.msrb.mxu1 %v4804_v20  ;;  %1572 = vmatmul.bf16.vlgmr.msra.gmra.mxu2 %v7229_v9  ;;  %v4628_v9 = vor.u32 %v6422_v49, %v4625_v50  ;;  %v7259_v20 = vld [vmem:[#allocation8] sm:$0xf]  ;;  %v4980_v30 = vor.u32 %v6510_v18, %v4977_v19  ;;  %v4964_v49 = vor.u32 %v6506_v37, %v4961_v38  ;;  %v4817_v50 = vld [vmem:[#allocation7 + $0x418] sm:$0xf0]  ;;  %v6655_v18 = vld [vmem:[#allocation10 + $0x3cc] sm:$0xf0] }
  0xc5   :  { %1616 = vmatpush.bf16.msrb.mxu2 %v4932_v21  ;;  %1585 = vmatmul.bf16.vlgmr.msra.gmra.mxu3 %v7236_v25  ;;  %v4884_v25 = vor.u32 %v6486_v54, %v4881_v55  ;;  %v4596_v21 = vor.u32 %v6414_v10, %v4593_v11  ;;  %v5175_v54 = vld [vmem:[#allocation10 + $0xe0] sm:$0xf]  ;;  %v6563_v55 = vld [vmem:[#allocation10 + $0xec] sm:$0xf0] }
  0xc6   :  { %1629 = vmatpush.bf16.msrb.mxu3 %v5060_v26  ;;  %v1339_v5 = vpop.f32.mrf.mxu0  ;;  %v4852_v26 = vor.u32 %v6478_v16, %v4849_v17  ;;  %v5176_v1 = vor.u32 %v6563_v55, %v5175_v54  ;;  %v5287_v10 = vld [vmem:[#allocation10 + $0x1c0] sm:$0xf]  ;;  %v6623_v16 = vld [vmem:[#allocation10 + $0x2cc] sm:$0xf0] }
  0xc7   :  { %1591 = vmatpush.bf16.msrb.mxu0 %v4660_v33  ;;  %v4833_v33 = vld [vmem:[#allocation7 + $0x438] sm:$0xf0]  ;;  %v5543_v17 = vld [vmem:[#allocation10 + $0x3c0] sm:$0xf]  ;;  %v6579_v55 = vld [vmem:[#allocation10 + $0x16c] sm:$0xf0] }
  0xc8   :  { %1604 = vmatpush.bf16.msrb.mxu1 %v4788_v34  ;;  %v362_v34 = vperm.slane %v7259_v20, 0  ;;  %v7262_v39 = vpop.f32.mrf.mxu3  ;;  %v4836_v45 = vor.u32 %v6474_v31, %v4833_v33  ;;  %v1354_v59 = vpop.f32.mrf.mxu1  ;;  %v5544_v28 = vor.u32 %v6655_v18, %v5543_v17  ;;  %v6619_v31 = vld [vmem:[#allocation10 + $0x2ac] sm:$0xf0]  ;;  %v5527_v33 = vld [vmem:[#allocation10 + $0x3a0] sm:$0xf] }
  0xc9   :  { %1617 = vmatpush.bf16.msrb.mxu2 %v4916_v36  ;;  %v5079_v17 = vld [vmem:[#allocation10 + $0x20] sm:$0xf]  ;;  %v6539_v18 = vld [vmem:[#allocation10 + $0x2c] sm:$0xf0] }
  0xca   :  { %1630 = vmatpush.bf16.msrb.mxu3 %v5044_v40  ;;  %v4580_v40 = vor.u32 %v6410_v22, %v4577_v27  ;;  %v1340_v53 = vadd.f32 %v1339_v5, %v362_v34  ;;  %v5271_v27 = vld [vmem:[#allocation10 + $0x1a0] sm:$0xf]  ;;  %v6651_v34 = vld [vmem:[#allocation10 + $0x3ac] sm:$0xf0] }
  0xcb   :  { %1592 = vmatpush.bf16.msrb.mxu0 %v4644_v46  ;;  %v6438_v46 = vld [vmem:[#allocation7 + $0x30c] sm:$0xf]  ;;  %v5272_v38 = vor.u32 %v6587_v29, %v5271_v27  ;;  %v6635_v27 = vld [vmem:[#allocation10 + $0x32c] sm:$0xf0]  ;;  %v5063_v29 = vld [vmem:[#allocation10] sm:$0xf] }
  0xcc   :  { %1605 = vmatpush.bf16.msrb.mxu1 %v4772_v47  ;;  %v4689_v47 = vld [vmem:[#allocation7 + $0x318] sm:$0xf0]  ;;  %v1353_v2 = vadd.f32 %v1352_v23, %v1340_v53  ;;  %v5416_v23 = vor.u32 %v6623_v16, %v5415_v14  ;;  %v5239_v53 = vld [vmem:[#allocation10 + $0x160] sm:$0xf] }
  0xcd   :  { %1618 = vmatpush.bf16.msrb.mxu2 %v4900_v48  ;;  %v1365_v36 = vpop.f32.mrf.mxu2  ;;  %v6470_v48 = vld [vmem:[#allocation7 + $0x40c] sm:$0xf]  ;;  %v4692_v60 = vor.u32 %v6438_v46, %v4689_v47  ;;  %v5511_v46 = vld [vmem:[#allocation10 + $0x380] sm:$0xf] }
  0xce   :  { %1631 = vmatpush.bf16.msrb.mxu3 %v5028_v52  ;;  %v1341_v43 = vpop.f32.mrf.mxu0  ;;  %v4945_v52 = vld [vmem:[#allocation7 + $0x518] sm:$0xf0]  ;;  %v4820_v61 = vor.u32 %v6470_v48, %v4817_v50 }
  0xcf   :  { %1593 = vmatpush.bf16.msrb.mxu0 %v4628_v9  ;;  %v6595_v9 = vld [vmem:[#allocation10 + $0x1ec] sm:$0xf0]  ;;  %v4948_v0 = vor.u32 %v6502_v51, %v4945_v52  ;;  %v5528_v43 = vor.u32 %v6651_v34, %v5527_v33  ;;  %v5111_v51 = vld [vmem:[#allocation10 + $0x60] sm:$0xf] }
  0xd0   :  { %1606 = vmatpush.bf16.msrb.mxu1 %v4756_v58  ;;  %v5431_v58 = vld [vmem:[#allocation10 + $0x2e0] sm:$0xf]  ;;  %v1380_v11 = vpop.f32.mrf.mxu3  ;;  %v6547_v52 = vld [vmem:[#allocation10 + $0x6c] sm:$0xf0] }
  0xd1   :  { %1619 = vmatpush.bf16.msrb.mxu2 %v4884_v25  ;;  %v6627_v25 = vld [vmem:[#allocation10 + $0x2ec] sm:$0xf0]  ;;  %v5112_v59 = vor.u32 %v6547_v52, %v5111_v51  ;;  %v5191_v34 = vld [vmem:[#allocation10 + $0x100] sm:$0xf] }
  0xd2   :  { %1632 = vmatpush.bf16.msrb.mxu3 %v5012_v62  ;;  %v5559_v62 = vld [vmem:[#allocation10 + $0x3e0] sm:$0xf]  ;;  %v5432_v5 = vor.u32 %v6627_v25, %v5431_v58  ;;  %v6643_v25 = vld [vmem:[#allocation10 + $0x36c] sm:$0xf0] }
  0xd3   :  { %1594 = vmatpush.bf16.msrb.mxu0 %v4612_v4  ;;  %v5304_v4 = vor.u32 %v6595_v9, %v5303_v56  ;;  %v5560_v12 = vor.u32 %v6659_v63, %v5559_v62  ;;  %v5367_v56 = vld [vmem:[#allocation10 + $0x260] sm:$0xf]  ;;  %v6543_v63 = vld [vmem:[#allocation10 + $0x4c] sm:$0xf0] }
  0xd4   :  { %1607 = vmatpush.bf16.msrb.mxu1 %v4740_v6  ;;  %v5159_v6 = vld [vmem:[#allocation10 + $0xc0] sm:$0xf]  ;;  %v154_v51 = vld [vmem:[#allocation5 + $0x10] sm:$0xff] }
  0xd5   :  { %1620 = vmatpush.bf16.msrb.mxu2 %v4868_v7  ;;  %v1367_v3 = vpop.f32.mrf.mxu2  ;;  %v6559_v7 = vld [vmem:[#allocation10 + $0xcc] sm:$0xf0]  ;;  %v5495_v58 = vld [vmem:[#allocation10 + $0x360] sm:$0xf] }
  0xd6   :  { %1633 = vmatpush.bf16.msrb.mxu3 %v4996_v13  ;;  %v6591_v13 = vld [vmem:[#allocation10 + $0x1cc] sm:$0xf0]  ;;  %v5160_v19 = vor.u32 %v6559_v7, %v5159_v6  ;;  %v5095_v62 = vld [vmem:[#allocation10 + $0x40] sm:$0xf] }
  0xd7   :  { %1595 = vmatpush.bf16.msrb.mxu0 %v4596_v21  ;;  %v1366_v21 = vadd.f32 %v1365_v36, %v1353_v2  ;;  %v5288_v22 = vor.u32 %v6591_v13, %v5287_v10  ;;  %v6575_v2 = vld [vmem:[#allocation10 + $0x14c] sm:$0xf0]  ;;  %v5351_v3 = vld [vmem:[#allocation10 + $0x240] sm:$0xf] }
  0xd8   :  { %1608 = vmatpush.bf16.msrb.mxu1 %v4724_v24  ;;  %v5143_v24 = vld [vmem:[#allocation10 + $0xa0] sm:$0xf]  ;;  %v6639_v7 = vld [vmem:[#allocation10 + $0x34c] sm:$0xf0] }
  0xd9   :  { %1621 = vmatpush.bf16.msrb.mxu2 %v4852_v26  ;;  %v6555_v26 = vld [vmem:[#allocation10 + $0xac] sm:$0xf0]  ;;  %v1379_v37 = vadd.f32 %v7262_v39, %v1366_v21  ;;  %v5479_v6 = vld [vmem:[#allocation10 + $0x340] sm:$0xf] }
  0xda   :  { %1634 = vmatpush.bf16.msrb.mxu3 %v4980_v30  ;;  %v5399_v30 = vld [vmem:[#allocation10 + $0x2a0] sm:$0xf]  ;;  %v5144_v36 = vor.u32 %v6555_v26, %v5143_v24  ;;  %v5480_v21 = vor.u32 %v6639_v7, %v5479_v6  ;;  %v6603_v24 = vld [vmem:[#allocation10 + $0x22c] sm:$0xf0] }
  0xdb   :  { %1596 = vmatpush.bf16.msrb.mxu0 %v4580_v40  ;;  %v5400_v40 = vor.u32 %v6619_v31, %v5399_v30  ;;  %v5463_v26 = vld [vmem:[#allocation10 + $0x320] sm:$0xf]  ;;  %v6535_v30 = vld [vmem:[#allocation10 + $0xc] sm:$0xf0] }
  0xdc   :  { %1609 = vmatpush.bf16.msrb.mxu1 %v4708_v44  ;;  %v6583_v44 = vld [vmem:[#allocation10 + $0x18c] sm:$0xf0] }
  0xdd   :  { %1622 = vmatpush.bf16.msrb.mxu2 %v4836_v45  ;;  %v5383_v45 = vld [vmem:[#allocation10 + $0x280] sm:$0xf] }
  0xde   :  { %1635 = vmatpush.bf16.msrb.mxu3 %v4964_v49 }
  0xdf   :  { %1597 = vmatpush.bf16.msrb.mxu0 %v4564_v57  ;;  %v1391_v47 = vpop.f32.mrf.mxu0  ;;  %v6611_v57 = vld [vmem:[#allocation10 + $0x26c] sm:$0xf0] }
  0xe0   :  { %1610 = vmatpush.bf16.msrb.mxu1 %v4692_v60  ;;  %v1392_v39 = vadd.f32 %v1391_v47, %v1379_v37  ;;  %v1404_v49 = vpop.f32.mrf.mxu1  ;;  %v5240_v60 = vor.u32 %v6579_v55, %v5239_v53  ;;  %v5319_v37 = vld [vmem:[#allocation10 + $0x200] sm:$0xf] }
  0xe1   :  { %1623 = vmatpush.bf16.msrb.mxu2 %v4820_v61  ;;  %v5368_v61 = vor.u32 %v6611_v57, %v5367_v56  ;;  %v5943_v47 = vld [vmem:[#allocation10 + $0x6e0] sm:$0xf]  ;;  %v155_v56 = vld [vmem:[#allocation5 + $0x18] sm:$0xff] }
  0xe2   :  { %1636 = vmatpush.bf16.msrb.mxu3 %v4948_v0  ;;  %1598 = vmatmul.bf16.vlgmr.msrb.gmra.mxu0 %v7227_v8  ;;  %v6615_v8 = vld [vmem:[#allocation10 + $0x28c] sm:$0xf0]  ;;  %v1405_v9 = vadd.f32 %v1404_v49, %v1392_v39  ;;  %v5223_v0 = vld [vmem:[#allocation10 + $0x140] sm:$0xf]  ;;  %v7278_v6 = vpack.c.bf16 %v155_v56, %v155_v56 }
  0xe3   :  { %3188 = vmatpush.bf16.msra.mxu0 %v5176_v1  ;;  %1611 = vmatmul.bf16.vlgmr.msrb.gmra.mxu1 %v7231_v15  ;;  %v5256_v15 = vor.u32 %v6583_v44, %v5255_v42  ;;  %v5384_v50 = vor.u32 %v6615_v8, %v5383_v45  ;;  %v5496_v1 = vor.u32 %v6643_v25, %v5495_v58  ;;  %v6691_v44 = vld [vmem:[#allocation10 + $0x4ec] sm:$0xf0]  ;;  %v5815_v45 = vld [vmem:[#allocation10 + $0x5e0] sm:$0xf] }
  0xe4   :  { %3201 = vmatpush.bf16.msra.mxu1 %v5304_v4  ;;  %1624 = vmatmul.bf16.vlgmr.msrb.gmra.mxu2 %v7239_v32  ;;  %v5127_v32 = vld [vmem:[#allocation10 + $0x80] sm:$0xf]  ;;  %3604 = vst [vmem:[#allocation14] sm:$0xff] %v1405_v9  ;;  %v6607_v4 = vld [vmem:[#allocation10 + $0x24c] sm:$0xf0]  ;;  %v5224_v14 = vor.u32 %v6575_v2, %v5223_v0 }
  0xe5   :  { %3214 = vmatpush.bf16.msra.mxu2 %v5432_v5  ;;  %1637 = vmatmul.bf16.vlgmr.msrb.gmra.mxu3 %v7241_v35  ;;  %v6647_v35 = vld [vmem:[#allocation10 + $0x38c] sm:$0xf0]  ;;  %v5128_v48 = vor.u32 %v6551_v41, %v5127_v32  ;;  %v5352_v16 = vor.u32 %v6607_v4, %v5351_v3  ;;  %v5447_v32 = vld [vmem:[#allocation10 + $0x300] sm:$0xf] }
  0xe6   :  { %3227 = vmatpush.bf16.msra.mxu3 %v5560_v12  ;;  %v5512_v54 = vor.u32 %v6647_v35, %v5511_v46  ;;  %v5096_v12 = vor.u32 %v6543_v63, %v5095_v62  ;;  %v6631_v41 = vld [vmem:[#allocation10 + $0x30c] sm:$0xf0]  ;;  %v5064_v46 = vor.u32 %v6535_v30, %v5063_v29  ;;  %v152_v55 = vld [vmem:[#allocation5] sm:$0xff] }
  0xe7   :  { %3189 = vmatpush.bf16.msra.mxu0 %v5160_v19  ;;  %v7269_v5 = vpop.f32.mrf.mxu2  ;;  %v1393_v11 = vpop.f32.mrf.mxu0  ;;  %v5207_v19 = vld [vmem:[#allocation10 + $0x120] sm:$0xf]  ;;  %v6723_v35 = vld [vmem:[#allocation10 + $0x5ec] sm:$0xf0]  ;;  %v5448_v52 = vor.u32 %v6631_v41, %v5447_v32  ;;  %v7276_v4 = vpack.c.bf16 %v152_v55, %v152_v55 }
  0xe8   :  { %3202 = vmatpush.bf16.msra.mxu1 %v5288_v22  ;;  %v7271_v10 = vpop.f32.mrf.mxu3  ;;  %v1406_v13 = vpop.f32.mrf.mxu1  ;;  %v6571_v22 = vld [vmem:[#allocation10 + $0x12c] sm:$0xf0]  ;;  %v5816_v57 = vor.u32 %v6723_v35, %v5815_v45  ;;  %v5799_v25 = vld [vmem:[#allocation10 + $0x5c0] sm:$0xf] }
  0xe9   :  { %3215 = vmatpush.bf16.msra.mxu2 %v5416_v23  ;;  %v5335_v23 = vld [vmem:[#allocation10 + $0x220] sm:$0xf]  ;;  %v5208_v31 = vor.u32 %v6571_v22, %v5207_v19  ;;  %v6687_v58 = vld [vmem:[#allocation10 + $0x4cc] sm:$0xf0] }
  0xea   :  { %3228 = vmatpush.bf16.msra.mxu3 %v5544_v28  ;;  %v5080_v28 = vor.u32 %v6539_v18, %v5079_v17  ;;  %v5336_v33 = vor.u32 %v6603_v24, %v5335_v23  ;;  %v6719_v62 = vld [vmem:[#allocation10 + $0x5cc] sm:$0xf0]  ;;  %v5927_v63 = vld [vmem:[#allocation10 + $0x6c0] sm:$0xf] }
  0xeb   :  { %3190 = vmatpush.bf16.msra.mxu0 %v5144_v36  ;;  %v6567_v36 = vld [vmem:[#allocation10 + $0x10c] sm:$0xf0]  ;;  %v6055_v2 = vld [vmem:[#allocation10 + $0x7c0] sm:$0xf] }
  0xec   :  { %3203 = vmatpush.bf16.msra.mxu1 %v5272_v38  ;;  %v5464_v38 = vor.u32 %v6635_v27, %v5463_v26  ;;  %v5192_v39 = vor.u32 %v6567_v36, %v5191_v34  ;;  %v6751_v0 = vld [vmem:[#allocation10 + $0x6cc] sm:$0xf0]  ;;  %v5783_v18 = vld [vmem:[#allocation10 + $0x5a0] sm:$0xf] }
  0xed   :  { %3216 = vmatpush.bf16.msra.mxu2 %v5400_v40  ;;  %v6599_v40 = vld [vmem:[#allocation10 + $0x20c] sm:$0xf0]  ;;  %v5928_v13 = vor.u32 %v6751_v0, %v5927_v63  ;;  %v5911_v22 = vld [vmem:[#allocation10 + $0x6a0] sm:$0xf] }
  0xee   :  { %3229 = vmatpush.bf16.msra.mxu3 %v5528_v43  ;;  %v5687_v43 = vld [vmem:[#allocation10 + $0x4e0] sm:$0xf]  ;;  %v5320_v49 = vor.u32 %v6599_v40, %v5319_v37  ;;  %v6783_v3 = vld [vmem:[#allocation10 + $0x7cc] sm:$0xf0] }
  0xef   :  { %3191 = vmatpush.bf16.msra.mxu0 %v5128_v48  ;;  %v1419_v42 = vpop.f32.mrf.mxu2  ;;  %v6755_v48 = vld [vmem:[#allocation10 + $0x6ec] sm:$0xf0]  ;;  %v5688_v53 = vor.u32 %v6691_v44, %v5687_v43  ;;  %v6056_v19 = vor.u32 %v6783_v3, %v6055_v2  ;;  %v6039_v24 = vld [vmem:[#allocation10 + $0x7a0] sm:$0xf] }
  0xf0   :  { %3204 = vmatpush.bf16.msra.mxu1 %v5256_v15  ;;  %v1432_v8 = vpop.f32.mrf.mxu3  ;;  %v6071_v15 = vld [vmem:[#allocation10 + $0x7e0] sm:$0xf]  ;;  %v5944_v9 = vor.u32 %v6755_v48, %v5943_v47  ;;  %v6683_v17 = vld [vmem:[#allocation10 + $0x4ac] sm:$0xf0] }
  0xf1   :  { %3217 = vmatpush.bf16.msra.mxu2 %v5384_v50  ;;  %v6787_v50 = vld [vmem:[#allocation10 + $0x7ec] sm:$0xf0]  ;;  %v5639_v30 = vld [vmem:[#allocation10 + $0x480] sm:$0xf] }
  0xf2   :  { %3230 = vmatpush.bf16.msra.mxu3 %v5512_v54  ;;  %v5671_v54 = vld [vmem:[#allocation10 + $0x4c0] sm:$0xf]  ;;  %v6747_v23 = vld [vmem:[#allocation10 + $0x6ac] sm:$0xf0] }
  0xf3   :  { %3192 = vmatpush.bf16.msra.mxu0 %v5112_v59  ;;  %v363_v59 = vperm.slane %v7259_v20, 1  ;;  %v5672_v7 = vor.u32 %v6687_v58, %v5671_v54  ;;  %v6779_v26 = vld [vmem:[#allocation10 + $0x7ac] sm:$0xf0]  ;;  %v5895_v37 = vld [vmem:[#allocation10 + $0x680] sm:$0xf] }
  0xf4   :  { %3205 = vmatpush.bf16.msra.mxu1 %v5240_v60  ;;  %v153_v60 = vld [vmem:[#allocation5 + $0x8] sm:$0xff]  ;;  %v6040_v34 = vor.u32 %v6779_v26, %v6039_v24  ;;  %v6711_v36 = vld [vmem:[#allocation10 + $0x58c] sm:$0xf0]  ;;  %v6023_v40 = vld [vmem:[#allocation10 + $0x780] sm:$0xf] }
  0xf5   :  { %3218 = vmatpush.bf16.msra.mxu2 %v5368_v61  ;;  %v6072_v61 = vor.u32 %v6787_v50, %v6071_v15  ;;  %v7280_v11 = vpack.c.bf16 %v153_v60, %v153_v60  ;;  %v6775_v32 = vld [vmem:[#allocation10 + $0x78c] sm:$0xf0]  ;;  %v5623_v45 = vld [vmem:[#allocation10 + $0x460] sm:$0xf] }
  0xf6   :  { %3231 = vmatpush.bf16.msra.mxu3 %v5496_v1  ;;  %v7274_v1 = vpack.c.bf16 %v154_v51, %v154_v51  ;;  %v6675_v8 = vld [vmem:[#allocation10 + $0x46c] sm:$0xf0]  ;;  %v6024_v47 = vor.u32 %v6775_v32, %v6023_v40  ;;  %v6007_v15 = vld [vmem:[#allocation10 + $0x760] sm:$0xf] }
  0xf7   :  { %3193 = vmatpush.bf16.msra.mxu0 %v5096_v12  ;;  %v5800_v12 = vor.u32 %v6719_v62, %v5799_v25  ;;  %v6707_v48 = vld [vmem:[#allocation10 + $0x56c] sm:$0xf0]  ;;  %v5607_v55 = vld [vmem:[#allocation10 + $0x440] sm:$0xf] }
  0xf8   :  { %3206 = vmatpush.bf16.msra.mxu1 %v5224_v14  ;;  %v1418_v14 = vadd.f32 %v7269_v5, %v363_v59  ;;  %v6771_v50 = vld [vmem:[#allocation10 + $0x76c] sm:$0xf0]  ;;  %v5863_v59 = vld [vmem:[#allocation10 + $0x640] sm:$0xf] }
  0xf9   :  { %3219 = vmatpush.bf16.msra.mxu2 %v5352_v16  ;;  %v5655_v16 = vld [vmem:[#allocation10 + $0x4a0] sm:$0xf]  ;;  %v6671_v56 = vld [vmem:[#allocation10 + $0x44c] sm:$0xf0]  ;;  %v6008_v58 = vor.u32 %v6771_v50, %v6007_v15 }
  0xfa   :  { %3232 = vmatpush.bf16.msra.mxu3 %v5480_v21  ;;  %v6715_v21 = vld [vmem:[#allocation10 + $0x5ac] sm:$0xf0]  ;;  %v5656_v27 = vor.u32 %v6683_v17, %v5655_v16  ;;  %v1431_v29 = vadd.f32 %v7271_v10, %v1418_v14  ;;  %v5751_v10 = vld [vmem:[#allocation10 + $0x560] sm:$0xf]  ;;  %v5608_v2 = vor.u32 %v6671_v56, %v5607_v55  ;;  %v5161_v56 = vld [vmem:[#allocation10 + $0xd0] sm:$0xf0] }
  0xfb   :  { %3194 = vmatpush.bf16.msra.mxu0 %v5080_v28  ;;  %v5784_v5 = vor.u32 %v6715_v21, %v5783_v18  ;;  %v5912_v28 = vor.u32 %v6747_v23, %v5911_v22  ;;  %v6703_v25 = vld [vmem:[#allocation10 + $0x54c] sm:$0xf0]  ;;  %v5991_v63 = vld [vmem:[#allocation10 + $0x740] sm:$0xf] }
  0xfc   :  { %3207 = vmatpush.bf16.msra.mxu1 %v5208_v31  ;;  %v6679_v31 = vld [vmem:[#allocation10 + $0x48c] sm:$0xf0]  ;;  %v5591_v3 = vld [vmem:[#allocation10 + $0x420] sm:$0xf] }
  0xfd   :  { %3220 = vmatpush.bf16.msra.mxu2 %v5336_v33  ;;  %v5767_v33 = vld [vmem:[#allocation10 + $0x580] sm:$0xf]  ;;  %v5640_v41 = vor.u32 %v6679_v31, %v5639_v30  ;;  %v6735_v60 = vld [vmem:[#allocation10 + $0x64c] sm:$0xf0] }
  0xfe   :  { %3233 = vmatpush.bf16.msra.mxu3 %v5464_v38  ;;  %v6743_v38 = vld [vmem:[#allocation10 + $0x68c] sm:$0xf0]  ;;  %v5768_v43 = vor.u32 %v6711_v36, %v5767_v33  ;;  %v5864_v14 = vor.u32 %v6735_v60, %v5863_v59  ;;  %v5719_v17 = vld [vmem:[#allocation10 + $0x520] sm:$0xf]  ;;  %v6621_v59 = vld [vmem:[#allocation10 + $0x2c4] sm:$0xf] }
  0xff   :  { %3195 = vmatpush.bf16.msra.mxu0 %v5064_v46  ;;  %v1443_v42 = vpop.f32.mrf.mxu0  ;;  %v5896_v44 = vor.u32 %v6743_v38, %v5895_v37  ;;  %v6767_v0 = vld [vmem:[#allocation10 + $0x74c] sm:$0xf0]  ;;  %v5847_v22 = vld [vmem:[#allocation10 + $0x620] sm:$0xf]  ;;  %v5417_v60 = vld [vmem:[#allocation10 + $0x2d0] sm:$0xf0] }
 0x100   :  { %3208 = vmatpush.bf16.msra.mxu1 %v5192_v39  ;;  %v1444_v46 = vadd.f32 %v1443_v42, %v1431_v29  ;;  %v1456_v35 = vpop.f32.mrf.mxu1  ;;  %v5879_v39 = vld [vmem:[#allocation10 + $0x660] sm:$0xf]  ;;  %v6667_v16 = vld [vmem:[#allocation10 + $0x42c] sm:$0xf0]  ;;  %v5992_v21 = vor.u32 %v6767_v0, %v5991_v63  ;;  %v6561_v42 = vld [vmem:[#allocation10 + $0xe4] sm:$0xf] }
 0x101   :  { %3221 = vmatpush.bf16.msra.mxu2 %v5320_v49  ;;  %v6739_v49 = vld [vmem:[#allocation10 + $0x66c] sm:$0xf0]  ;;  %v5975_v24 = vld [vmem:[#allocation10 + $0x720] sm:$0xf]  ;;  %v5545_v63 = vld [vmem:[#allocation10 + $0x3d0] sm:$0xf0] }
 0x102   :  { %3234 = vmatpush.bf16.msra.mxu3 %v5448_v52  ;;  %3196 = vmatmul.bf16.vlgmr.msra.gmra.mxu0 %v7276_v4  ;;  %v1457_v51 = vadd.f32 %v1456_v35, %v1444_v46  ;;  %v5624_v52 = vor.u32 %v6675_v8, %v5623_v45  ;;  %v5880_v54 = vor.u32 %v6739_v49, %v5879_v39  ;;  %v6699_v18 = vld [vmem:[#allocation10 + $0x52c] sm:$0xf0]  ;;  %v5703_v31 = vld [vmem:[#allocation10 + $0x500] sm:$0xf]  ;;  %v5305_v8 = vld [vmem:[#allocation10 + $0x1f0] sm:$0xf0] }
 0x103   :  { %3240 = vmatpush.bf16.msrb.mxu0 %v5688_v53  ;;  %3209 = vmatmul.bf16.vlgmr.msra.gmra.mxu1 %v7280_v11  ;;  %v5752_v53 = vor.u32 %v6707_v48, %v5751_v10  ;;  %v6731_v23 = vld [vmem:[#allocation10 + $0x62c] sm:$0xf0]  ;;  %v5720_v29 = vor.u32 %v6699_v18, %v5719_v17  ;;  %v5959_v40 = vld [vmem:[#allocation10 + $0x700] sm:$0xf]  ;;  %v6625_v10 = vld [vmem:[#allocation10 + $0x2e4] sm:$0xf] }
 0x104   :  { %3253 = vmatpush.bf16.msrb.mxu1 %v5816_v57  ;;  %3222 = vmatmul.bf16.vlgmr.msra.gmra.mxu2 %v7274_v1  ;;  %v5735_v57 = vld [vmem:[#allocation10 + $0x540] sm:$0xf]  ;;  %v6763_v26 = vld [vmem:[#allocation10 + $0x72c] sm:$0xf0]  ;;  %v5848_v30 = vor.u32 %v6731_v23, %v5847_v22  ;;  %v5433_v46 = vld [vmem:[#allocation10 + $0x2f0] sm:$0xf0] }
 0x105   :  { %3266 = vmatpush.bf16.msrb.mxu2 %v5944_v9  ;;  %3235 = vmatmul.bf16.vlgmr.msra.gmra.mxu3 %v7278_v6  ;;  %v6695_v33 = vld [vmem:[#allocation10 + $0x50c] sm:$0xf0]  ;;  %v5976_v37 = vor.u32 %v6763_v26, %v5975_v24  ;;  %v6657_v48 = vld [vmem:[#allocation10 + $0x3e4] sm:$0xf]  ;;  %v5561_v39 = vld [vmem:[#allocation10 + $0x3f0] sm:$0xf0]  ;;  %v5436_v55 = vor.u32 %v6625_v10, %v5433_v46 }
 0x106   :  { %3279 = vmatpush.bf16.msrb.mxu3 %v6072_v61  ;;  %v6727_v38 = vld [vmem:[#allocation10 + $0x60c] sm:$0xf0]  ;;  %v5704_v35 = vor.u32 %v6695_v33, %v5703_v31  ;;  %v6585_v17 = vld [vmem:[#allocation10 + $0x1a4] sm:$0xf]  ;;  %v5401_v22 = vld [vmem:[#allocation10 + $0x2b0] sm:$0xf0] }
 0x107   :  { %3241 = vmatpush.bf16.msrb.mxu0 %v5672_v7  ;;  %v1469_v9 = vpop.f32.mrf.mxu2  ;;  %v6759_v32 = vld [vmem:[#allocation10 + $0x70c] sm:$0xf0]  ;;  %v6649_v23 = vld [vmem:[#allocation10 + $0x3a4] sm:$0xf]  ;;  %v5529_v24 = vld [vmem:[#allocation10 + $0x3b0] sm:$0xf0] }
 0x108   :  { %3254 = vmatpush.bf16.msrb.mxu1 %v5800_v12  ;;  %v1470_v61 = vadd.f32 %v1469_v9, %v1457_v51  ;;  %v1482_v62 = vpop.f32.mrf.mxu3  ;;  %v1445_v12 = vpop.f32.mrf.mxu0  ;;  %v158_v49 = vld [vmem:[#allocation5 + $0x30] sm:$0xff]  ;;  %v5960_v15 = vor.u32 %v6759_v32, %v5959_v40  ;;  %v6557_v51 = vld [vmem:[#allocation10 + $0xc4] sm:$0xf]  ;;  %v5532_v31 = vor.u32 %v6649_v23, %v5529_v24  ;;  %v5257_v33 = vld [vmem:[#allocation10 + $0x190] sm:$0xf0] }
 0x109   :  { %3267 = vmatpush.bf16.msrb.mxu2 %v5928_v13  ;;  %v5736_v13 = vor.u32 %v6703_v25, %v5735_v57  ;;  %v6589_v57 = vld [vmem:[#allocation10 + $0x1c4] sm:$0xf]  ;;  %v5289_v25 = vld [vmem:[#allocation10 + $0x1d0] sm:$0xf0] }
 0x10a   :  { %3280 = vmatpush.bf16.msrb.mxu3 %v6056_v19  ;;  %v1483_v7 = vadd.f32 %v1482_v62, %v1470_v61  ;;  %v1458_v19 = vpop.f32.mrf.mxu1  ;;  %v157_v9 = vld [vmem:[#allocation5 + $0x28] sm:$0xff]  ;;  %v7288_v61 = vpack.c.bf16 %v158_v49, %v158_v49  ;;  %v5292_v12 = vor.u32 %v6589_v57, %v5289_v25  ;;  %v5241_v46 = vld [vmem:[#allocation10 + $0x170] sm:$0xf0] }
 0x10b   :  { %3242 = vmatpush.bf16.msrb.mxu0 %v5656_v27  ;;  %v5592_v27 = vor.u32 %v6667_v16, %v5591_v3  ;;  %v6653_v62 = vld [vmem:[#allocation10 + $0x3c4] sm:$0xf]  ;;  %v5164_v3 = vor.u32 %v6557_v51, %v5161_v56  ;;  %v5145_v16 = vld [vmem:[#allocation10 + $0xb0] sm:$0xf0] }
 0x10c   :  { %3255 = vmatpush.bf16.msrb.mxu1 %v5784_v5  ;;  %3605 = vst [vmem:[#allocation14 + $0x8] sm:$0xff] %v1483_v7  ;;  %v5575_v5 = vld [vmem:[#allocation10 + $0x400] sm:$0xf]  ;;  %v7294_v7 = vpack.c.bf16 %v157_v9, %v157_v9  ;;  %v5548_v18 = vor.u32 %v6653_v62, %v5545_v63  ;;  %v5273_v19 = vld [vmem:[#allocation10 + $0x1b0] sm:$0xf0] }
 0x10d   :  { %3268 = vmatpush.bf16.msrb.mxu2 %v5912_v28  ;;  %v6663_v28 = vld [vmem:[#allocation10 + $0x40c] sm:$0xf0]  ;;  %v6541_v51 = vld [vmem:[#allocation10 + $0x44] sm:$0xf]  ;;  %v5225_v56 = vld [vmem:[#allocation10 + $0x150] sm:$0xf0] }
 0x10e   :  { %3281 = vmatpush.bf16.msrb.mxu3 %v6040_v34  ;;  %v5831_v34 = vld [vmem:[#allocation10 + $0x600] sm:$0xf]  ;;  %v5576_v45 = vor.u32 %v6663_v28, %v5575_v5  ;;  %v6549_v28 = vld [vmem:[#allocation10 + $0x84] sm:$0xf]  ;;  %v5353_v9 = vld [vmem:[#allocation10 + $0x250] sm:$0xf0] }
 0x10f   :  { %3243 = vmatpush.bf16.msrb.mxu0 %v5640_v41  ;;  %v1471_v36 = vpop.f32.mrf.mxu2  ;;  %v6605_v57 = vld [vmem:[#allocation10 + $0x244] sm:$0xf]  ;;  %v5465_v24 = vld [vmem:[#allocation10 + $0x330] sm:$0xf0] }
 0x110   :  { %3256 = vmatpush.bf16.msrb.mxu1 %v5768_v43  ;;  %v1484_v41 = vpop.f32.mrf.mxu3  ;;  %v5177_v43 = vld [vmem:[#allocation10 + $0xf0] sm:$0xf0]  ;;  %v6637_v25 = vld [vmem:[#allocation10 + $0x344] sm:$0xf] }
 0x111   :  { %3269 = vmatpush.bf16.msrb.mxu2 %v5896_v44  ;;  %v6593_v44 = vld [vmem:[#allocation10 + $0x1e4] sm:$0xf]  ;;  %v5180_v50 = vor.u32 %v6561_v42, %v5177_v43  ;;  %v5385_v36 = vld [vmem:[#allocation10 + $0x290] sm:$0xf0] }
 0x112   :  { %3282 = vmatpush.bf16.msrb.mxu3 %v6024_v47  ;;  %v5832_v47 = vor.u32 %v6727_v38, %v5831_v34  ;;  %v6613_v34 = vld [vmem:[#allocation10 + $0x284] sm:$0xf]  ;;  %v5513_v38 = vld [vmem:[#allocation10 + $0x390] sm:$0xf0] }
 0x113   :  { %3244 = vmatpush.bf16.msrb.mxu0 %v5624_v52  ;;  %v156_v52 = vld [vmem:[#allocation5 + $0x20] sm:$0xff]  ;;  %v5388_v42 = vor.u32 %v6613_v34, %v5385_v36  ;;  %v6545_v43 = vld [vmem:[#allocation10 + $0x64] sm:$0xf] }
 0x114   :  { %3257 = vmatpush.bf16.msrb.mxu1 %v5752_v53  ;;  %v159_v53 = vld [vmem:[#allocation5 + $0x38] sm:$0xff]  ;;  %v7290_v0 = vpack.c.bf16 %v156_v52, %v156_v52  ;;  %v6537_v62 = vld [vmem:[#allocation10 + $0x24] sm:$0xf] }
 0x115   :  { %3270 = vmatpush.bf16.msrb.mxu2 %v5880_v54  ;;  %v5308_v54 = vor.u32 %v6593_v44, %v5305_v8  ;;  %v5113_v44 = vld [vmem:[#allocation10 + $0x70] sm:$0xf0]  ;;  %v6633_v23 = vld [vmem:[#allocation10 + $0x324] sm:$0xf] }
 0x116   :  { %3283 = vmatpush.bf16.msrb.mxu3 %v6008_v58  ;;  %v5564_v58 = vor.u32 %v6657_v48, %v5561_v39  ;;  %v6641_v48 = vld [vmem:[#allocation10 + $0x364] sm:$0xf]  ;;  %v5497_v39 = vld [vmem:[#allocation10 + $0x370] sm:$0xf0]  ;;  %v5116_v49 = vor.u32 %v6545_v43, %v5113_v44  ;;  %v5468_v36 = vor.u32 %v6633_v23, %v5465_v24 }
 0x117   :  { %3245 = vmatpush.bf16.msrb.mxu0 %v5608_v2  ;;  %v7292_v2 = vpack.c.bf16 %v159_v53, %v159_v53  ;;  %v5097_v52 = vld [vmem:[#allocation10 + $0x50] sm:$0xf0]  ;;  %v6573_v53 = vld [vmem:[#allocation10 + $0x144] sm:$0xf] }
 0x118   :  { %3258 = vmatpush.bf16.msrb.mxu1 %v5736_v13  ;;  %v5420_v13 = vor.u32 %v6621_v59, %v5417_v60  ;;  %v5481_v59 = vld [vmem:[#allocation10 + $0x350] sm:$0xf0]  ;;  %v5100_v60 = vor.u32 %v6541_v51, %v5097_v52  ;;  %v6721_v44 = vld [vmem:[#allocation10 + $0x5e4] sm:$0xf] }
 0x119   :  { %3271 = vmatpush.bf16.msrb.mxu2 %v5864_v14  ;;  %v6553_v14 = vld [vmem:[#allocation10 + $0xa4] sm:$0xf]  ;;  %v5689_v43 = vld [vmem:[#allocation10 + $0x4f0] sm:$0xf0] }
 0x11a   :  { %3284 = vmatpush.bf16.msrb.mxu3 %v5992_v21  ;;  %v6617_v21 = vld [vmem:[#allocation10 + $0x2a4] sm:$0xf]  ;;  %v5148_v26 = vor.u32 %v6553_v14, %v5145_v16  ;;  %v5209_v16 = vld [vmem:[#allocation10 + $0x130] sm:$0xf0] }
 0x11b   :  { %3246 = vmatpush.bf16.msrb.mxu0 %v5592_v27  ;;  %v5276_v27 = vor.u32 %v6585_v17, %v5273_v19  ;;  %v5404_v5 = vor.u32 %v6617_v21, %v5401_v22  ;;  %v6569_v14 = vld [vmem:[#allocation10 + $0x124] sm:$0xf]  ;;  %v5337_v21 = vld [vmem:[#allocation10 + $0x230] sm:$0xf0]  ;;  %v364_v22 = vperm.slane %v7259_v20, 2 }
 0x11c   :  { %3259 = vmatpush.bf16.msrb.mxu1 %v5720_v29  ;;  %v5129_v29 = vld [vmem:[#allocation10 + $0x90] sm:$0xf0]  ;;  %v6601_v19 = vld [vmem:[#allocation10 + $0x224] sm:$0xf] }
 0x11d   :  { %3272 = vmatpush.bf16.msrb.mxu2 %v5848_v30  ;;  %v6581_v30 = vld [vmem:[#allocation10 + $0x184] sm:$0xf]  ;;  %v5132_v40 = vor.u32 %v6549_v28, %v5129_v29  ;;  %v5212_v28 = vor.u32 %v6569_v14, %v5209_v16  ;;  %v5340_v29 = vor.u32 %v6601_v19, %v5337_v21  ;;  %v5657_v14 = vld [vmem:[#allocation10 + $0x4b0] sm:$0xf0] }
 0x11e   :  { %3285 = vmatpush.bf16.msrb.mxu3 %v5976_v37  ;;  %v6645_v37 = vld [vmem:[#allocation10 + $0x384] sm:$0xf]  ;;  %v5260_v41 = vor.u32 %v6581_v30, %v5257_v33  ;;  %v5913_v21 = vld [vmem:[#allocation10 + $0x6b0] sm:$0xf0] }
 0x11f   :  { %3247 = vmatpush.bf16.msrb.mxu0 %v5576_v45  ;;  %v7300_v32 = vpop.f32.mrf.mxu0  ;;  %v6577_v45 = vld [vmem:[#allocation10 + $0x164] sm:$0xf]  ;;  %v5516_v10 = vor.u32 %v6645_v37, %v5513_v38  ;;  %v5321_v37 = vld [vmem:[#allocation10 + $0x210] sm:$0xf0] }
 0x120   :  { %3260 = vmatpush.bf16.msrb.mxu1 %v5704_v35  ;;  %v7302_v8 = vpop.f32.mrf.mxu1  ;;  %v6609_v35 = vld [vmem:[#allocation10 + $0x264] sm:$0xf]  ;;  %v1496_v20 = vadd.f32 %v7300_v32, %v364_v22  ;;  %v6041_v23 = vld [vmem:[#allocation10 + $0x7b0] sm:$0xf0] }
 0x121   :  { %3273 = vmatpush.bf16.msrb.mxu2 %v5832_v47  ;;  %v5369_v47 = vld [vmem:[#allocation10 + $0x270] sm:$0xf0]  ;;  %v6565_v30 = vld [vmem:[#allocation10 + $0x104] sm:$0xf] }
 0x122   :  { %3286 = vmatpush.bf16.msrb.mxu3 %v5960_v15  ;;  %3248 = vmatmul.bf16.vlgmr.msrb.gmra.mxu0 %v7290_v0  ;;  %v5244_v15 = vor.u32 %v6577_v45, %v5241_v46  ;;  %v6597_v33 = vld [vmem:[#allocation10 + $0x204] sm:$0xf]  ;;  %v1509_v32 = vadd.f32 %v7302_v8, %v1496_v20 }
 0x123   :  { %3292 = vmatpush.bf16.msra.mxu0 %v5180_v50  ;;  %3261 = vmatmul.bf16.vlgmr.msrb.gmra.mxu1 %v7294_v7  ;;  %v5372_v50 = vor.u32 %v6609_v35, %v5369_v47  ;;  %v6629_v38 = vld [vmem:[#allocation10 + $0x304] sm:$0xf]  ;;  %v5945_v35 = vld [vmem:[#allocation10 + $0x6f0] sm:$0xf0] }
 0x124   :  { %3305 = vmatpush.bf16.msra.mxu1 %v5308_v54  ;;  %3274 = vmatmul.bf16.vlgmr.msrb.gmra.mxu2 %v7288_v61  ;;  %v6753_v46 = vld [vmem:[#allocation10 + $0x6e4] sm:$0xf] }
 0x125   :  { %3318 = vmatpush.bf16.msra.mxu2 %v5436_v55  ;;  %3287 = vmatmul.bf16.vlgmr.msrb.gmra.mxu3 %v7292_v2  ;;  %v5500_v55 = vor.u32 %v6641_v48, %v5497_v39  ;;  %v5324_v48 = vor.u32 %v6597_v33, %v5321_v37  ;;  %v6785_v39 = vld [vmem:[#allocation10 + $0x7e4] sm:$0xf]  ;;  %v5948_v52 = vor.u32 %v6753_v46, %v5945_v35  ;;  %v6025_v37 = vld [vmem:[#allocation10 + $0x790] sm:$0xf0] }
 0x126   :  { %3331 = vmatpush.bf16.msra.mxu3 %v5564_v58  ;;  %v6713_v16 = vld [vmem:[#allocation10 + $0x5a4] sm:$0xf]  ;;  %v5753_v46 = vld [vmem:[#allocation10 + $0x570] sm:$0xf0] }
 0x127   :  { %3293 = vmatpush.bf16.msra.mxu0 %v5164_v3  ;;  %v7304_v54 = vpop.f32.mrf.mxu2  ;;  %v1497_v63 = vpop.f32.mrf.mxu0  ;;  %v5228_v3 = vor.u32 %v6573_v53, %v5225_v56  ;;  %v6685_v53 = vld [vmem:[#allocation10 + $0x4c4] sm:$0xf] }
 0x128   :  { %3306 = vmatpush.bf16.msra.mxu1 %v5292_v12  ;;  %v7306_v58 = vpop.f32.mrf.mxu3  ;;  %v5356_v12 = vor.u32 %v6605_v57, %v5353_v9  ;;  %v1510_v17 = vpop.f32.mrf.mxu1  ;;  %v6717_v56 = vld [vmem:[#allocation10 + $0x5c4] sm:$0xf]  ;;  %v5801_v9 = vld [vmem:[#allocation10 + $0x5d0] sm:$0xf0] }
 0x129   :  { %3319 = vmatpush.bf16.msra.mxu2 %v5420_v13  ;;  %v5081_v13 = vld [vmem:[#allocation10 + $0x30] sm:$0xf0]  ;;  %v5804_v8 = vor.u32 %v6717_v56, %v5801_v9  ;;  %v6745_v19 = vld [vmem:[#allocation10 + $0x6a4] sm:$0xf] }
 0x12a   :  { %3332 = vmatpush.bf16.msra.mxu3 %v5548_v18  ;;  %v5484_v18 = vor.u32 %v6637_v25, %v5481_v59  ;;  %v6749_v25 = vld [vmem:[#allocation10 + $0x6c4] sm:$0xf]  ;;  %v5929_v59 = vld [vmem:[#allocation10 + $0x6d0] sm:$0xf0] }
 0x12b   :  { %3294 = vmatpush.bf16.msra.mxu0 %v5148_v26  ;;  %v5084_v26 = vor.u32 %v6537_v62, %v5081_v13  ;;  %v6057_v62 = vld [vmem:[#allocation10 + $0x7d0] sm:$0xf0]  ;;  %v6681_v13 = vld [vmem:[#allocation10 + $0x4a4] sm:$0xf] }
 0x12c   :  { %3307 = vmatpush.bf16.msra.mxu1 %v5276_v27  ;;  %v6533_v27 = vld [vmem:[#allocation10 + $0x4] sm:$0xf]  ;;  %v5737_v56 = vld [vmem:[#allocation10 + $0x550] sm:$0xf0] }
 0x12d   :  { %3320 = vmatpush.bf16.msra.mxu2 %v5404_v5  ;;  %v5065_v5 = vld [vmem:[#allocation10 + $0x10] sm:$0xf0]  ;;  %v6777_v22 = vld [vmem:[#allocation10 + $0x7a4] sm:$0xf] }
 0x12e   :  { %3333 = vmatpush.bf16.msra.mxu3 %v5532_v31  ;;  %v5193_v31 = vld [vmem:[#allocation10 + $0x110] sm:$0xf0]  ;;  %v5068_v45 = vor.u32 %v6533_v27, %v5065_v5  ;;  %v5916_v27 = vor.u32 %v6745_v19, %v5913_v21  ;;  %v6677_v5 = vld [vmem:[#allocation10 + $0x484] sm:$0xf] }
 0x12f   :  { %3295 = vmatpush.bf16.msra.mxu0 %v5132_v40  ;;  %v1523_v34 = vpop.f32.mrf.mxu2  ;;  %v5449_v40 = vld [vmem:[#allocation10 + $0x310] sm:$0xf0]  ;;  %v5196_v47 = vor.u32 %v6565_v30, %v5193_v31  ;;  %v6044_v30 = vor.u32 %v6777_v22, %v6041_v23  ;;  %v6741_v33 = vld [vmem:[#allocation10 + $0x684] sm:$0xf] }
 0x130   :  { %3308 = vmatpush.bf16.msra.mxu1 %v5260_v41  ;;  %v1536_v41 = vpop.f32.mrf.mxu3  ;;  %v5769_v31 = vld [vmem:[#allocation10 + $0x590] sm:$0xf0]  ;;  %v6737_v35 = vld [vmem:[#allocation10 + $0x664] sm:$0xf] }
 0x131   :  { %3321 = vmatpush.bf16.msra.mxu2 %v5388_v42  ;;  %v6689_v42 = vld [vmem:[#allocation10 + $0x4e4] sm:$0xf]  ;;  %v5897_v34 = vld [vmem:[#allocation10 + $0x690] sm:$0xf0] }
 0x132   :  { %3334 = vmatpush.bf16.msra.mxu3 %v5516_v10  ;;  %v5817_v10 = vld [vmem:[#allocation10 + $0x5f0] sm:$0xf0]  ;;  %v6729_v21 = vld [vmem:[#allocation10 + $0x624] sm:$0xf] }
 0x133   :  { %3296 = vmatpush.bf16.msra.mxu0 %v5116_v49  ;;  %v6073_v49 = vld [vmem:[#allocation10 + $0x7f0] sm:$0xf0]  ;;  %v5820_v51 = vor.u32 %v6721_v44, %v5817_v10  ;;  %v6761_v23 = vld [vmem:[#allocation10 + $0x724] sm:$0xf] }
 0x134   :  { %3309 = vmatpush.bf16.msra.mxu1 %v5244_v15  ;;  %v5452_v15 = vor.u32 %v6629_v38, %v5449_v40  ;;  %v6076_v57 = vor.u32 %v6785_v39, %v6073_v49  ;;  %v5625_v44 = vld [vmem:[#allocation10 + $0x470] sm:$0xf0]  ;;  %v6769_v39 = vld [vmem:[#allocation10 + $0x764] sm:$0xf] }
 0x135   :  { %3322 = vmatpush.bf16.msra.mxu2 %v5372_v50  ;;  %v5692_v50 = vor.u32 %v6689_v42, %v5689_v43  ;;  %v5900_v42 = vor.u32 %v6741_v33, %v5897_v34  ;;  %v6673_v43 = vld [vmem:[#allocation10 + $0x464] sm:$0xf]  ;;  %v6009_v49 = vld [vmem:[#allocation10 + $0x770] sm:$0xf0] }
 0x136   :  { %3335 = vmatpush.bf16.msra.mxu3 %v5500_v55  ;;  %v5673_v55 = vld [vmem:[#allocation10 + $0x4d0] sm:$0xf0] }
 0x137   :  { %3297 = vmatpush.bf16.msra.mxu0 %v5100_v60  ;;  %v6781_v60 = vld [vmem:[#allocation10 + $0x7c4] sm:$0xf]  ;;  %v5676_v63 = vor.u32 %v6685_v53, %v5673_v55  ;;  %v6012_v55 = vor.u32 %v6769_v39, %v6009_v49  ;;  %v5865_v9 = vld [vmem:[#allocation10 + $0x650] sm:$0xf0]  ;;  %v5167_v49 = vld [vmem:[#allocation10 + $0xc8] sm:$0xf] }
 0x138   :  { %3310 = vmatpush.bf16.msra.mxu1 %v5228_v3  ;;  %v1522_v3 = vadd.f32 %v7304_v54, %v1509_v32  ;;  %v6060_v17 = vor.u32 %v6781_v60, %v6057_v62  ;;  %v5660_v54 = vor.u32 %v6681_v13, %v5657_v14  ;;  %v6701_v53 = vld [vmem:[#allocation10 + $0x544] sm:$0xf]  ;;  %v5993_v60 = vld [vmem:[#allocation10 + $0x750] sm:$0xf0] }
 0x139   :  { %3323 = vmatpush.bf16.msra.mxu2 %v5356_v12  ;;  %v5932_v12 = vor.u32 %v6749_v25, %v5929_v59  ;;  %v6765_v59 = vld [vmem:[#allocation10 + $0x744] sm:$0xf]  ;;  %v5721_v19 = vld [vmem:[#allocation10 + $0x530] sm:$0xf0] }
 0x13a   :  { %3336 = vmatpush.bf16.msra.mxu3 %v5484_v18  ;;  %v5785_v18 = vld [vmem:[#allocation10 + $0x5b0] sm:$0xf0]  ;;  %v1535_v24 = vadd.f32 %v7306_v58, %v1522_v3  ;;  %v6665_v14 = vld [vmem:[#allocation10 + $0x424] sm:$0xf] }
 0x13b   :  { %3298 = vmatpush.bf16.msra.mxu0 %v5084_v26  ;;  %v5788_v26 = vor.u32 %v6713_v16, %v5785_v18  ;;  %v5593_v16 = vld [vmem:[#allocation10 + $0x430] sm:$0xf0]  ;;  %v5996_v18 = vor.u32 %v6765_v59, %v5993_v60  ;;  %v5551_v59 = vld [vmem:[#allocation10 + $0x3c8] sm:$0xf]  ;;  %v6656_v60 = vld [vmem:[#allocation10 + $0x3d4] sm:$0xf0] }
 0x13c   :  { %3311 = vmatpush.bf16.msra.mxu1 %v5212_v28  ;;  %v5641_v28 = vld [vmem:[#allocation10 + $0x490] sm:$0xf0] }
 0x13d   :  { %3324 = vmatpush.bf16.msra.mxu2 %v5340_v29  ;;  %v6709_v29 = vld [vmem:[#allocation10 + $0x584] sm:$0xf]  ;;  %v5644_v40 = vor.u32 %v6677_v5, %v5641_v28  ;;  %v5849_v22 = vld [vmem:[#allocation10 + $0x630] sm:$0xf0] }
 0x13e   :  { %3337 = vmatpush.bf16.msra.mxu3 %v5468_v36  ;;  %v6773_v36 = vld [vmem:[#allocation10 + $0x784] sm:$0xf]  ;;  %v5772_v41 = vor.u32 %v6709_v29, %v5769_v31  ;;  %v5852_v28 = vor.u32 %v6729_v21, %v5849_v22  ;;  %v5833_v34 = vld [vmem:[#allocation10 + $0x610] sm:$0xf0]  ;;  %v6620_v21 = vld [vmem:[#allocation10 + $0x2b4] sm:$0xf0] }
 0x13f   :  { %3299 = vmatpush.bf16.msra.mxu0 %v5068_v45  ;;  %v1547_v38 = vpop.f32.mrf.mxu0  ;;  %v6705_v45 = vld [vmem:[#allocation10 + $0x564] sm:$0xf]  ;;  %v6028_v10 = vor.u32 %v6773_v36, %v6025_v37  ;;  %v5961_v37 = vld [vmem:[#allocation10 + $0x710] sm:$0xf0]  ;;  %v5535_v22 = vld [vmem:[#allocation10 + $0x3a8] sm:$0xf] }
 0x140   :  { %3312 = vmatpush.bf16.msra.mxu1 %v5196_v47  ;;  %v1548_v58 = vadd.f32 %v1547_v38, %v1535_v24  ;;  %v1560_v20 = vpop.f32.mrf.mxu1  ;;  %v5881_v47 = vld [vmem:[#allocation10 + $0x670] sm:$0xf0]  ;;  %v5596_v24 = vor.u32 %v6665_v14, %v5593_v16  ;;  %v6693_v29 = vld [vmem:[#allocation10 + $0x504] sm:$0xf]  ;;  %v6556_v14 = vld [vmem:[#allocation10 + $0xb4] sm:$0xf0] }
 0x141   :  { %3325 = vmatpush.bf16.msra.mxu2 %v5324_v48  ;;  %v5884_v32 = vor.u32 %v6737_v35, %v5881_v47  ;;  %v6725_v31 = vld [vmem:[#allocation10 + $0x604] sm:$0xf]  ;;  %v5567_v35 = vld [vmem:[#allocation10 + $0x3e8] sm:$0xf]  ;;  %v6660_v47 = vld [vmem:[#allocation10 + $0x3f4] sm:$0xf0] }
 0x142   :  { %3338 = vmatpush.bf16.msra.mxu3 %v5452_v15  ;;  %3300 = vmatmul.bf16.vlgmr.msra.gmra.mxu0 %v7276_v4  ;;  %v1561_v48 = vadd.f32 %v1560_v20, %v1548_v58  ;;  %v5628_v15 = vor.u32 %v6673_v43, %v5625_v44  ;;  %v6757_v36 = vld [vmem:[#allocation10 + $0x704] sm:$0xf]  ;;  %v6564_v58 = vld [vmem:[#allocation10 + $0xf4] sm:$0xf0]  ;;  %v5311_v20 = vld [vmem:[#allocation10 + $0x1e8] sm:$0xf] }
 0x143   :  { %3344 = vmatpush.bf16.msrb.mxu0 %v5692_v50  ;;  %3313 = vmatmul.bf16.vlgmr.msra.gmra.mxu1 %v7280_v11  ;;  %v5756_v50 = vor.u32 %v6705_v45, %v5753_v46  ;;  %v6596_v43 = vld [vmem:[#allocation10 + $0x1f4] sm:$0xf0]  ;;  %v5439_v44 = vld [vmem:[#allocation10 + $0x2e8] sm:$0xf]  ;;  %v5836_v46 = vor.u32 %v6725_v31, %v5833_v34 }
 0x144   :  { %3357 = vmatpush.bf16.msrb.mxu1 %v5820_v51  ;;  %3326 = vmatmul.bf16.vlgmr.msra.gmra.mxu2 %v7274_v1  ;;  %3606 = vst [vmem:[#allocation14 + $0x10] sm:$0xff] %v1561_v48  ;;  %v6669_v51 = vld [vmem:[#allocation10 + $0x444] sm:$0xf]  ;;  %v6628_v45 = vld [vmem:[#allocation10 + $0x2f4] sm:$0xf0]  ;;  %v5964_v48 = vor.u32 %v6757_v36, %v5961_v37 }
 0x145   :  { %3370 = vmatpush.bf16.msrb.mxu2 %v5948_v52  ;;  %3339 = vmatmul.bf16.vlgmr.msra.gmra.mxu3 %v7278_v6  ;;  %v5609_v52 = vld [vmem:[#allocation10 + $0x450] sm:$0xf0]  ;;  %v5279_v16 = vld [vmem:[#allocation10 + $0x1a8] sm:$0xf]  ;;  %v6648_v36 = vld [vmem:[#allocation10 + $0x394] sm:$0xf0] }
 0x146   :  { %3383 = vmatpush.bf16.msrb.mxu3 %v6076_v57  ;;  %v6733_v57 = vld [vmem:[#allocation10 + $0x644] sm:$0xf]  ;;  %v5612_v3 = vor.u32 %v6669_v51, %v5609_v52  ;;  %v5295_v51 = vld [vmem:[#allocation10 + $0x1c8] sm:$0xf]  ;;  %v6868_v52 = vld [vmem:[#allocation8] sm:$0xf] }
 0x147   :  { %3345 = vmatpush.bf16.msrb.mxu0 %v5676_v63  ;;  %v7317_v25 = vpop.f32.mrf.mxu2  ;;  %v1549_v63 = vpop.f32.mrf.mxu0  ;;  %v5868_v13 = vor.u32 %v6733_v57, %v5865_v9  ;;  %v5423_v57 = vld [vmem:[#allocation10 + $0x2c8] sm:$0xf]  ;;  %v6624_v9 = vld [vmem:[#allocation10 + $0x2d4] sm:$0xf0] }
 0x148   :  { %3358 = vmatpush.bf16.msrb.mxu1 %v5804_v8  ;;  %v7319_v62 = vpop.f32.mrf.mxu3  ;;  %v1562_v8 = vpop.f32.mrf.mxu1  ;;  %v5391_v31 = vld [vmem:[#allocation10 + $0x288] sm:$0xf] }
 0x149   :  { %3371 = vmatpush.bf16.msrb.mxu2 %v5932_v12  ;;  %v5740_v12 = vor.u32 %v6701_v53, %v5737_v56  ;;  %v365_v53 = vperm.slane %v6868_v52, 3  ;;  %v6592_v56 = vld [vmem:[#allocation10 + $0x1d4] sm:$0xf0]  ;;  %v5424_v8 = vor.u32 %v6624_v9, %v5423_v57  ;;  %v5519_v34 = vld [vmem:[#allocation10 + $0x388] sm:$0xf] }
 0x14a   :  { %3384 = vmatpush.bf16.msrb.mxu3 %v6060_v17  ;;  %v6697_v17 = vld [vmem:[#allocation10 + $0x524] sm:$0xf]  ;;  %v6608_v57 = vld [vmem:[#allocation10 + $0x254] sm:$0xf0] }
 0x14b   :  { %3346 = vmatpush.bf16.msrb.mxu0 %v5660_v54  ;;  %v5977_v54 = vld [vmem:[#allocation10 + $0x730] sm:$0xf0]  ;;  %v5724_v5 = vor.u32 %v6697_v17, %v5721_v19  ;;  %v5552_v17 = vor.u32 %v6656_v60, %v5551_v59  ;;  %v5407_v19 = vld [vmem:[#allocation10 + $0x2a8] sm:$0xf] }
 0x14c   :  { %3359 = vmatpush.bf16.msrb.mxu1 %v5788_v26  ;;  %v6661_v26 = vld [vmem:[#allocation10 + $0x404] sm:$0xf]  ;;  %v5980_v33 = vor.u32 %v6761_v23, %v5977_v54  ;;  %v6652_v23 = vld [vmem:[#allocation10 + $0x3b4] sm:$0xf0]  ;;  %v5487_v60 = vld [vmem:[#allocation10 + $0x348] sm:$0xf] }
 0x14d   :  { %3372 = vmatpush.bf16.msrb.mxu2 %v5916_v27  ;;  %v5577_v27 = vld [vmem:[#allocation10 + $0x410] sm:$0xf0] }
 0x14e   :  { %3385 = vmatpush.bf16.msrb.mxu3 %v6044_v30  ;;  %v5705_v30 = vld [vmem:[#allocation10 + $0x510] sm:$0xf0] }
 0x14f   :  { %3347 = vmatpush.bf16.msrb.mxu0 %v5644_v40  ;;  %v1575_v38 = vpop.f32.mrf.mxu2  ;;  %v5183_v40 = vld [vmem:[#allocation10 + $0xe8] sm:$0xf] }
 0x150   :  { %3360 = vmatpush.bf16.msrb.mxu1 %v5772_v41  ;;  %v1588_v41 = vpop.f32.mrf.mxu3  ;;  %v5184_v39 = vor.u32 %v6564_v58, %v5183_v40 }
 0x151   :  { %3373 = vmatpush.bf16.msrb.mxu2 %v5900_v42  ;;  %v5580_v42 = vor.u32 %v6661_v26, %v5577_v27  ;;  %v5135_v27 = vld [vmem:[#allocation10 + $0x88] sm:$0xf]  ;;  %v6548_v41 = vld [vmem:[#allocation10 + $0x74] sm:$0xf0] }
 0x152   :  { %3386 = vmatpush.bf16.msrb.mxu3 %v6028_v10  ;;  %v5708_v10 = vor.u32 %v6693_v29, %v5705_v30  ;;  %v5536_v29 = vor.u32 %v6652_v23, %v5535_v22  ;;  %v6584_v30 = vld [vmem:[#allocation10 + $0x194] sm:$0xf0]  ;;  %v5343_v23 = vld [vmem:[#allocation10 + $0x228] sm:$0xf] }
 0x153   :  { %3348 = vmatpush.bf16.msrb.mxu0 %v5628_v15  ;;  %v5312_v15 = vor.u32 %v6596_v43, %v5311_v20  ;;  %v5119_v20 = vld [vmem:[#allocation10 + $0x68] sm:$0xf] }
 0x154   :  { %3361 = vmatpush.bf16.msrb.mxu1 %v5756_v50  ;;  %v5440_v50 = vor.u32 %v6628_v45, %v5439_v44  ;;  %v5520_v44 = vor.u32 %v6648_v36, %v5519_v34  ;;  %v6580_v45 = vld [vmem:[#allocation10 + $0x174] sm:$0xf0] }
 0x155   :  { %3374 = vmatpush.bf16.msrb.mxu2 %v5884_v32  ;;  %v6560_v32 = vld [vmem:[#allocation10 + $0xd4] sm:$0xf0] }
 0x156   :  { %3387 = vmatpush.bf16.msrb.mxu3 %v6012_v55  ;;  %v5568_v55 = vor.u32 %v6660_v47, %v5567_v35  ;;  %v5168_v63 = vor.u32 %v6560_v32, %v5167_v49  ;;  %v5503_v35 = vld [vmem:[#allocation10 + $0x368] sm:$0xf]  ;;  %v6644_v47 = vld [vmem:[#allocation10 + $0x374] sm:$0xf0] }
 0x157   :  { %3349 = vmatpush.bf16.msrb.mxu0 %v5612_v3  ;;  %v5296_v3 = vor.u32 %v6592_v56, %v5295_v51  ;;  %v6544_v32 = vld [vmem:[#allocation10 + $0x54] sm:$0xf0]  ;;  %v5231_v51 = vld [vmem:[#allocation10 + $0x148] sm:$0xf] }
 0x158   :  { %3362 = vmatpush.bf16.msrb.mxu1 %v5740_v12  ;;  %v1574_v12 = vadd.f32 %v7317_v25, %v365_v53  ;;  %v5504_v53 = vor.u32 %v6644_v47, %v5503_v35  ;;  %v5359_v56 = vld [vmem:[#allocation10 + $0x248] sm:$0xf]  ;;  %v6788_v47 = vld [vmem:[#allocation10 + $0x7f4] sm:$0xf0] }
 0x159   :  { %3375 = vmatpush.bf16.msrb.mxu2 %v5868_v13  ;;  %v5151_v13 = vld [vmem:[#allocation10 + $0xa8] sm:$0xf] }
 0x15a   :  { %3388 = vmatpush.bf16.msrb.mxu3 %v5996_v18  ;;  %v6588_v18 = vld [vmem:[#allocation10 + $0x1b4] sm:$0xf0]  ;;  %v5152_v54 = vor.u32 %v6556_v14, %v5151_v13  ;;  %v1587_v26 = vadd.f32 %v7319_v62, %v1574_v12  ;;  %v5247_v62 = vld [vmem:[#allocation10 + $0x168] sm:$0xf] }
 0x15b   :  { %3350 = vmatpush.bf16.msrb.mxu0 %v5596_v24  ;;  %v5280_v25 = vor.u32 %v6588_v18, %v5279_v16  ;;  %v5408_v24 = vor.u32 %v6620_v21, %v5407_v19  ;;  %v5248_v49 = vor.u32 %v6580_v45, %v5247_v62  ;;  %v5360_v16 = vor.u32 %v6608_v57, %v5359_v56  ;;  %v5215_v18 = vld [vmem:[#allocation10 + $0x128] sm:$0xf]  ;;  %v6572_v19 = vld [vmem:[#allocation10 + $0x134] sm:$0xf0] }
 0x15c   :  { %3363 = vmatpush.bf16.msrb.mxu1 %v5724_v5  ;;  %v6552_v5 = vld [vmem:[#allocation10 + $0x94] sm:$0xf0]  ;;  %v5823_v62 = vld [vmem:[#allocation10 + $0x5e8] sm:$0xf] }
 0x15d   :  { %3376 = vmatpush.bf16.msrb.mxu2 %v5852_v28  ;;  %v5263_v28 = vld [vmem:[#allocation10 + $0x188] sm:$0xf]  ;;  %v5136_v37 = vor.u32 %v6552_v5, %v5135_v27  ;;  %v6536_v5 = vld [vmem:[#allocation10 + $0x14] sm:$0xf0] }
 0x15e   :  { %3389 = vmatpush.bf16.msrb.mxu3 %v5980_v33  ;;  %v6616_v33 = vld [vmem:[#allocation10 + $0x294] sm:$0xf0]  ;;  %v5264_v40 = vor.u32 %v6584_v30, %v5263_v28  ;;  %v5071_v27 = vld [vmem:[#allocation10 + $0x8] sm:$0xf]  ;;  %v5216_v28 = vor.u32 %v6572_v19, %v5215_v18 }
 0x15f   :  { %3351 = vmatpush.bf16.msrb.mxu0 %v5580_v42  ;;  %v1599_v38 = vpop.f32.mrf.mxu0  ;;  %v5392_v58 = vor.u32 %v6616_v33, %v5391_v31  ;;  %v5199_v30 = vld [vmem:[#allocation10 + $0x108] sm:$0xf]  ;;  %v6568_v31 = vld [vmem:[#allocation10 + $0x114] sm:$0xf0] }
 0x160   :  { %3364 = vmatpush.bf16.msrb.mxu1 %v5708_v10  ;;  %v1600_v42 = vadd.f32 %v1599_v38, %v1587_v26  ;;  %v1612_v43 = vpop.f32.mrf.mxu1  ;;  %v5375_v10 = vld [vmem:[#allocation10 + $0x268] sm:$0xf]  ;;  %v6756_v45 = vld [vmem:[#allocation10 + $0x6f4] sm:$0xf0] }
 0x161   :  { %3377 = vmatpush.bf16.msrb.mxu2 %v5836_v46  ;;  %v6612_v46 = vld [vmem:[#allocation10 + $0x274] sm:$0xf0]  ;;  %v5327_v33 = vld [vmem:[#allocation10 + $0x208] sm:$0xf] }
 0x162   :  { %3390 = vmatpush.bf16.msrb.mxu3 %v5964_v48  ;;  %3352 = vmatmul.bf16.vlgmr.msrb.gmra.mxu0 %v7290_v0  ;;  %v1613_v48 = vadd.f32 %v1612_v43, %v1600_v42  ;;  %v5455_v38 = vld [vmem:[#allocation10 + $0x308] sm:$0xf]  ;;  %v5072_v42 = vor.u32 %v6536_v5, %v5071_v27  ;;  %v6724_v43 = vld [vmem:[#allocation10 + $0x5f4] sm:$0xf0] }
 0x163   :  { %3396 = vmatpush.bf16.msra.mxu0 %v5184_v39  ;;  %3365 = vmatmul.bf16.vlgmr.msrb.gmra.mxu1 %v7294_v7  ;;  %v5120_v39 = vor.u32 %v6548_v41, %v5119_v20  ;;  %v5695_v20 = vld [vmem:[#allocation10 + $0x4e8] sm:$0xf]  ;;  %v6692_v41 = vld [vmem:[#allocation10 + $0x4f4] sm:$0xf0] }
 0x164   :  { %3409 = vmatpush.bf16.msra.mxu1 %v5312_v15  ;;  %3378 = vmatmul.bf16.vlgmr.msrb.gmra.mxu2 %v7288_v61  ;;  %v5376_v15 = vor.u32 %v6612_v46, %v5375_v10  ;;  %v5200_v10 = vor.u32 %v6568_v31, %v5199_v30  ;;  %v6079_v35 = vld [vmem:[#allocation10 + $0x7e8] sm:$0xf]  ;;  %v6752_v56 = vld [vmem:[#allocation10 + $0x6d4] sm:$0xf0] }
 0x165   :  { %3422 = vmatpush.bf16.msra.mxu2 %v5440_v50  ;;  %3391 = vmatmul.bf16.vlgmr.msrb.gmra.mxu3 %v7292_v2  ;;  %v5103_v50 = vld [vmem:[#allocation10 + $0x48] sm:$0xf]  ;;  %v6780_v19 = vld [vmem:[#allocation10 + $0x7b4] sm:$0xf0] }
 0x166   :  { %3435 = vmatpush.bf16.msra.mxu3 %v5568_v55  ;;  %v6576_v55 = vld [vmem:[#allocation10 + $0x154] sm:$0xf0]  ;;  %v6063_v57 = vld [vmem:[#allocation10 + $0x7c8] sm:$0xf] }
 0x167   :  { %3397 = vmatpush.bf16.msra.mxu0 %v5168_v63  ;;  %v1625_v52 = vpop.f32.mrf.mxu2  ;;  %v6640_v63 = vld [vmem:[#allocation10 + $0x354] sm:$0xf0]  ;;  %v1601_v13 = vpop.f32.mrf.mxu0  ;;  %v5232_v14 = vor.u32 %v6576_v55, %v5231_v51  ;;  %v5807_v51 = vld [vmem:[#allocation10 + $0x5c8] sm:$0xf] }
 0x168   :  { %3410 = vmatpush.bf16.msra.mxu1 %v5296_v3  ;;  %v1626_v9 = vadd.f32 %v1625_v52, %v1613_v48  ;;  %v1638_v59 = vpop.f32.mrf.mxu3  ;;  %v5104_v3 = vor.u32 %v6544_v32, %v5103_v50  ;;  %v1614_v21 = vpop.f32.mrf.mxu1  ;;  %v5488_v22 = vor.u32 %v6640_v63, %v5487_v60  ;;  %v5679_v50 = vld [vmem:[#allocation10 + $0x4c8] sm:$0xf]  ;;  %v6688_v32 = vld [vmem:[#allocation10 + $0x4d4] sm:$0xf0]  ;;  %v6080_v52 = vor.u32 %v6788_v47, %v6079_v35 }
 0x169   :  { %3423 = vmatpush.bf16.msra.mxu2 %v5424_v8  ;;  %v5087_v8 = vld [vmem:[#allocation10 + $0x28] sm:$0xf]  ;;  %v6712_v27 = vld [vmem:[#allocation10 + $0x594] sm:$0xf0] }
 0x16a   :  { %3436 = vmatpush.bf16.msra.mxu3 %v5552_v17  ;;  %v1639_v12 = vadd.f32 %v1638_v59, %v1626_v9  ;;  %v6540_v17 = vld [vmem:[#allocation10 + $0x34] sm:$0xf0]  ;;  %v5935_v55 = vld [vmem:[#allocation10 + $0x6c8] sm:$0xf]  ;;  %v5680_v59 = vor.u32 %v6688_v32, %v5679_v50 }
 0x16b   :  { %3398 = vmatpush.bf16.msra.mxu0 %v5152_v54  ;;  %v6604_v54 = vld [vmem:[#allocation10 + $0x234] sm:$0xf0]  ;;  %v5088_v26 = vor.u32 %v6540_v17, %v5087_v8  ;;  %v5936_v63 = vor.u32 %v6752_v56, %v5935_v55  ;;  %v6047_v18 = vld [vmem:[#allocation10 + $0x7a8] sm:$0xf]  ;;  %v7342_v56 = vld [vmem:[%s7400_s5] sm:$0xf] }
 0x16c   :  { %3411 = vmatpush.bf16.msra.mxu1 %v5280_v25  ;;  %3607 = vst [vmem:[#allocation14 + $0x18] sm:$0xff] %v1639_v12  ;;  %v5471_v25 = vld [vmem:[#allocation10 + $0x328] sm:$0xf]  ;;  %v6784_v9 = vld [vmem:[#allocation10 + $0x7d4] sm:$0xf0] }
 0x16d   :  { %3424 = vmatpush.bf16.msra.mxu2 %v5408_v24  ;;  %v6636_v24 = vld [vmem:[#allocation10 + $0x334] sm:$0xf0]  ;;  %v5791_v12 = vld [vmem:[#allocation10 + $0x5a8] sm:$0xf]  ;;  %v6064_v13 = vor.u32 %v6784_v9, %v6063_v57  ;;  %4252 = dma.vmem_to_hbm [thread:$0]  %s4248_s6, 512, %s4250_s20, [#allocation4]  }
 0x16e   :  { %3437 = vmatpush.bf16.msra.mxu3 %v5536_v29  ;;  %v5344_v29 = vor.u32 %v6604_v54, %v5343_v23  ;;  %v5472_v36 = vor.u32 %v6636_v24, %v5471_v25  ;;  %v6684_v8 = vld [vmem:[#allocation10 + $0x4b4] sm:$0xf0]  ;;  %v5647_v54 = vld [vmem:[#allocation10 + $0x488] sm:$0xf] }
 0x16f   :  { %3399 = vmatpush.bf16.msra.mxu0 %v5136_v37  ;;  %v1627_v34 = vpop.f32.mrf.mxu2  ;;  %v6600_v37 = vld [vmem:[#allocation10 + $0x214] sm:$0xf0]  ;;  %v5775_v24 = vld [vmem:[#allocation10 + $0x588] sm:$0xf] }
 0x170   :  { %3412 = vmatpush.bf16.msra.mxu1 %v5264_v40  ;;  %v6632_v40 = vld [vmem:[#allocation10 + $0x314] sm:$0xf0]  ;;  %v5328_v46 = vor.u32 %v6600_v37, %v5327_v33  ;;  %v5903_v5 = vld [vmem:[#allocation10 + $0x688] sm:$0xf]  ;;  %v5776_v34 = vor.u32 %v6712_v27, %v5775_v24 }
 0x171   :  { %3425 = vmatpush.bf16.msra.mxu2 %v5392_v58  ;;  %v1640_v58 = vpop.f32.mrf.mxu3  ;;  %v5456_v48 = vor.u32 %v6632_v40, %v5455_v38  ;;  %v6748_v17 = vld [vmem:[#allocation10 + $0x6b4] sm:$0xf0]  ;;  %v5631_v37 = vld [vmem:[#allocation10 + $0x468] sm:$0xf] }
 0x172   :  { %3438 = vmatpush.bf16.msra.mxu3 %v5520_v44  ;;  %v5951_v44 = vld [vmem:[#allocation10 + $0x6e8] sm:$0xf]  ;;  %v6680_v25 = vld [vmem:[#allocation10 + $0x494] sm:$0xf0] }
 0x173   :  { %3400 = vmatpush.bf16.msra.mxu0 %v5120_v39  ;;  %v5696_v39 = vor.u32 %v6692_v41, %v5695_v20  ;;  %v6776_v30 = vld [vmem:[#allocation10 + $0x794] sm:$0xf0]  ;;  %v5648_v31 = vor.u32 %v6680_v25, %v5647_v54  ;;  %v5759_v40 = vld [vmem:[#allocation10 + $0x568] sm:$0xf] }
 0x174   :  { %3413 = vmatpush.bf16.msra.mxu1 %v5248_v49  ;;  %v5824_v49 = vor.u32 %v6724_v43, %v5823_v62  ;;  %v6676_v38 = vld [vmem:[#allocation10 + $0x474] sm:$0xf0]  ;;  %v5887_v62 = vld [vmem:[#allocation10 + $0x668] sm:$0xf] }
 0x175   :  { %3426 = vmatpush.bf16.msra.mxu2 %v5376_v15  ;;  %v5952_v15 = vor.u32 %v6756_v45, %v5951_v44  ;;  %v6708_v41 = vld [vmem:[#allocation10 + $0x574] sm:$0xf0]  ;;  %v6015_v43 = vld [vmem:[#allocation10 + $0x768] sm:$0xf]  ;;  %v5632_v45 = vor.u32 %v6676_v38, %v5631_v37  ;;  %v5185_v37 = vld [vmem:[#allocation10 + $0xf8] sm:$0xf0] }
 0x176   :  { %3439 = vmatpush.bf16.msra.mxu3 %v5504_v53  ;;  %v6720_v53 = vld [vmem:[#allocation10 + $0x5d4] sm:$0xf0]  ;;  %v5615_v35 = vld [vmem:[#allocation10 + $0x448] sm:$0xf]  ;;  %v6594_v38 = vld [vmem:[#allocation10 + $0x1ec] sm:$0xf] }
 0x177   :  { %3401 = vmatpush.bf16.msra.mxu0 %v5104_v3  ;;  %v5808_v60 = vor.u32 %v6720_v53, %v5807_v51  ;;  %v5663_v3 = vld [vmem:[#allocation10 + $0x4a8] sm:$0xf]  ;;  %v6772_v44 = vld [vmem:[#allocation10 + $0x774] sm:$0xf0] }
 0x178   :  { %3414 = vmatpush.bf16.msra.mxu1 %v5232_v14  ;;  %v6716_v14 = vld [vmem:[#allocation10 + $0x5b4] sm:$0xf0]  ;;  %v5664_v21 = vor.u32 %v6684_v8, %v5663_v3  ;;  %v5871_v50 = vld [vmem:[#allocation10 + $0x648] sm:$0xf] }
 0x179   :  { %3427 = vmatpush.bf16.msra.mxu2 %v5360_v16  ;;  %v5919_v16 = vld [vmem:[#allocation10 + $0x6a8] sm:$0xf]  ;;  %v6672_v47 = vld [vmem:[#allocation10 + $0x454] sm:$0xf0] }
 0x17a   :  { %3440 = vmatpush.bf16.msra.mxu3 %v5488_v22  ;;  %v5792_v22 = vor.u32 %v6716_v14, %v5791_v12  ;;  %v5920_v23 = vor.u32 %v6748_v17, %v5919_v16  ;;  %v6736_v32 = vld [vmem:[#allocation10 + $0x654] sm:$0xf0]  ;;  %v5616_v55 = vor.u32 %v6672_v47, %v5615_v35  ;;  %v5727_v3 = vld [vmem:[#allocation10 + $0x528] sm:$0xf] }
 0x17b   :  { %3402 = vmatpush.bf16.msra.mxu0 %v5088_v26  ;;  %v6048_v26 = vor.u32 %v6780_v19, %v6047_v18  ;;  %v6768_v53 = vld [vmem:[#allocation10 + $0x754] sm:$0xf0]  ;;  %v5855_v14 = vld [vmem:[#allocation10 + $0x628] sm:$0xf]  ;;  %v1900_v19 = vperm.slane %v7342_v56, 0 }
 0x17c   :  { %3415 = vmatpush.bf16.msra.mxu1 %v5216_v28  ;;  %v6744_v28 = vld [vmem:[#allocation10 + $0x694] sm:$0xf0]  ;;  %v5983_v17 = vld [vmem:[#allocation10 + $0x728] sm:$0xf] }
 0x17d   :  { %3428 = vmatpush.bf16.msra.mxu2 %v5344_v29  ;;  %v6031_v29 = vld [vmem:[#allocation10 + $0x788] sm:$0xf]  ;;  %v6732_v16 = vld [vmem:[#allocation10 + $0x634] sm:$0xf0] }
 0x17e   :  { %3441 = vmatpush.bf16.msra.mxu3 %v5472_v36  ;;  %v5904_v36 = vor.u32 %v6744_v28, %v5903_v5  ;;  %v6032_v20 = vor.u32 %v6776_v30, %v6031_v29  ;;  %v6764_v18 = vld [vmem:[#allocation10 + $0x734] sm:$0xf0]  ;;  %v5856_v25 = vor.u32 %v6732_v16, %v5855_v14  ;;  %v5711_v24 = vld [vmem:[#allocation10 + $0x508] sm:$0xf]  ;;  %v5281_v14 = vld [vmem:[#allocation10 + $0x1b8] sm:$0xf0] }
 0x17f   :  { %3403 = vmatpush.bf16.msra.mxu0 %v5072_v42  ;;  %v7331_v33 = vpop.f32.mrf.mxu0  ;;  %v6740_v42 = vld [vmem:[#allocation10 + $0x674] sm:$0xf0]  ;;  %v5839_v27 = vld [vmem:[#allocation10 + $0x608] sm:$0xf]  ;;  %v5984_v28 = vor.u32 %v6764_v18, %v5983_v17  ;;  %v6618_v16 = vld [vmem:[#allocation10 + $0x2ac] sm:$0xf] }
 0x180   :  { %3416 = vmatpush.bf16.msra.mxu1 %v5200_v10  ;;  %v7333_v58 = vpop.f32.mrf.mxu1  ;;  %v5760_v10 = vor.u32 %v6708_v41, %v5759_v40  ;;  %v6728_v29 = vld [vmem:[#allocation10 + $0x614] sm:$0xf0]  ;;  %v5967_v30 = vld [vmem:[#allocation10 + $0x708] sm:$0xf]  ;;  %v3198_v40 = vadd.f32 %v7331_v33, %v1900_v19  ;;  %v5313_v41 = vld [vmem:[#allocation10 + $0x1f8] sm:$0xf0] }
 0x181   :  { %3429 = vmatpush.bf16.msra.mxu2 %v5328_v46  ;;  %v5888_v46 = vor.u32 %v6740_v42, %v5887_v62  ;;  %v6626_v62 = vld [vmem:[#allocation10 + $0x2ec] sm:$0xf]  ;;  %v5441_v42 = vld [vmem:[#allocation10 + $0x2f8] sm:$0xf0]  ;;  %v5316_v47 = vor.u32 %v6594_v38, %v5313_v41 }
 0x182   :  { %3442 = vmatpush.bf16.msra.mxu3 %v5456_v48  ;;  %3404 = vmatmul.bf16.vlgmr.msra.gmra.mxu0 %v7276_v4  ;;  %v5743_v48 = vld [vmem:[#allocation10 + $0x548] sm:$0xf]  ;;  %v3211_v33 = vadd.f32 %v7333_v58, %v3198_v40  ;;  %v5153_v58 = vld [vmem:[#allocation10 + $0xb8] sm:$0xf0]  ;;  %v6650_v18 = vld [vmem:[#allocation10 + $0x3ac] sm:$0xf] }
 0x183   :  { %3448 = vmatpush.bf16.msrb.mxu0 %v5696_v39  ;;  %3417 = vmatmul.bf16.vlgmr.msra.gmra.mxu1 %v7280_v11  ;;  %v5409_v17 = vld [vmem:[#allocation10 + $0x2b8] sm:$0xf0]  ;;  %v6546_v38 = vld [vmem:[#allocation10 + $0x6c] sm:$0xf] }
 0x184   :  { %3461 = vmatpush.bf16.msrb.mxu1 %v5824_v49  ;;  %3430 = vmatmul.bf16.vlgmr.msra.gmra.mxu2 %v7274_v1  ;;  %v6016_v49 = vor.u32 %v6772_v44, %v6015_v43  ;;  %v5840_v44 = vor.u32 %v6728_v29, %v5839_v27  ;;  %v5537_v19 = vld [vmem:[#allocation10 + $0x3b8] sm:$0xf0]  ;;  %v6646_v29 = vld [vmem:[#allocation10 + $0x38c] sm:$0xf] }
 0x185   :  { %3474 = vmatpush.bf16.msrb.mxu2 %v5952_v15  ;;  %3443 = vmatmul.bf16.vlgmr.msra.gmra.mxu3 %v7278_v6  ;;  %v6704_v15 = vld [vmem:[#allocation10 + $0x554] sm:$0xf0]  ;;  %v5265_v27 = vld [vmem:[#allocation10 + $0x198] sm:$0xf0] }
 0x186   :  { %3487 = vmatpush.bf16.msrb.mxu3 %v6080_v52  ;;  %v5999_v52 = vld [vmem:[#allocation10 + $0x748] sm:$0xf]  ;;  %v5744_v9 = vor.u32 %v6704_v15, %v5743_v48  ;;  %v5444_v48 = vor.u32 %v6626_v62, %v5441_v42  ;;  %v5169_v15 = vld [vmem:[#allocation10 + $0xd8] sm:$0xf0] }
 0x187   :  { %3449 = vmatpush.bf16.msrb.mxu0 %v5680_v59  ;;  %v7335_v39 = vpop.f32.mrf.mxu2  ;;  %v3199_v57 = vpop.f32.mrf.mxu0  ;;  %v5872_v59 = vor.u32 %v6736_v32, %v5871_v50  ;;  %v6000_v12 = vor.u32 %v6768_v53, %v5999_v52  ;;  %v6590_v50 = vld [vmem:[#allocation10 + $0x1cc] sm:$0xf]  ;;  %v5297_v52 = vld [vmem:[#allocation10 + $0x1d8] sm:$0xf0] }
 0x188   :  { %3462 = vmatpush.bf16.msrb.mxu1 %v5808_v60  ;;  %v7337_v51 = vpop.f32.mrf.mxu3  ;;  %v5599_v60 = vld [vmem:[#allocation10 + $0x428] sm:$0xf]  ;;  %v3212_v8 = vpop.f32.mrf.mxu1  ;;  %v6622_v53 = vld [vmem:[#allocation10 + $0x2cc] sm:$0xf]  ;;  %v5121_v40 = vld [vmem:[#allocation10 + $0x78] sm:$0xf0] }
 0x189   :  { %3475 = vmatpush.bf16.msrb.mxu2 %v5936_v63  ;;  %v6668_v63 = vld [vmem:[#allocation10 + $0x434] sm:$0xf0]  ;;  %v6654_v57 = vld [vmem:[#allocation10 + $0x3cc] sm:$0xf]  ;;  %v5249_v42 = vld [vmem:[#allocation10 + $0x178] sm:$0xf0] }
 0x18a   :  { %3488 = vmatpush.bf16.msrb.mxu3 %v6064_v13  ;;  %v6700_v13 = vld [vmem:[#allocation10 + $0x534] sm:$0xf0]  ;;  %v6554_v8 = vld [vmem:[#allocation10 + $0xac] sm:$0xf] }
 0x18b   :  { %3450 = vmatpush.bf16.msrb.mxu0 %v5664_v21  ;;  %v5600_v21 = vor.u32 %v6668_v63, %v5599_v60  ;;  %v5728_v54 = vor.u32 %v6700_v13, %v5727_v3  ;;  %v5300_v60 = vor.u32 %v6590_v50, %v5297_v52  ;;  %v3224_v3 = vadd.f32 %v7335_v39, %v3211_v33  ;;  %v6574_v50 = vld [vmem:[#allocation10 + $0x14c] sm:$0xf]  ;;  %v5233_v52 = vld [vmem:[#allocation10 + $0x158] sm:$0xf0] }
 0x18c   :  { %3463 = vmatpush.bf16.msrb.mxu1 %v5792_v22  ;;  %v5583_v22 = vld [vmem:[#allocation10 + $0x408] sm:$0xf]  ;;  %v5156_v39 = vor.u32 %v6554_v8, %v5153_v58 }
 0x18d   :  { %3476 = vmatpush.bf16.msrb.mxu2 %v5920_v23  ;;  %v6664_v23 = vld [vmem:[#allocation10 + $0x414] sm:$0xf0] }
 0x18e   :  { %3489 = vmatpush.bf16.msrb.mxu3 %v6048_v26  ;;  %v6696_v26 = vld [vmem:[#allocation10 + $0x514] sm:$0xf0] }
 0x18f   :  { %3451 = vmatpush.bf16.msrb.mxu0 %v5648_v31  ;;  %v3225_v5 = vpop.f32.mrf.mxu2  ;;  %v6760_v31 = vld [vmem:[#allocation10 + $0x714] sm:$0xf0]  ;;  %v5712_v43 = vor.u32 %v6696_v26, %v5711_v24  ;;  %v6582_v24 = vld [vmem:[#allocation10 + $0x18c] sm:$0xf]  ;;  %v5540_v26 = vor.u32 %v6650_v18, %v5537_v19 }
 0x190   :  { %3464 = vmatpush.bf16.msrb.mxu1 %v5776_v34  ;;  %v3238_v34 = vpop.f32.mrf.mxu3  ;;  %v6614_v5 = vld [vmem:[#allocation10 + $0x28c] sm:$0xf] }
 0x191   :  { %3477 = vmatpush.bf16.msrb.mxu2 %v5904_v36  ;;  %v6562_v36 = vld [vmem:[#allocation10 + $0xec] sm:$0xf] }
 0x192   :  { %3490 = vmatpush.bf16.msrb.mxu3 %v6032_v20  ;;  %v5584_v20 = vor.u32 %v6664_v23, %v5583_v22  ;;  %v5188_v35 = vor.u32 %v6562_v36, %v5185_v37  ;;  %v5412_v22 = vor.u32 %v6618_v16, %v5409_v17  ;;  %v3237_v23 = vadd.f32 %v7337_v51, %v3224_v3  ;;  %v6578_v51 = vld [vmem:[#allocation10 + $0x16c] sm:$0xf]  ;;  %v5217_v17 = vld [vmem:[#allocation10 + $0x138] sm:$0xf0] }
 0x193   :  { %3452 = vmatpush.bf16.msrb.mxu0 %v5632_v45  ;;  %v6658_v45 = vld [vmem:[#allocation10 + $0x3ec] sm:$0xf]  ;;  %v5268_v36 = vor.u32 %v6582_v24, %v5265_v27  ;;  %v5073_v24 = vld [vmem:[#allocation10 + $0x18] sm:$0xf0] }
 0x194   :  { %3465 = vmatpush.bf16.msrb.mxu1 %v5760_v10  ;;  %v5569_v10 = vld [vmem:[#allocation10 + $0x3f8] sm:$0xf0]  ;;  %v6538_v3 = vld [vmem:[#allocation10 + $0x2c] sm:$0xf] }
 0x195   :  { %3478 = vmatpush.bf16.msrb.mxu2 %v5888_v46  ;;  %v5968_v46 = vor.u32 %v6760_v31, %v5967_v30  ;;  %v5572_v32 = vor.u32 %v6658_v45, %v5569_v10  ;;  %v5521_v30 = vld [vmem:[#allocation10 + $0x398] sm:$0xf0]  ;;  %v6642_v45 = vld [vmem:[#allocation10 + $0x36c] sm:$0xf] }
 0x196   :  { %3491 = vmatpush.bf16.msrb.mxu3 %v6016_v49  ;;  %v6558_v49 = vld [vmem:[#allocation10 + $0xcc] sm:$0xf]  ;;  %v5524_v62 = vor.u32 %v6646_v29, %v5521_v30  ;;  %v5505_v10 = vld [vmem:[#allocation10 + $0x378] sm:$0xf0] }
 0x197   :  { %3453 = vmatpush.bf16.msrb.mxu0 %v5616_v55  ;;  %v5425_v55 = vld [vmem:[#allocation10 + $0x2d8] sm:$0xf0]  ;;  %v6570_v16 = vld [vmem:[#allocation10 + $0x12c] sm:$0xf] }
 0x198   :  { %3466 = vmatpush.bf16.msrb.mxu1 %v5744_v9  ;;  %v5553_v9 = vld [vmem:[#allocation10 + $0x3d8] sm:$0xf0]  ;;  %v5428_v63 = vor.u32 %v6622_v53, %v5425_v55  ;;  %v6606_v53 = vld [vmem:[#allocation10 + $0x24c] sm:$0xf] }
 0x199   :  { %3479 = vmatpush.bf16.msrb.mxu2 %v5872_v59  ;;  %v5172_v59 = vor.u32 %v6558_v49, %v5169_v15  ;;  %v5556_v13 = vor.u32 %v6654_v57, %v5553_v9  ;;  %v6542_v49 = vld [vmem:[#allocation10 + $0x4c] sm:$0xf]  ;;  %v5105_v15 = vld [vmem:[#allocation10 + $0x58] sm:$0xf0] }
 0x19a   :  { %3492 = vmatpush.bf16.msrb.mxu3 %v6000_v12  ;;  %v6586_v12 = vld [vmem:[#allocation10 + $0x1ac] sm:$0xf]  ;;  %v5361_v55 = vld [vmem:[#allocation10 + $0x258] sm:$0xf0] }
 0x19b   :  { %3454 = vmatpush.bf16.msrb.mxu0 %v5600_v21  ;;  %v5284_v21 = vor.u32 %v6586_v12, %v5281_v14  ;;  %v5236_v12 = vor.u32 %v6574_v50, %v5233_v52  ;;  %v5089_v14 = vld [vmem:[#allocation10 + $0x38] sm:$0xf0]  ;;  %v6598_v29 = vld [vmem:[#allocation10 + $0x20c] sm:$0xf] }
 0x19c   :  { %3467 = vmatpush.bf16.msrb.mxu1 %v5728_v54  ;;  %v6550_v54 = vld [vmem:[#allocation10 + $0x8c] sm:$0xf]  ;;  %v5681_v50 = vld [vmem:[#allocation10 + $0x4d8] sm:$0xf0] }
 0x19d   :  { %3480 = vmatpush.bf16.msrb.mxu2 %v5856_v25  ;;  %v5137_v25 = vld [vmem:[#allocation10 + $0x98] sm:$0xf0] }
 0x19e   :  { %3493 = vmatpush.bf16.msrb.mxu3 %v5984_v28  ;;  %v5393_v28 = vld [vmem:[#allocation10 + $0x298] sm:$0xf0]  ;;  %v5140_v31 = vor.u32 %v6550_v54, %v5137_v25  ;;  %v5092_v54 = vor.u32 %v6538_v3, %v5089_v14  ;;  %v6534_v25 = vld [vmem:[#allocation10 + $0xc] sm:$0xf] }
 0x19f   :  { %3455 = vmatpush.bf16.msrb.mxu0 %v5584_v20  ;;  %v3249_v34 = vpop.f32.mrf.mxu0  ;;  %v5396_v37 = vor.u32 %v6614_v5, %v5393_v28  ;;  %v6566_v5 = vld [vmem:[#allocation10 + $0x10c] sm:$0xf]  ;;  %v5201_v28 = vld [vmem:[#allocation10 + $0x118] sm:$0xf0] }
 0x1a0   :  { %3468 = vmatpush.bf16.msrb.mxu1 %v5712_v43  ;;  %v3250_v20 = vadd.f32 %v3249_v34, %v3237_v23  ;;  %v3262_v41 = vpop.f32.mrf.mxu1  ;;  %v6610_v43 = vld [vmem:[#allocation10 + $0x26c] sm:$0xf]  ;;  %v5473_v23 = vld [vmem:[#allocation10 + $0x338] sm:$0xf0] }
 0x1a1   :  { %3481 = vmatpush.bf16.msrb.mxu2 %v5840_v44  ;;  %v5377_v44 = vld [vmem:[#allocation10 + $0x278] sm:$0xf0]  ;;  %v6682_v3 = vld [vmem:[#allocation10 + $0x4ac] sm:$0xf] }
 0x1a2   :  { %3494 = vmatpush.bf16.msrb.mxu3 %v5968_v46  ;;  %3456 = vmatmul.bf16.vlgmr.msrb.gmra.mxu0 %v7290_v0  ;;  %v3263_v46 = vadd.f32 %v3262_v41, %v3250_v20  ;;  %v5329_v34 = vld [vmem:[#allocation10 + $0x218] sm:$0xf0]  ;;  %v6722_v20 = vld [vmem:[#allocation10 + $0x5ec] sm:$0xf]  ;;  %v5076_v41 = vor.u32 %v6534_v25, %v5073_v24 }
 0x1a3   :  { %3500 = vmatpush.bf16.msra.mxu0 %v5188_v35  ;;  %3469 = vmatmul.bf16.vlgmr.msrb.gmra.mxu1 %v7294_v7  ;;  %v5124_v35 = vor.u32 %v6546_v38, %v5121_v40  ;;  %v6690_v40 = vld [vmem:[#allocation10 + $0x4ec] sm:$0xf]  ;;  %v5809_v52 = vld [vmem:[#allocation10 + $0x5d8] sm:$0xf0] }
 0x1a4   :  { %3513 = vmatpush.bf16.msra.mxu1 %v5316_v47  ;;  %3482 = vmatmul.bf16.vlgmr.msrb.gmra.mxu2 %v7288_v61  ;;  %v5252_v47 = vor.u32 %v6578_v51, %v5249_v42  ;;  %v5697_v51 = vld [vmem:[#allocation10 + $0x4f8] sm:$0xf0]  ;;  %v6754_v42 = vld [vmem:[#allocation10 + $0x6ec] sm:$0xf] }
 0x1a5   :  { %3526 = vmatpush.bf16.msra.mxu2 %v5444_v48  ;;  %3495 = vmatmul.bf16.vlgmr.msrb.gmra.mxu3 %v7292_v2  ;;  %v5380_v48 = vor.u32 %v6610_v43, %v5377_v44  ;;  %v5953_v43 = vld [vmem:[#allocation10 + $0x6f8] sm:$0xf0]  ;;  %v5204_v44 = vor.u32 %v6566_v5, %v5201_v28  ;;  %v6774_v5 = vld [vmem:[#allocation10 + $0x78c] sm:$0xf] }
 0x1a6   :  { %3539 = vmatpush.bf16.msra.mxu3 %v5572_v32  ;;  %v5508_v32 = vor.u32 %v6642_v45, %v5505_v10  ;;  %v5332_v45 = vor.u32 %v6598_v29, %v5329_v34  ;;  %v6786_v10 = vld [vmem:[#allocation10 + $0x7ec] sm:$0xf]  ;;  %v5793_v14 = vld [vmem:[#allocation10 + $0x5b8] sm:$0xf0] }
 0x1a7   :  { %3501 = vmatpush.bf16.msra.mxu0 %v5172_v59  ;;  %v3275_v33 = vpop.f32.mrf.mxu2  ;;  %v6638_v59 = vld [vmem:[#allocation10 + $0x34c] sm:$0xf]  ;;  %v3251_v58 = vpop.f32.mrf.mxu0  ;;  %v5777_v24 = vld [vmem:[#allocation10 + $0x598] sm:$0xf0] }
 0x1a8   :  { %3514 = vmatpush.bf16.msra.mxu1 %v5300_v60  ;;  %v3276_v57 = vadd.f32 %v3275_v33, %v3263_v46  ;;  %v3288_v9 = vpop.f32.mrf.mxu3  ;;  %v5489_v60 = vld [vmem:[#allocation10 + $0x358] sm:$0xf0]  ;;  %v3264_v18 = vpop.f32.mrf.mxu1  ;;  %v6718_v33 = vld [vmem:[#allocation10 + $0x5cc] sm:$0xf] }
 0x1a9   :  { %3527 = vmatpush.bf16.msra.mxu2 %v5428_v63  ;;  %v5108_v63 = vor.u32 %v6542_v49, %v5105_v15  ;;  %v5492_v19 = vor.u32 %v6638_v59, %v5489_v60  ;;  %v6081_v46 = vld [vmem:[#allocation10 + $0x7f8] sm:$0xf0]  ;;  %v5956_v49 = vor.u32 %v6754_v42, %v5953_v43  ;;  %v6686_v15 = vld [vmem:[#allocation10 + $0x4cc] sm:$0xf]  ;;  %v5812_v60 = vor.u32 %v6718_v33, %v5809_v52 }
 0x1aa   :  { %3540 = vmatpush.bf16.msra.mxu3 %v5556_v13  ;;  %v7353_v8 = vadd.f32 %v3288_v9, %v3276_v57  ;;  %v5364_v13 = vor.u32 %v6606_v53, %v5361_v55  ;;  %v6750_v53 = vld [vmem:[#allocation10 + $0x6cc] sm:$0xf]  ;;  %v5937_v55 = vld [vmem:[#allocation10 + $0x6d8] sm:$0xf0]  ;;  %v5684_v59 = vor.u32 %v6686_v15, %v5681_v50 }
 0x1ab   :  { %3502 = vmatpush.bf16.msra.mxu0 %v5156_v39  ;;  %v6602_v39 = vld [vmem:[#allocation10 + $0x22c] sm:$0xf]  ;;  %v6065_v9 = vld [vmem:[#allocation10 + $0x7d8] sm:$0xf0] }
 0x1ac   :  { %3515 = vmatpush.bf16.msra.mxu1 %v5284_v21  ;;  %v5345_v21 = vld [vmem:[#allocation10 + $0x238] sm:$0xf0]  ;;  %3608 = vst [vmem:[#allocation15] sm:$0xff] %v7353_v8  ;;  %v6782_v57 = vld [vmem:[#allocation10 + $0x7cc] sm:$0xf] }
 0x1ad   :  { %3528 = vmatpush.bf16.msra.mxu2 %v5412_v22  ;;  %v6634_v22 = vld [vmem:[#allocation10 + $0x32c] sm:$0xf]  ;;  %v5348_v27 = vor.u32 %v6602_v39, %v5345_v21  ;;  %v5665_v58 = vld [vmem:[#allocation10 + $0x4b8] sm:$0xf0] }
 0x1ae   :  { %3541 = vmatpush.bf16.msra.mxu3 %v5540_v26  ;;  %v5220_v26 = vor.u32 %v6570_v16, %v5217_v17  ;;  %v6746_v16 = vld [vmem:[#allocation10 + $0x6ac] sm:$0xf]  ;;  %v5921_v17 = vld [vmem:[#allocation10 + $0x6b8] sm:$0xf0]  ;;  %v5668_v39 = vor.u32 %v6682_v3, %v5665_v58 }
 0x1af   :  { %3503 = vmatpush.bf16.msra.mxu0 %v5140_v31  ;;  %v3277_v30 = vpop.f32.mrf.mxu2  ;;  %v5476_v31 = vor.u32 %v6634_v22, %v5473_v23  ;;  %v6778_v18 = vld [vmem:[#allocation10 + $0x7ac] sm:$0xf]  ;;  %v5924_v22 = vor.u32 %v6746_v16, %v5921_v17  ;;  %v6001_v33 = vld [vmem:[#allocation10 + $0x758] sm:$0xf0]  ;;  %v1901_v16 = vperm.slane %v7342_v56, 1 }
 0x1b0   :  { %3516 = vmatpush.bf16.msra.mxu1 %v5268_v36  ;;  %v6630_v36 = vld [vmem:[#allocation10 + $0x30c] sm:$0xf]  ;;  %v3290_v38 = vpop.f32.mrf.mxu3  ;;  %v5729_v3 = vld [vmem:[#allocation10 + $0x538] sm:$0xf0] }
 0x1b1   :  { %3529 = vmatpush.bf16.msra.mxu2 %v5396_v37  ;;  %v5457_v37 = vld [vmem:[#allocation10 + $0x318] sm:$0xf0]  ;;  %v6678_v23 = vld [vmem:[#allocation10 + $0x48c] sm:$0xf] }
 0x1b2   :  { %3542 = vmatpush.bf16.msra.mxu3 %v5524_v62  ;;  %v5825_v62 = vld [vmem:[#allocation10 + $0x5f8] sm:$0xf0]  ;;  %v6674_v30 = vld [vmem:[#allocation10 + $0x46c] sm:$0xf] }
 0x1b3   :  { %3504 = vmatpush.bf16.msra.mxu0 %v5124_v35  ;;  %v5460_v35 = vor.u32 %v6630_v36, %v5457_v37  ;;  %v6706_v34 = vld [vmem:[#allocation10 + $0x56c] sm:$0xf]  ;;  %v5761_v38 = vld [vmem:[#allocation10 + $0x578] sm:$0xf0] }
 0x1b4   :  { %3517 = vmatpush.bf16.msra.mxu1 %v5252_v47  ;;  %v5700_v47 = vor.u32 %v6690_v40, %v5697_v51  ;;  %v6738_v40 = vld [vmem:[#allocation10 + $0x66c] sm:$0xf]  ;;  %v5889_v51 = vld [vmem:[#allocation10 + $0x678] sm:$0xf0]  ;;  %v5764_v42 = vor.u32 %v6706_v34, %v5761_v38  ;;  %v6827_v38 = vld [vmem:[#allocation13 + $0x30] sm:$0xff] }
 0x1b5   :  { %3530 = vmatpush.bf16.msra.mxu2 %v5380_v48  ;;  %v5828_v48 = vor.u32 %v6722_v20, %v5825_v62  ;;  %v6770_v20 = vld [vmem:[#allocation10 + $0x76c] sm:$0xf]  ;;  %v5892_v43 = vor.u32 %v6738_v40, %v5889_v51  ;;  %v6836_v34 = vld [vmem:[#allocation13 + $0x78] sm:$0xff] }
 0x1b6   :  { %3543 = vmatpush.bf16.msra.mxu3 %v5508_v32  ;;  %v6084_v32 = vor.u32 %v6786_v10, %v6081_v46  ;;  %v6702_v10 = vld [vmem:[#allocation10 + $0x54c] sm:$0xf] }
 0x1b7   :  { %3505 = vmatpush.bf16.msra.mxu0 %v5108_v63  ;;  %v5940_v63 = vor.u32 %v6750_v53, %v5937_v55  ;;  %v6766_v50 = vld [vmem:[#allocation10 + $0x74c] sm:$0xf] }
 0x1b8   :  { %3518 = vmatpush.bf16.msra.mxu1 %v5236_v12  ;;  %v6714_v12 = vld [vmem:[#allocation10 + $0x5ac] sm:$0xf] }
 0x1b9   :  { %3531 = vmatpush.bf16.msra.mxu2 %v5364_v13  ;;  %v6068_v13 = vor.u32 %v6782_v57, %v6065_v9  ;;  %v5796_v21 = vor.u32 %v6714_v12, %v5793_v14  ;;  %v6666_v57 = vld [vmem:[#allocation10 + $0x42c] sm:$0xf]  ;;  %v5601_v9 = vld [vmem:[#allocation10 + $0x438] sm:$0xf0] }
 0x1ba   :  { %3544 = vmatpush.bf16.msra.mxu3 %v5492_v19  ;;  %v6049_v19 = vld [vmem:[#allocation10 + $0x7b8] sm:$0xf0]  ;;  %v6730_v58 = vld [vmem:[#allocation10 + $0x62c] sm:$0xf]  ;;  %v5604_v17 = vor.u32 %v6666_v57, %v5601_v9 }
 0x1bb   :  { %3506 = vmatpush.bf16.msra.mxu0 %v5092_v54  ;;  %v5649_v54 = vld [vmem:[#allocation10 + $0x498] sm:$0xf0]  ;;  %v6052_v25 = vor.u32 %v6778_v18, %v6049_v19  ;;  %v6834_v51 = vld [vmem:[#allocation13 + $0x68] sm:$0xff] }
 0x1bc   :  { %3519 = vmatpush.bf16.msra.mxu1 %v5220_v26  ;;  %v6742_v26 = vld [vmem:[#allocation10 + $0x68c] sm:$0xf]  ;;  %v5857_v12 = vld [vmem:[#allocation10 + $0x638] sm:$0xf0] }
 0x1bd   :  { %3532 = vmatpush.bf16.msra.mxu2 %v5348_v27  ;;  %v5905_v27 = vld [vmem:[#allocation10 + $0x698] sm:$0xf0]  ;;  %v5860_v19 = vor.u32 %v6730_v58, %v5857_v12 }
 0x1be   :  { %3545 = vmatpush.bf16.msra.mxu3 %v5476_v31  ;;  %v5908_v29 = vor.u32 %v6742_v26, %v5905_v27  ;;  %v5633_v31 = vld [vmem:[#allocation10 + $0x478] sm:$0xf0]  ;;  %v6758_v27 = vld [vmem:[#allocation10 + $0x70c] sm:$0xf] }
 0x1bf   :  { %3507 = vmatpush.bf16.msra.mxu0 %v5076_v41  ;;  %v7360_v28 = vpop.f32.mrf.mxu0  ;;  %v6017_v41 = vld [vmem:[#allocation10 + $0x778] sm:$0xf0]  ;;  %v5636_v62 = vor.u32 %v6674_v30, %v5633_v31 }
 0x1c0   :  { %3520 = vmatpush.bf16.msra.mxu1 %v5204_v44  ;;  %v7362_v36 = vpop.f32.mrf.mxu1  ;;  %v6670_v44 = vld [vmem:[#allocation10 + $0x44c] sm:$0xf]  ;;  %v5985_v14 = vld [vmem:[#allocation10 + $0x738] sm:$0xf0] }
 0x1c1   :  { %3533 = vmatpush.bf16.msra.mxu2 %v5332_v45  ;;  %v5617_v45 = vld [vmem:[#allocation10 + $0x458] sm:$0xf0] }
 0x1c2   :  { %3546 = vmatpush.bf16.msra.mxu3 %v5460_v35  ;;  %3508 = vmatmul.bf16.vlgmr.msra.gmra.mxu0 %v7276_v4  ;;  %v6033_v4 = vld [vmem:[#allocation10 + $0x798] sm:$0xf0]  ;;  %v6020_v35 = vor.u32 %v6770_v20, %v6017_v41 }
 0x1c3   :  { %3552 = vmatpush.bf16.msrb.mxu0 %v5700_v47  ;;  %3521 = vmatmul.bf16.vlgmr.msra.gmra.mxu1 %v7280_v11  ;;  %v6036_v37 = vor.u32 %v6774_v5, %v6033_v4  ;;  %v5745_v47 = vld [vmem:[#allocation10 + $0x558] sm:$0xf0]  ;;  %v3302_v4 = vadd.f32 %v7360_v28, %v1901_v16  ;;  %v6835_v28 = vld [vmem:[#allocation13 + $0x70] sm:$0xff]  ;;  %v6838_v16 = vld [vmem:[#allocation13 + $0x88] sm:$0xff] }
 0x1c4   :  { %3565 = vmatpush.bf16.msrb.mxu1 %v5828_v48  ;;  %3534 = vmatmul.bf16.vlgmr.msra.gmra.mxu2 %v7274_v1  ;;  %v6710_v1 = vld [vmem:[#allocation10 + $0x58c] sm:$0xf]  ;;  %v5748_v53 = vor.u32 %v6702_v10, %v5745_v47  ;;  %v5969_v5 = vld [vmem:[#allocation10 + $0x718] sm:$0xf0] }
 0x1c5   :  { %3578 = vmatpush.bf16.msrb.mxu2 %v5956_v49  ;;  %3547 = vmatmul.bf16.vlgmr.msra.gmra.mxu3 %v7278_v6  ;;  %v5652_v6 = vor.u32 %v6678_v23, %v5649_v54  ;;  %v5780_v11 = vor.u32 %v6710_v1, %v5777_v24  ;;  %v6734_v48 = vld [vmem:[#allocation10 + $0x64c] sm:$0xf]  ;;  %v5873_v49 = vld [vmem:[#allocation10 + $0x658] sm:$0xf0]  ;;  %v5972_v30 = vor.u32 %v6758_v27, %v5969_v5 }
 0x1c6   :  { %3591 = vmatpush.bf16.msrb.mxu3 %v6084_v32  ;;  %v5620_v32 = vor.u32 %v6670_v44, %v5617_v45  ;;  %v5876_v55 = vor.u32 %v6734_v48, %v5873_v49  ;;  %v5713_v1 = vld [vmem:[#allocation10 + $0x518] sm:$0xf0]  ;;  %v6823_v48 = vld [vmem:[#allocation13 + $0x10] sm:$0xff] }
 0x1c7   :  { %3553 = vmatpush.bf16.msrb.mxu0 %v5684_v59  ;;  %v7364_v46 = vpop.f32.mrf.mxu2  ;;  %v3303_v52 = vpop.f32.mrf.mxu0  ;;  %v6698_v59 = vld [vmem:[#allocation10 + $0x52c] sm:$0xf]  ;;  %v5841_v24 = vld [vmem:[#allocation10 + $0x618] sm:$0xf0] }
 0x1c8   :  { %3566 = vmatpush.bf16.msrb.mxu1 %v5812_v60  ;;  %v7366_v15 = vpop.f32.mrf.mxu3  ;;  %v3316_v60 = vpop.f32.mrf.mxu1  ;;  %v5732_v18 = vor.u32 %v6698_v59, %v5729_v3  ;;  %v6828_v31 = vld [vmem:[#allocation13 + $0x38] sm:$0xff]  ;;  %v6822_v52 = vld [vmem:[#allocation13 + $0x8] sm:$0xff]  ;;  %v6821_v59 = vld [vmem:[#allocation13] sm:$0xff] }
 0x1c9   :  { %3579 = vmatpush.bf16.msrb.mxu2 %v5940_v63  ;;  %v6004_v63 = vor.u32 %v6766_v50, %v6001_v33  ;;  %v6844_v41 = vld [vmem:[#allocation13 + $0xb8] sm:$0xff]  ;;  %v6831_v50 = vld [vmem:[#allocation13 + $0x50] sm:$0xff]  ;;  %v6829_v60 = vld [vmem:[#allocation13 + $0x40] sm:$0xff] }
 0x1ca   :  { %3592 = vmatpush.bf16.msrb.mxu3 %v6068_v13  ;;  %v6762_v13 = vld [vmem:[#allocation10 + $0x72c] sm:$0xf]  ;;  %v6840_v57 = vld [vmem:[#allocation13 + $0x98] sm:$0xff]  ;;  %v6839_v3 = vld [vmem:[#allocation13 + $0x90] sm:$0xff] }
 0x1cb   :  { %3554 = vmatpush.bf16.msrb.mxu0 %v5668_v39  ;;  %v6662_v39 = vld [vmem:[#allocation10 + $0x40c] sm:$0xf]  ;;  %v5988_v54 = vor.u32 %v6762_v13, %v5985_v14  ;;  %v6804_v58 = vld [vmem:[#allocation11 + $0x78] sm:$0xff]  ;;  %v3680_v13 = vpack.c.bf16 %v7353_v8, %v7353_v8  ;;  %v6795_v14 = vld [vmem:[#allocation11 + $0x30] sm:$0xff] }
 0x1cc   :  { %3567 = vmatpush.bf16.msrb.mxu1 %v5796_v21  ;;  %v5585_v21 = vld [vmem:[#allocation10 + $0x418] sm:$0xf0]  ;;  %v6811_v8 = vld [vmem:[#allocation11 + $0xb0] sm:$0xff] }
 0x1cd   :  { %3580 = vmatpush.bf16.msrb.mxu2 %v5924_v22  ;;  %v6694_v22 = vld [vmem:[#allocation10 + $0x50c] sm:$0xf] }
 0x1ce   :  { %3593 = vmatpush.bf16.msrb.mxu3 %v6052_v25  ;;  %v6726_v25 = vld [vmem:[#allocation10 + $0x60c] sm:$0xf] }
 0x1cf   :  { %3555 = vmatpush.bf16.msrb.mxu0 %v5652_v6  ;;  %v3329_v23 = vpop.f32.mrf.mxu2  ;;  %v5588_v6 = vor.u32 %v6662_v39, %v5585_v21  ;;  %v6794_v39 = vld [vmem:[#allocation11 + $0x28] sm:$0xff] }
 0x1d0   :  { %3568 = vmatpush.bf16.msrb.mxu1 %v5780_v11  ;;  %v3342_v26 = vpop.f32.mrf.mxu3  ;;  %v5716_v11 = vor.u32 %v6694_v22, %v5713_v1  ;;  %v6802_v21 = vld [vmem:[#allocation11 + $0x68] sm:$0xff]  ;;  %v6793_v22 = vld [vmem:[#allocation11 + $0x20] sm:$0xff] }
 0x1d1   :  { %3581 = vmatpush.bf16.msrb.mxu2 %v5908_v29  ;;  %v5844_v29 = vor.u32 %v6726_v25, %v5841_v24  ;;  %v6801_v23 = vld [vmem:[#allocation11 + $0x60] sm:$0xff]  ;;  %v6792_v25 = vld [vmem:[#allocation11 + $0x18] sm:$0xff]  ;;  %v6810_v26 = vld [vmem:[#allocation11 + $0xa8] sm:$0xff] }
 0x1d2   :  { %3594 = vmatpush.bf16.msrb.mxu3 %v6036_v37  ;;  %v3315_v37 = vadd.f32 %v7362_v36, %v3302_v4  ;;  %v6826_v36 = vld [vmem:[#allocation13 + $0x28] sm:$0xff]  ;;  %v6800_v24 = vld [vmem:[#allocation11 + $0x58] sm:$0xff]  ;;  %v6791_v4 = vld [vmem:[#allocation11 + $0x10] sm:$0xff] }
 0x1d3   :  { %3556 = vmatpush.bf16.msrb.mxu0 %v5636_v62  ;;  %v6825_v62 = vld [vmem:[#allocation13 + $0x20] sm:$0xff] }
 0x1d4   :  { %3569 = vmatpush.bf16.msrb.mxu1 %v5764_v42  ;;  %v3328_v40 = vadd.f32 %v7364_v46, %v3315_v37  ;;  %v6833_v42 = vld [vmem:[#allocation13 + $0x60] sm:$0xff]  ;;  %v6842_v46 = vld [vmem:[#allocation13 + $0xa8] sm:$0xff]  ;;  %v1902_v37 = vperm.slane %v7342_v56, 2 }
 0x1d5   :  { %3582 = vmatpush.bf16.msrb.mxu2 %v5892_v43  ;;  %v6870_v56 = vld [vmem:[#allocation14 + $0x8] sm:$0xff] }
 0x1d6   :  { %3595 = vmatpush.bf16.msrb.mxu3 %v6020_v35  ;;  %v3341_v20 = vadd.f32 %v7366_v15, %v3328_v40 }
 0x1d7   :  { %3557 = vmatpush.bf16.msrb.mxu0 %v5620_v32  ;;  %v6841_v32 = vld [vmem:[#allocation13 + $0xa0] sm:$0xff] }
 0x1d8   :  { %3570 = vmatpush.bf16.msrb.mxu1 %v5748_v53  ;;  %v6830_v53 = vld [vmem:[#allocation13 + $0x48] sm:$0xff] }
 0x1d9   :  { %3583 = vmatpush.bf16.msrb.mxu2 %v5876_v55 }
 0x1da   :  { %3596 = vmatpush.bf16.msrb.mxu3 %v6004_v63  ;;  %v6796_v63 = vld [vmem:[#allocation11 + $0x38] sm:$0xff] }
 0x1db   :  { %3558 = vmatpush.bf16.msrb.mxu0 %v5604_v17  ;;  %v6803_v17 = vld [vmem:[#allocation11 + $0x70] sm:$0xff] }
 0x1dc   :  { %3571 = vmatpush.bf16.msrb.mxu1 %v5732_v18  ;;  %v6837_v18 = vld [vmem:[#allocation13 + $0x80] sm:$0xff] }
 0x1dd   :  { %3584 = vmatpush.bf16.msrb.mxu2 %v5860_v19  ;;  %v6812_v19 = vld [vmem:[#allocation11 + $0xb8] sm:$0xff] }
 0x1de   :  { %3597 = vmatpush.bf16.msrb.mxu3 %v5988_v54 }
 0x1df   :  { %3559 = vmatpush.bf16.msrb.mxu0 %v5588_v6  ;;  %v6799_v6 = vld [vmem:[#allocation11 + $0x50] sm:$0xff] }
 0x1e0   :  { %3572 = vmatpush.bf16.msrb.mxu1 %v5716_v11  ;;  %v3366_v44 = vpop.f32.mrf.mxu1 }
 0x1e1   :  { %3585 = vmatpush.bf16.msrb.mxu2 %v5844_v29  ;;  %v6809_v29 = vld [vmem:[#allocation11 + $0xa0] sm:$0xff] }
 0x1e2   :  { %3598 = vmatpush.bf16.msrb.mxu3 %v5972_v30  ;;  %3560 = vmatmul.bf16.vlgmr.msrb.gmra.mxu0 %v7290_v0  ;;  %v3353_v0 = vpop.f32.mrf.mxu0 }
 0x1e3   :  { %3940 = vmatpush.bf16.msra.mxu0 %v6828_v31  ;;  %3573 = vmatmul.bf16.vlgmr.msrb.gmra.mxu1 %v7294_v7  ;;  %v3354_v43 = vadd.f32 %v3353_v0, %v3341_v20  ;;  %v6843_v7 = vld [vmem:[#allocation13 + $0xb0] sm:$0xff]  ;;  %v6808_v31 = vld [vmem:[#allocation11 + $0x98] sm:$0xff]  ;;  %v6806_v0 = vld [vmem:[#allocation11 + $0x88] sm:$0xff] }
 0x1e4   :  { %3953 = vmatpush.bf16.msra.mxu1 %v6836_v34  ;;  %3586 = vmatmul.bf16.vlgmr.msrb.gmra.mxu2 %v7288_v61  ;;  %v6824_v61 = vld [vmem:[#allocation13 + $0x18] sm:$0xff]  ;;  %v6790_v34 = vld [vmem:[#allocation11 + $0x8] sm:$0xff] }
 0x1e5   :  { %3599 = vmatmul.bf16.vlgmr.msrb.gmra.mxu3 %v7292_v2  ;;  %3966 = vmatpush.bf16.msra.mxu2 %v6844_v41  ;;  %v3367_v45 = vadd.f32 %v3366_v44, %v3354_v43  ;;  %v6832_v2 = vld [vmem:[#allocation13 + $0x58] sm:$0xff]  ;;  %v6789_v41 = vld [vmem:[#allocation11] sm:$0xff] }
 0x1e6   :  { %v6869_v43 = vld [vmem:[#allocation14] sm:$0xff] }
 0x1e7   :  { %3941 = vmatpush.bf16.msra.mxu0 %v6827_v38  ;;  %v3379_v10 = vpop.f32.mrf.mxu2  ;;  %v6852_v38 = vld [vmem:[#allocation13 + $0xf8] sm:$0xff]  ;;  %v3612_v44 = vpack.c.bf16 %v6869_v43, %v6869_v43 }
 0x1e8   :  { %3954 = vmatpush.bf16.msra.mxu1 %v6835_v28  ;;  %v3380_v35 = vadd.f32 %v3379_v10, %v3367_v45  ;;  %v3392_v47 = vpop.f32.mrf.mxu3  ;;  %v3368_v33 = vpop.f32.mrf.mxu1  ;;  %v6798_v28 = vld [vmem:[#allocation11 + $0x48] sm:$0xff]  ;;  %3979 = vmatpush.bf16.msra.mxu3 %v6852_v38  ;;  %v6805_v45 = vld [vmem:[#allocation11 + $0x80] sm:$0xff]  ;;  %v6873_v43 = vld [vmem:[#allocation14 + $0x18] sm:$0xff] }
 0x1e9   :  { %3967 = vmatpush.bf16.msra.mxu2 %v6843_v7  ;;  %v3613_v7 = vpack.c.bf16 %v6870_v56, %v6870_v56 }
 0x1ea   :  { %v3393_v49 = vadd.f32 %v3392_v47, %v3380_v35  ;;  %v3355_v15 = vpop.f32.mrf.mxu0 }
 0x1eb   :  { %3942 = vmatpush.bf16.msra.mxu0 %v6826_v36 }
 0x1ec   :  { %3955 = vmatpush.bf16.msra.mxu1 %v6834_v51  ;;  %3609 = vst [vmem:[#allocation15 + $0x8] sm:$0xff] %v3393_v49  ;;  %v3681_v12 = vpack.c.bf16 %v3393_v49, %v3393_v49  ;;  %v6807_v51 = vld [vmem:[#allocation11 + $0x90] sm:$0xff]  ;;  %v6849_v49 = vld [vmem:[#allocation13 + $0xe0] sm:$0xff] }
 0x1ed   :  { %3968 = vmatpush.bf16.msra.mxu2 %v6842_v46  ;;  %v6850_v46 = vld [vmem:[#allocation13 + $0xe8] sm:$0xff] }
 0x1ef   :  { %3943 = vmatpush.bf16.msra.mxu0 %v6825_v62  ;;  %v3381_v55 = vpop.f32.mrf.mxu2  ;;  %v6797_v62 = vld [vmem:[#allocation11 + $0x40] sm:$0xff] }
 0x1f0   :  { %3956 = vmatpush.bf16.msra.mxu1 %v6833_v42  ;;  %v3394_v9 = vpop.f32.mrf.mxu3 }
 0x1f1   :  { %3969 = vmatpush.bf16.msra.mxu2 %v6841_v32 }
 0x1f3   :  { %3944 = vmatpush.bf16.msra.mxu0 %v6824_v61 }
 0x1f4   :  { %3957 = vmatpush.bf16.msra.mxu1 %v6832_v2  ;;  %v6851_v2 = vld [vmem:[#allocation13 + $0xf0] sm:$0xff] }
 0x1f5   :  { %3970 = vmatpush.bf16.msra.mxu2 %v6840_v57  ;;  %3980 = vmatpush.bf16.msra.mxu3 %v6851_v2 }
 0x1f7   :  { %3945 = vmatpush.bf16.msra.mxu0 %v6823_v48 }
 0x1f8   :  { %3958 = vmatpush.bf16.msra.mxu1 %v6831_v50 }
 0x1f9   :  { %3971 = vmatpush.bf16.msra.mxu2 %v6839_v3  ;;  %3981 = vmatpush.bf16.msra.mxu3 %v6850_v46  ;;  %v6846_v3 = vld [vmem:[#allocation13 + $0xc8] sm:$0xff] }
 0x1fb   :  { %3946 = vmatpush.bf16.msra.mxu0 %v6822_v52  ;;  %v6848_v52 = vld [vmem:[#allocation13 + $0xd8] sm:$0xff] }
 0x1fc   :  { %3959 = vmatpush.bf16.msra.mxu1 %v6830_v53 }
 0x1fd   :  { %3972 = vmatpush.bf16.msra.mxu2 %v6838_v16  ;;  %3982 = vmatpush.bf16.msra.mxu3 %v6849_v49  ;;  %v6819_v16 = vld [vmem:[#allocation11 + $0xf0] sm:$0xff] }
 0x1ff   :  { %3947 = vmatpush.bf16.msra.mxu0 %v6821_v59  ;;  %v3405_v54 = vpop.f32.mrf.mxu0  ;;  %v6847_v59 = vld [vmem:[#allocation13 + $0xd0] sm:$0xff] }
 0x200   :  { %3960 = vmatpush.bf16.msra.mxu1 %v6829_v60  ;;  %v3418_v1 = vpop.f32.mrf.mxu1  ;;  %v3406_v20 = vadd.f32 %v3405_v54, %v1902_v37  ;;  %v6816_v54 = vld [vmem:[#allocation11 + $0xd8] sm:$0xff] }
 0x201   :  { %3973 = vmatpush.bf16.msra.mxu2 %v6837_v18  ;;  %3983 = vmatpush.bf16.msra.mxu3 %v6848_v52 }
 0x202   :  { %3948 = vmatmul.bf16.vlgmr.msra.gmra.mxu0 %v3680_v13  ;;  %v3419_v42 = vadd.f32 %v3418_v1, %v3406_v20  ;;  %v6871_v13 = vld [vmem:[#allocation14 + $0x10] sm:$0xff]  ;;  %v6872_v1 = vld [vmem:[%s7400_s5] sm:$0xf] }
 0x203   :  { %4184 = vmatpush.bf16.msrb.mxu0 %v6796_v63  ;;  %3961 = vmatmul.bf16.vlgmr.msra.gmra.mxu1 %v3681_v12  ;;  %v6820_v12 = vld [vmem:[#allocation11 + $0xf8] sm:$0xff] }
 0x204   :  { %4197 = vmatpush.bf16.msrb.mxu1 %v6804_v58  ;;  %v6845_v58 = vld [vmem:[#allocation13 + $0xc0] sm:$0xff] }
 0x205   :  { %4210 = vmatpush.bf16.msrb.mxu2 %v6812_v19  ;;  %3984 = vmatpush.bf16.msra.mxu3 %v6847_v59  ;;  %v6818_v19 = vld [vmem:[#allocation11 + $0xe8] sm:$0xff] }
 0x206   :  { %v6867_v59 = vld [vmem:[%s7403_s8] ss:$0 sm:$0xff] }
 0x207   :  { %4185 = vmatpush.bf16.msrb.mxu0 %v6795_v14  ;;  %v3431_v27 = vpop.f32.mrf.mxu2  ;;  %v3407_v11 = vpop.f32.mrf.mxu0  ;;  %v3614_v14 = vpack.c.bf16 %v6871_v13, %v6871_v13 }
 0x208   :  { %4198 = vmatpush.bf16.msrb.mxu1 %v6803_v17  ;;  %v3444_v5 = vpop.f32.mrf.mxu3  ;;  %v3420_v30 = vpop.f32.mrf.mxu1  ;;  %v3432_v61 = vadd.f32 %v3431_v27, %v3419_v42  ;;  %v6813_v11 = vld [vmem:[#allocation11 + $0xc0] sm:$0xff] }
 0x209   :  { %4211 = vmatpush.bf16.msrb.mxu2 %v6811_v8  ;;  %3985 = vmatpush.bf16.msra.mxu3 %v6846_v3 }
 0x20a   :  { %v3445_v10 = vadd.f32 %v3444_v5, %v3432_v61 }
 0x20b   :  { %4186 = vmatpush.bf16.msrb.mxu0 %v6794_v39 }
 0x20c   :  { %4199 = vmatpush.bf16.msrb.mxu1 %v6802_v21 }
 0x20d   :  { %4212 = vmatpush.bf16.msrb.mxu2 %v6810_v26  ;;  %3986 = vmatpush.bf16.msra.mxu3 %v6845_v58 }
 0x20f   :  { %4187 = vmatpush.bf16.msrb.mxu0 %v6793_v22  ;;  %v3433_v40 = vpop.f32.mrf.mxu2  ;;  %v6817_v22 = vld [vmem:[#allocation11 + $0xe0] sm:$0xff] }
 0x210   :  { %4200 = vmatpush.bf16.msrb.mxu1 %v6801_v23  ;;  %v3446_v36 = vpop.f32.mrf.mxu3 }
 0x211   :  { %4213 = vmatpush.bf16.msrb.mxu2 %v6809_v29  ;;  %4223 = vmatpush.bf16.msrb.mxu3 %v6820_v12 }
 0x213   :  { %4188 = vmatpush.bf16.msrb.mxu0 %v6792_v25  ;;  %v1903_v25 = vperm.slane %v6872_v1, 3 }
 0x214   :  { %4201 = vmatpush.bf16.msrb.mxu1 %v6800_v24  ;;  %v6815_v24 = vld [vmem:[#allocation11 + $0xd0] sm:$0xff] }
 0x215   :  { %4214 = vmatpush.bf16.msrb.mxu2 %v6808_v31  ;;  %4224 = vmatpush.bf16.msrb.mxu3 %v6819_v16 }
 0x217   :  { %4189 = vmatpush.bf16.msrb.mxu0 %v6791_v4  ;;  %v6814_v4 = vld [vmem:[#allocation11 + $0xc8] sm:$0xff] }
 0x218   :  { %4202 = vmatpush.bf16.msrb.mxu1 %v6799_v6 }
 0x219   :  { %4215 = vmatpush.bf16.msrb.mxu2 %v6807_v51  ;;  %4225 = vmatpush.bf16.msrb.mxu3 %v6818_v19 }
 0x21b   :  { %4190 = vmatpush.bf16.msrb.mxu0 %v6790_v34 }
 0x21c   :  { %4203 = vmatpush.bf16.msrb.mxu1 %v6798_v28 }
 0x21d   :  { %4216 = vmatpush.bf16.msrb.mxu2 %v6806_v0  ;;  %4226 = vmatpush.bf16.msrb.mxu3 %v6817_v22 }
 0x21f   :  { %4191 = vmatpush.bf16.msrb.mxu0 %v6789_v41  ;;  %v3457_v35 = vpop.f32.mrf.mxu0 }
 0x220   :  { %4204 = vmatpush.bf16.msrb.mxu1 %v6797_v62  ;;  %v3458_v47 = vadd.f32 %v3457_v35, %v3445_v10  ;;  %v3470_v48 = vpop.f32.mrf.mxu1 }
 0x221   :  { %4217 = vmatpush.bf16.msrb.mxu2 %v6805_v45  ;;  %4227 = vmatpush.bf16.msrb.mxu3 %v6816_v54 }
 0x222   :  { %4192 = vmatmul.bf16.vlgmr.msrb.gmra.mxu0 %v3612_v44  ;;  %v3471_v15 = vadd.f32 %v3470_v48, %v3458_v47  ;;  %v3615_v44 = vpack.c.bf16 %v6873_v43, %v6873_v43 }
 0x223   :  { %4205 = vmatmul.bf16.vlgmr.msrb.gmra.mxu1 %v3613_v7 }
 0x225   :  { %4228 = vmatpush.bf16.msrb.mxu3 %v6815_v24 }
 0x227   :  { %v3483_v50 = vpop.f32.mrf.mxu2  ;;  %v3459_v55 = vpop.f32.mrf.mxu0 }
 0x228   :  { %v3484_v33 = vadd.f32 %v3483_v50, %v3471_v15  ;;  %v3496_v32 = vpop.f32.mrf.mxu3  ;;  %v3472_v57 = vpop.f32.mrf.mxu1 }
 0x229   :  { %4229 = vmatpush.bf16.msrb.mxu3 %v6814_v4 }
 0x22a   :  { %v3497_v53 = vadd.f32 %v3496_v32, %v3484_v33 }
 0x22c   :  { %3610 = vst [vmem:[#allocation15 + $0x10] sm:$0xff] %v3497_v53  ;;  %v3682_v9 = vpack.c.bf16 %v3497_v53, %v3497_v53 }
 0x22d   :  { %4230 = vmatpush.bf16.msrb.mxu3 %v6813_v11 }
 0x22e   :  { %3974 = vmatmul.bf16.vlgmr.msra.gmra.mxu2 %v3682_v9 }
 0x22f   :  { %v3485_v60 = vpop.f32.mrf.mxu2 }
 0x230   :  { %v3498_v63 = vpop.f32.mrf.mxu3 }
 0x23e   :  { %4218 = vmatmul.bf16.vlgmr.msrb.gmra.mxu2 %v3614_v14 }
 0x23f   :  { %v3509_v17 = vpop.f32.mrf.mxu0 }
 0x240   :  { %v3522_v18 = vpop.f32.mrf.mxu1  ;;  %v3510_v5 = vadd.f32 %v3509_v17, %v1903_v25 }
 0x242   :  { %v3523_v6 = vadd.f32 %v3522_v18, %v3510_v5 }
 0x247   :  { %v3535_v39 = vpop.f32.mrf.mxu2  ;;  %v3511_v8 = vpop.f32.mrf.mxu0 }
 0x248   :  { %v3548_v21 = vpop.f32.mrf.mxu3  ;;  %v3524_v23 = vpop.f32.mrf.mxu1  ;;  %v3536_v29 = vadd.f32 %v3535_v39, %v3523_v6 }
 0x24a   :  { %v3549_v30 = vadd.f32 %v3548_v21, %v3536_v29 }
 0x24f   :  { %v3537_v26 = vpop.f32.mrf.mxu2 }
 0x250   :  { %v3550_v27 = vpop.f32.mrf.mxu3 }
 0x25f   :  { %v3561_v31 = vpop.f32.mrf.mxu0 }
 0x260   :  { %v3574_v34 = vpop.f32.mrf.mxu1  ;;  %v3562_v37 = vadd.f32 %v3561_v31, %v3549_v30 }
 0x262   :  { %v3575_v38 = vadd.f32 %v3574_v34, %v3562_v37 }
 0x267   :  { %v3587_v28 = vpop.f32.mrf.mxu2  ;;  %v3563_v51 = vpop.f32.mrf.mxu0 }
 0x268   :  { %v3588_v40 = vadd.f32 %v3587_v28, %v3575_v38  ;;  %v3600_v36 = vpop.f32.mrf.mxu3  ;;  %v3576_v20 = vpop.f32.mrf.mxu1 }
 0x26a   :  { %v3601_v41 = vadd.f32 %v3600_v36, %v3588_v40 }
 0x26c   :  { %3611 = vst [vmem:[#allocation15 + $0x18] sm:$0xff] %v3601_v41  ;;  %v3683_v62 = vpack.c.bf16 %v3601_v41, %v3601_v41 }
 0x26d   :  { %4263 = dma.vmem_to_hbm [thread:$0]  %s4259_s16, 512, %s4261_s15, [#allocation16]  }
 0x26e   :  { %3987 = vmatmul.bf16.vlgmr.msra.gmra.mxu3 %v3683_v62 }
 0x26f   :  { %v3589_v0 = vpop.f32.mrf.mxu2 }
 0x270   :  { %v3602_v42 = vpop.f32.mrf.mxu3 }
 0x27e   :  { %4231 = vmatmul.bf16.vlgmr.msrb.gmra.mxu3 %v3615_v44 }
 0x27f   :  { %v3949_v56 = vpop.f32.mrf.mxu0 }
 0x280   :  { %v3962_v7 = vpop.f32.mrf.mxu1 }
 0x281   :  { %v3963_v45 = vadd.f32 %v3962_v7, %v3949_v56 }
 0x287   :  { %v3951_v61 = vpop.f32.mrf.mxu0 }
 0x288   :  { %v3964_v2 = vpop.f32.mrf.mxu1 }
 0x29f   :  { %v4193_v10 = vpop.f32.mrf.mxu0 }
 0x2a0   :  { %v4206_v46 = vpop.f32.mrf.mxu1 }
 0x2a7   :  { %v4195_v35 = vpop.f32.mrf.mxu0 }
 0x2a8   :  { %v4208_v47 = vpop.f32.mrf.mxu1 }
 0x2b1   :  { %v3975_v48 = vpop.f32.mrf.mxu2 }
 0x2b2   :  { %v3976_v49 = vadd.f32 %v3975_v48, %v3963_v45 }
 0x2b9   :  { %v3977_v15 = vpop.f32.mrf.mxu2 }
 0x2c1   :  { %v4219_v50 = vpop.f32.mrf.mxu2 }
 0x2c9   :  { %v4221_v33 = vpop.f32.mrf.mxu2 }
 0x2f1   :  { %v3988_v32 = vpop.f32.mrf.mxu3 }
 0x2f2   :  { %v3989_v52 = vadd.f32 %v3988_v32, %v3976_v49 }
 0x2f4   :  { %v4194_v53 = vadd.f32 %v4193_v10, %v3989_v52 }
 0x2f6   :  { %v4207_v57 = vadd.f32 %v4206_v46, %v4194_v53 }
 0x2f8   :  { %v4220_v9 = vadd.f32 %v4219_v50, %v4207_v57 }
 0x2f9   :  { %v3990_v55 = vpop.f32.mrf.mxu3 }
 0x301   :  { %v4232_v60 = vpop.f32.mrf.mxu3 }
 0x302   :  { %v4233_v63 = vadd.f32 %v4232_v60, %v4220_v9 }
 0x304   :  { %v4240_v3 = vadd.f32 %v6867_v59, %v4233_v63 }
 0x306   :  { %4241 = vst [vmem:[#allocation17] sm:$0xff] %v4240_v3 }
 0x307   :  { %4274 = dma.vmem_to_hbm [thread:$0]  %s4270_s0, 128, %s4272_s24, [#allocation16]  }
 0x309   :  { %v4234_v58 = vpop.f32.mrf.mxu3 }
 0x30a   :  { %7122 = dma.done.wait [#allocation4], 512  }
 0x30b   :  { %7123 = vsyncadd [#allocation4], 4294966784 }
 0x30c   :  { %7124 = dma.done.wait [#allocation16], 640  }
 0x30d   :  { %7125 = vsyncadd [#allocation16], 4294966656 }
 0x30e   :  { %4287 = vsyncpa [#allocation3], 1 }
 0x30f   :  { %4288 = vsyncpa [#allocation6], 1 }
 0x310   :  { %4289 = vsyncpa [#allocation9], 1 }
 0x311   :  { %4290 = vsyncpa [#allocation12], 1 }
 0x312   :  { %4291 = vsyncpa [#allocation4], 1 }
 0x313   :  { %4292 = vsyncpa [#allocation16], 1 }

</bundles_post_ra>
